<compile_context>
chip_gen: v7x
topology: tpu7x:2x2x1
jax: 0.10.0
libtpu: 0.0.40
codegen_flags: <defaults>
</compile_context>

<pallas_src>
import jax
import jax.numpy as jnp
from jax import lax
from jax.experimental import pallas as pl
from jax.experimental.pallas import tpu as pltpu

_EPS = 1e-5

# ---- row-pack layout (indices into the [N_ROWS, 256] f32 operand) ----------
_ROW_WIN0, _ROW_WIN1 = 0, 1      # stem W^T rows (128 wide)
_ROW_G_IN, _ROW_B_IN = 2, 3      # stem BN gamma / beta (128 wide)
_ROW_RB1 = 4                     # rb1: g1, be1, g2, be2, bs   (5 rows, 256 wide)
_ROW_RB2 = 9                     # rb2: g1, be1, g2, be2       (4 rows, 256 wide)
_ROW_RB3 = 13
_ROW_RB4 = 17
_ROW_RB5 = 21                    # rb5: g1, be1, g2, be2, bs   (5 rows, 128 wide)
_ROW_B_OUT = 26                  # output-layer bias (1 wide)
_N_ROWS = 32


# --------------------------------------------------------------------------- #
# kernel
# --------------------------------------------------------------------------- #
def _deeper_residual_nn_kernel(x_ref, rows_ref, head_hbm, mid_hbm, tail_hbm,
                               o_ref, head_buf, mid_buf, tail_buf, sem):
    # ---- issue every weight DMA up front (HBM -> VMEM), in consumption order.
    # Waits are placed right before first use so each copy overlaps with the
    # compute of the preceding layers.
    head_cp = pltpu.make_async_copy(head_hbm, head_buf, sem.at[0])
    mid_cps = [pltpu.make_async_copy(mid_hbm.at[j], mid_buf.at[j], sem.at[1 + j])
               for j in range(3)]
    tail_cp = pltpu.make_async_copy(tail_hbm, tail_buf, sem.at[4])
    head_cp.start()
    for cp in mid_cps:
        cp.start()
    tail_cp.start()

    inv_n = 1.0 / x_ref.shape[0]   # true batch size (no batch padding here)

    def row(r, width=256):
        return rows_ref[r:r + 1, 0:width]                   # [1, width] f32

    def bn(h, g, be, *, relu):
        # training-mode BatchNorm1d: batch stats, biased two-pass variance
        mu = jnp.sum(h, axis=0, keepdims=True) * inv_n
        d = h - mu
        var = jnp.sum(d * d, axis=0, keepdims=True) * inv_n
        h = d * (lax.rsqrt(var + _EPS) * g) + be             # rsqrt -> EUP slot
        return jnp.maximum(h, 0.0) if relu else h

    def mm(a_bf16, w_bf16):
        return jnp.dot(a_bf16, w_bf16, preferred_element_type=jnp.float32)

    # ---- input stem: Linear(2,128) as a 2-term VPU outer product (bias is
    # dropped -- exactly cancelled by the BN mean subtraction), then BN + ReLU.
    h = (x_ref[:, 0:1] * row(_ROW_WIN0, 128) +
         x_ref[:, 1:2] * row(_ROW_WIN1, 128))                # [B, 128] f32
    h = bn(h, row(_ROW_G_IN, 128), row(_ROW_B_IN, 128), relu=True)

    # ---- rb1: 128 -> 256, Linear shortcut (weights in head_buf)
    head_cp.wait()
    hb = h.astype(jnp.bfloat16)                              # one cast, two uses
    identity = mm(hb, head_buf[128:256, :]) + row(_ROW_RB1 + 4)     # ws, bs
    out = bn(mm(hb, head_buf[0:128, :]),
             row(_ROW_RB1), row(_ROW_RB1 + 1), relu=True)
    out = bn(mm(out.astype(jnp.bfloat16), head_buf[256:512, :]),
             row(_ROW_RB1 + 2), row(_ROW_RB1 + 3), relu=False)
    h = jnp.maximum(out + identity, 0.0)                     # [B, 256] f32

    # ---- rb2..rb4: 256 -> 256, identity shortcut (weights stream into mid_buf)
    for j, base in enumerate((_ROW_RB2, _ROW_RB3, _ROW_RB4)):
        mid_cps[j].wait()
        out = bn(mm(h.astype(jnp.bfloat16), mid_buf[j, 0:256, :]),
                 row(base), row(base + 1), relu=True)
        out = bn(mm(out.astype(jnp.bfloat16), mid_buf[j, 256:512, :]),
                 row(base + 2), row(base + 3), relu=False)
        h = jnp.maximum(out + h, 0.0)                        # [B, 256] f32

    # ---- rb5: 256 -> 128, Linear shortcut, then output head (tail_buf)
    tail_cp.wait()
    hb = h.astype(jnp.bfloat16)                              # one cast, two uses
    identity = mm(hb, tail_buf[256:512, :]) + row(_ROW_RB5 + 4, 128)   # ws, bs
    out = bn(mm(hb, tail_buf[0:256, :]),
             row(_ROW_RB5, 128), row(_ROW_RB5 + 1, 128), relu=True)
    out = bn(mm(out.astype(jnp.bfloat16), tail_buf[512:640, :]),
             row(_ROW_RB5 + 2, 128), row(_ROW_RB5 + 3, 128), relu=False)
    h = jnp.maximum(out + identity, 0.0)                     # [B, 128] f32

    # output head: Linear(128,1) padded to 128 lanes (lane-dense store; col 0 real)
    o_ref[...] = (mm(h.astype(jnp.bfloat16), tail_buf[640:768, :])
                  + row(_ROW_B_OUT, 128)).astype(o_ref.dtype)


# --------------------------------------------------------------------------- #
# parameter init (PyTorch-shaped) and one-time packing into kernel operands
# --------------------------------------------------------------------------- #
def init_params(key):
    """Params matching nn.Linear default init; BN gamma/beta randomized so the
    kernel-vs-reference check exercises scale/shift wiring (PyTorch default is
    gamma=1, beta=0 -- the math is identical)."""
    ks = iter(jax.random.split(key, 32))

    def lin(out_f, in_f):
        kw, kb = jax.random.split(next(ks))
        lim = 1.0 / jnp.sqrt(in_f)
        w = jax.random.uniform(kw, (out_f, in_f), jnp.float32, -lim, lim)
        b = jax.random.uniform(kb, (out_f,), jnp.float32, -lim, lim)
        return w, b

    def bn(f):
        kg, kb = jax.random.split(next(ks))
        g = jax.random.uniform(kg, (f,), jnp.float32, 0.5, 1.5)
        be = jax.random.uniform(kb, (f,), jnp.float32, -0.5, 0.5)
        return g, be

    def resblock(in_f, out_f):
        d = {}
        d["w1"], d["b1"] = lin(out_f, in_f)
        d["g1"], d["be1"] = bn(out_f)
        d["w2"], d["b2"] = lin(out_f, out_f)
        d["g2"], d["be2"] = bn(out_f)
        if in_f != out_f:
            d["ws"], d["bs"] = lin(out_f, in_f)
        return d

    p = {"in": {}, "out": {}}
    p["in"]["w"], p["in"]["b"] = lin(128, 2)
    p["in"]["g"], p["in"]["be"] = bn(128)
    p["rb1"] = resblock(128, 256)
    p["rb2"] = resblock(256, 256)
    p["rb3"] = resblock(256, 256)
    p["rb4"] = resblock(256, 256)
    p["rb5"] = resblock(256, 128)
    p["out"]["w"], p["out"]["b"] = lin(1, 128)
    return p


def _rowvec(v):
    v = jnp.asarray(v, jnp.float32).reshape(-1)
    return jnp.pad(v, (0, 256 - v.shape[0]))


def _t(w):
    """PyTorch Linear weight [out, in] -> kernel operand [in, out] bf16."""
    return jnp.asarray(w, jnp.float32).T.astype(jnp.bfloat16)


def pack_params(p):
    """One-time coalescing: 1 f32 row-pack + 3 bf16 weight packs."""
    win_t = jnp.asarray(p["in"]["w"], jnp.float32).T                # [2, 128]
    rows = [_rowvec(win_t[0]), _rowvec(win_t[1]),
            _rowvec(p["in"]["g"]), _rowvec(p["in"]["be"])]
    rows += [_rowvec(p["rb1"][k]) for k in ("g1", "be1", "g2", "be2", "bs")]
    for n in ("rb2", "rb3", "rb4"):
        rows += [_rowvec(p[n][k]) for k in ("g1", "be1", "g2", "be2")]
    rows += [_rowvec(p["rb5"][k]) for k in ("g1", "be1", "g2", "be2", "bs")]
    rows += [_rowvec(p["out"]["b"])]
    while len(rows) < _N_ROWS:
        rows.append(jnp.zeros((256,), jnp.float32))
    rows = jnp.stack(rows, 0)                                        # [32, 256] f32

    head = jnp.concatenate([_t(p["rb1"]["w1"]),                      # [128, 256]
                            _t(p["rb1"]["ws"]),                      # [128, 256]
                            _t(p["rb1"]["w2"])], 0)                  # [512, 256] bf16
    mid = jnp.stack([jnp.concatenate([_t(p[n]["w1"]), _t(p[n]["w2"])], 0)
                     for n in ("rb2", "rb3", "rb4")], 0)             # [3, 512, 256] bf16
    w_out_t = jnp.pad(jnp.asarray(p["out"]["w"], jnp.float32).T,
                      ((0, 0), (0, 127))).astype(jnp.bfloat16)       # [128, 128]
    tail = jnp.concatenate([_t(p["rb5"]["w1"]),                      # [256, 128]
                            _t(p["rb5"]["ws"]),                      # [256, 128]
                            _t(p["rb5"]["w2"]),                      # [128, 128]
                            w_out_t], 0)                             # [768, 128] bf16
    return rows, head, mid, tail


# --------------------------------------------------------------------------- #
# wrapper
# --------------------------------------------------------------------------- #
def deeper_residual_nn(x, packed):
    """x: [B, 2] f32. packed: output of pack_params. Returns [B, 1] f32."""
    rows, head, mid, tail = packed
    B = x.shape[0]
    out_pad = pl.pallas_call(
        _deeper_residual_nn_kernel,
        out_shape=jax.ShapeDtypeStruct((B, 128), jnp.float32),
        grid=(1,),
        in_specs=[
            pl.BlockSpec((B, 2), lambda i: (0, 0)),              # x (auto-DMA, tiny)
            pl.BlockSpec((_N_ROWS, 256), lambda i: (0, 0)),      # row pack (auto-DMA)
            pl.BlockSpec(memory_space=pl.ANY),                   # rb1 weights  (manual DMA)
            pl.BlockSpec(memory_space=pl.ANY),                   # rb2-4 weights (manual DMA)
            pl.BlockSpec(memory_space=pl.ANY),                   # rb5+head weights (manual DMA)
        ],
        out_specs=pl.BlockSpec((B, 128), lambda i: (0, 0)),
        scratch_shapes=[
            pltpu.VMEM((512, 256), jnp.bfloat16),        # rb1 pack
            pltpu.VMEM((3, 512, 256), jnp.bfloat16),     # rb2-4 packs
            pltpu.VMEM((768, 128), jnp.bfloat16),        # rb5 + output head pack
            pltpu.SemaphoreType.DMA((5,)),
        ],
        compiler_params=pltpu.CompilerParams(
            dimension_semantics=("arbitrary",),
            vmem_limit_bytes=32 * 1024 * 1024,   # ~1.3 MiB resident; safe on v7x too
        ),
    )(x.astype(jnp.float32), rows, head, mid, tail)
    return out_pad[:, :1]


# --------------------------------------------------------------------------- #
# pure-JAX reference of the PyTorch forward (training-mode BatchNorm1d).
# Matmuls that the kernel runs on the MXU use the same bf16-operand /
# f32-accumulate precision here; the stem (a f32 VPU outer product in the
# kernel) is kept in full f32, so the comparison isolates kernel correctness.
# --------------------------------------------------------------------------- #
def _reference(x, p):
    def mm_bf16(a, w):   # w is PyTorch-shaped [out, in]
        return jnp.dot(a.astype(jnp.bfloat16), w.T.astype(jnp.bfloat16),
                       preferred_element_type=jnp.float32)

    def bn(h, g, be):
        mu = jnp.mean(h, axis=0, keepdims=True)
        var = jnp.mean((h - mu) ** 2, axis=0, keepdims=True)
        return (h - mu) / jnp.sqrt(var + _EPS) * g + be

    def block(h, b):
        identity = mm_bf16(h, b["ws"]) + b["bs"] if "ws" in b else h
        out = jax.nn.relu(bn(mm_bf16(h, b["w1"]) + b["b1"], b["g1"], b["be1"]))
        out = bn(mm_bf16(out, b["w2"]) + b["b2"], b["g2"], b["be2"])
        return jax.nn.relu(out + identity)

    h = jnp.dot(x, jnp.asarray(p["in"]["w"], jnp.float32).T,
                precision=lax.Precision.HIGHEST) + p["in"]["b"]
    h = jax.nn.relu(bn(h, p["in"]["g"], p["in"]["be"]))
    for name in ("rb1", "rb2", "rb3", "rb4", "rb5"):
        h = block(h, p[name])
    return mm_bf16(h, p["out"]["w"]) + p["out"]["b"]


if __name__ == "__main__":
    key = jax.random.PRNGKey(0)
    k_x, k_p = jax.random.split(key)

    batch, in_features = 16, 2                   # DeeperResidualNN takes 2 features
    x = jax.random.normal(k_x, (batch, in_features), jnp.float32)

    params = init_params(k_p)
    packed = pack_params(params)                 # one-time weight coalescing / bf16 cast

    out = deeper_residual_nn(x, packed)
    out = jax.block_until_ready(out)

    ref = _reference(x, params)
    assert out.shape == (batch, 1)
    assert jnp.allclose(out, ref, atol=5e-3, rtol=5e-3), "mismatch vs reference"

    print("KERNEL_OK")
</pallas_src>

<mosaic_0001>
module attributes {stable_mosaic.version = 11 : i64} {
  func.func @_deeper_residual_nn_kernel(%arg0: i32, %arg1: memref<16x2xf32, #tpu.memory_space<vmem>>, %arg2: memref<32x256xf32, #tpu.memory_space<vmem>>, %arg3: memref<512x256xbf16, #tpu.memory_space<any>>, %arg4: memref<3x512x256xbf16, #tpu.memory_space<any>>, %arg5: memref<768x128xbf16, #tpu.memory_space<any>>, %arg6: memref<16x128xf32, #tpu.memory_space<vmem>>, %arg7: memref<512x256xbf16, #tpu.memory_space<vmem>>, %arg8: memref<3x512x256xbf16, #tpu.memory_space<vmem>>, %arg9: memref<768x128xbf16, #tpu.memory_space<vmem>>, %arg10: memref<5x!tpu.dma_semaphore, #tpu.memory_space<semaphore_mem>>) attributes {dimension_semantics = [#tpu.dimension_semantics<arbitrary>], iteration_bounds = array<i64: 1>, scalar_prefetch = 0 : i64, scratch_operands = 4 : i64, tpu.core_type = #tpu.core_type<tc>, window_params = [{pipeline_mode = #tpu.pipeline_mode<synchronous>, transform_indices = @transform_0, window_bounds = array<i64: 16, 2>}, {pipeline_mode = #tpu.pipeline_mode<synchronous>, transform_indices = @transform_1, window_bounds = array<i64: 32, 256>}, {}, {}, {}, {pipeline_mode = #tpu.pipeline_mode<synchronous>, transform_indices = @transform_5, window_bounds = array<i64: 16, 128>}]} {
    %c0_i32 = arith.constant 0 : i32
    %0 = tpu.memref_slice %arg10[%c0_i32] : memref<5x!tpu.dma_semaphore, #tpu.memory_space<semaphore_mem>> -> memref<1x!tpu.dma_semaphore, #tpu.memory_space<semaphore_mem>>
    %1 = tpu.memref_squeeze %0 : memref<1x!tpu.dma_semaphore, #tpu.memory_space<semaphore_mem>> -> memref<!tpu.dma_semaphore, #tpu.memory_space<semaphore_mem>>
    tpu.enqueue_dma source(%arg3 : memref<512x256xbf16, #tpu.memory_space<any>>) target(%arg7 : memref<512x256xbf16, #tpu.memory_space<vmem>>) target_semaphore(%1 : memref<!tpu.dma_semaphore, #tpu.memory_space<semaphore_mem>>)
    %c0_i32_0 = arith.constant 0 : i32
    %c0_i32_1 = arith.constant 0 : i32
    %c1_i32 = arith.constant 1 : i32
    %c0_i32_2 = arith.constant 0 : i32
    %c0_i32_3 = arith.constant 0 : i32
    %2 = tpu.memref_slice %arg4[%c0_i32_0, %c0_i32_2, %c0_i32_3] : memref<3x512x256xbf16, #tpu.memory_space<any>> -> memref<1x512x256xbf16, #tpu.memory_space<any>>
    %3 = tpu.memref_squeeze %2 : memref<1x512x256xbf16, #tpu.memory_space<any>> -> memref<512x256xbf16, #tpu.memory_space<any>>
    %c0_i32_4 = arith.constant 0 : i32
    %c0_i32_5 = arith.constant 0 : i32
    %4 = tpu.memref_slice %arg8[%c0_i32_1, %c0_i32_4, %c0_i32_5] : memref<3x512x256xbf16, #tpu.memory_space<vmem>> -> memref<1x512x256xbf16, #tpu.memory_space<vmem>>
    %5 = tpu.memref_squeeze %4 : memref<1x512x256xbf16, #tpu.memory_space<vmem>> -> memref<512x256xbf16, #tpu.memory_space<vmem>>
    %6 = tpu.memref_slice %arg10[%c1_i32] : memref<5x!tpu.dma_semaphore, #tpu.memory_space<semaphore_mem>> -> memref<1x!tpu.dma_semaphore, #tpu.memory_space<semaphore_mem>>
    %7 = tpu.memref_squeeze %6 : memref<1x!tpu.dma_semaphore, #tpu.memory_space<semaphore_mem>> -> memref<!tpu.dma_semaphore, #tpu.memory_space<semaphore_mem>>
    tpu.enqueue_dma source(%3 : memref<512x256xbf16, #tpu.memory_space<any>>) target(%5 : memref<512x256xbf16, #tpu.memory_space<vmem>>) target_semaphore(%7 : memref<!tpu.dma_semaphore, #tpu.memory_space<semaphore_mem>>)
    %c1_i32_6 = arith.constant 1 : i32
    %c1_i32_7 = arith.constant 1 : i32
    %c2_i32 = arith.constant 2 : i32
    %c0_i32_8 = arith.constant 0 : i32
    %c0_i32_9 = arith.constant 0 : i32
    %8 = tpu.memref_slice %arg4[%c1_i32_6, %c0_i32_8, %c0_i32_9] : memref<3x512x256xbf16, #tpu.memory_space<any>> -> memref<1x512x256xbf16, #tpu.memory_space<any>>
    %9 = tpu.memref_squeeze %8 : memref<1x512x256xbf16, #tpu.memory_space<any>> -> memref<512x256xbf16, #tpu.memory_space<any>>
    %c0_i32_10 = arith.constant 0 : i32
    %c0_i32_11 = arith.constant 0 : i32
    %10 = tpu.memref_slice %arg8[%c1_i32_7, %c0_i32_10, %c0_i32_11] : memref<3x512x256xbf16, #tpu.memory_space<vmem>> -> memref<1x512x256xbf16, #tpu.memory_space<vmem>>
    %11 = tpu.memref_squeeze %10 : memref<1x512x256xbf16, #tpu.memory_space<vmem>> -> memref<512x256xbf16, #tpu.memory_space<vmem>>
    %12 = tpu.memref_slice %arg10[%c2_i32] : memref<5x!tpu.dma_semaphore, #tpu.memory_space<semaphore_mem>> -> memref<1x!tpu.dma_semaphore, #tpu.memory_space<semaphore_mem>>
    %13 = tpu.memref_squeeze %12 : memref<1x!tpu.dma_semaphore, #tpu.memory_space<semaphore_mem>> -> memref<!tpu.dma_semaphore, #tpu.memory_space<semaphore_mem>>
    tpu.enqueue_dma source(%9 : memref<512x256xbf16, #tpu.memory_space<any>>) target(%11 : memref<512x256xbf16, #tpu.memory_space<vmem>>) target_semaphore(%13 : memref<!tpu.dma_semaphore, #tpu.memory_space<semaphore_mem>>)
    %c2_i32_12 = arith.constant 2 : i32
    %c2_i32_13 = arith.constant 2 : i32
    %c3_i32 = arith.constant 3 : i32
    %c0_i32_14 = arith.constant 0 : i32
    %c0_i32_15 = arith.constant 0 : i32
    %14 = tpu.memref_slice %arg4[%c2_i32_12, %c0_i32_14, %c0_i32_15] : memref<3x512x256xbf16, #tpu.memory_space<any>> -> memref<1x512x256xbf16, #tpu.memory_space<any>>
    %15 = tpu.memref_squeeze %14 : memref<1x512x256xbf16, #tpu.memory_space<any>> -> memref<512x256xbf16, #tpu.memory_space<any>>
    %c0_i32_16 = arith.constant 0 : i32
    %c0_i32_17 = arith.constant 0 : i32
    %16 = tpu.memref_slice %arg8[%c2_i32_13, %c0_i32_16, %c0_i32_17] : memref<3x512x256xbf16, #tpu.memory_space<vmem>> -> memref<1x512x256xbf16, #tpu.memory_space<vmem>>
    %17 = tpu.memref_squeeze %16 : memref<1x512x256xbf16, #tpu.memory_space<vmem>> -> memref<512x256xbf16, #tpu.memory_space<vmem>>
    %18 = tpu.memref_slice %arg10[%c3_i32] : memref<5x!tpu.dma_semaphore, #tpu.memory_space<semaphore_mem>> -> memref<1x!tpu.dma_semaphore, #tpu.memory_space<semaphore_mem>>
    %19 = tpu.memref_squeeze %18 : memref<1x!tpu.dma_semaphore, #tpu.memory_space<semaphore_mem>> -> memref<!tpu.dma_semaphore, #tpu.memory_space<semaphore_mem>>
    tpu.enqueue_dma source(%15 : memref<512x256xbf16, #tpu.memory_space<any>>) target(%17 : memref<512x256xbf16, #tpu.memory_space<vmem>>) target_semaphore(%19 : memref<!tpu.dma_semaphore, #tpu.memory_space<semaphore_mem>>)
    %c4_i32 = arith.constant 4 : i32
    %20 = tpu.memref_slice %arg10[%c4_i32] : memref<5x!tpu.dma_semaphore, #tpu.memory_space<semaphore_mem>> -> memref<1x!tpu.dma_semaphore, #tpu.memory_space<semaphore_mem>>
    %21 = tpu.memref_squeeze %20 : memref<1x!tpu.dma_semaphore, #tpu.memory_space<semaphore_mem>> -> memref<!tpu.dma_semaphore, #tpu.memory_space<semaphore_mem>>
    tpu.enqueue_dma source(%arg5 : memref<768x128xbf16, #tpu.memory_space<any>>) target(%arg9 : memref<768x128xbf16, #tpu.memory_space<vmem>>) target_semaphore(%21 : memref<!tpu.dma_semaphore, #tpu.memory_space<semaphore_mem>>)
    %c0 = arith.constant 0 : index
    %c0_18 = arith.constant 0 : index
    %22 = vector.load %arg1[%c0, %c0_18] : memref<16x2xf32, #tpu.memory_space<vmem>>, vector<16x1xf32>
    %c0_19 = arith.constant 0 : index
    %c0_20 = arith.constant 0 : index
    %23 = vector.load %arg2[%c0_19, %c0_20] : memref<32x256xf32, #tpu.memory_space<vmem>>, vector<1x128xf32>
    %24 = vector.broadcast %22 : vector<16x1xf32> to vector<16x128xf32>
    %25 = vector.broadcast %23 : vector<1x128xf32> to vector<16x128xf32>
    %26 = arith.mulf %24, %25 : vector<16x128xf32>
    %c0_21 = arith.constant 0 : index
    %c1 = arith.constant 1 : index
    %27 = vector.load %arg1[%c0_21, %c1] : memref<16x2xf32, #tpu.memory_space<vmem>>, vector<16x1xf32>
    %c1_22 = arith.constant 1 : index
    %c0_23 = arith.constant 0 : index
    %28 = vector.load %arg2[%c1_22, %c0_23] : memref<32x256xf32, #tpu.memory_space<vmem>>, vector<1x128xf32>
    %29 = vector.broadcast %27 : vector<16x1xf32> to vector<16x128xf32>
    %30 = vector.broadcast %28 : vector<1x128xf32> to vector<16x128xf32>
    %31 = arith.mulf %29, %30 : vector<16x128xf32>
    %32 = arith.addf %26, %31 : vector<16x128xf32>
    %c2 = arith.constant 2 : index
    %c0_24 = arith.constant 0 : index
    %33 = vector.load %arg2[%c2, %c0_24] : memref<32x256xf32, #tpu.memory_space<vmem>>, vector<1x128xf32>
    %c3 = arith.constant 3 : index
    %c0_25 = arith.constant 0 : index
    %34 = vector.load %arg2[%c3, %c0_25] : memref<32x256xf32, #tpu.memory_space<vmem>>, vector<1x128xf32>
    %cst = arith.constant dense<0.000000e+00> : vector<128xf32>
    %35 = vector.multi_reduction <add>, %32, %cst [0] : vector<16x128xf32> to vector<128xf32>
    %36 = vector.shape_cast %35 : vector<128xf32> to vector<1x128xf32>
    %cst_26 = arith.constant 6.250000e-02 : f32
    %37 = vector.broadcast %cst_26 : f32 to vector<1x128xf32>
    %38 = arith.mulf %36, %37 : vector<1x128xf32>
    %39 = vector.broadcast %38 : vector<1x128xf32> to vector<16x128xf32>
    %40 = arith.subf %32, %39 : vector<16x128xf32>
    %41 = arith.mulf %40, %40 : vector<16x128xf32>
    %cst_27 = arith.constant dense<0.000000e+00> : vector<128xf32>
    %42 = vector.multi_reduction <add>, %41, %cst_27 [0] : vector<16x128xf32> to vector<128xf32>
    %43 = vector.shape_cast %42 : vector<128xf32> to vector<1x128xf32>
    %cst_28 = arith.constant 6.250000e-02 : f32
    %44 = vector.broadcast %cst_28 : f32 to vector<1x128xf32>
    %45 = arith.mulf %43, %44 : vector<1x128xf32>
    %cst_29 = arith.constant 9.99999974E-6 : f32
    %46 = vector.broadcast %cst_29 : f32 to vector<1x128xf32>
    %47 = arith.addf %45, %46 : vector<1x128xf32>
    %48 = math.rsqrt %47 : vector<1x128xf32>
    %49 = arith.mulf %48, %33 : vector<1x128xf32>
    %50 = vector.broadcast %49 : vector<1x128xf32> to vector<16x128xf32>
    %51 = arith.mulf %40, %50 : vector<16x128xf32>
    %52 = vector.broadcast %34 : vector<1x128xf32> to vector<16x128xf32>
    %53 = arith.addf %51, %52 : vector<16x128xf32>
    %cst_30 = arith.constant 0.000000e+00 : f32
    %54 = vector.broadcast %cst_30 : f32 to vector<16x128xf32>
    %55 = arith.maximumf %53, %54 : vector<16x128xf32>
    %c0_i32_31 = arith.constant 0 : i32
    %56 = tpu.memref_slice %arg10[%c0_i32_31] : memref<5x!tpu.dma_semaphore, #tpu.memory_space<semaphore_mem>> -> memref<1x!tpu.dma_semaphore, #tpu.memory_space<semaphore_mem>>
    %57 = tpu.memref_squeeze %56 : memref<1x!tpu.dma_semaphore, #tpu.memory_space<semaphore_mem>> -> memref<!tpu.dma_semaphore, #tpu.memory_space<semaphore_mem>>
    tpu.wait_dma2 semaphore(%57 : memref<!tpu.dma_semaphore, #tpu.memory_space<semaphore_mem>>) src(%arg3 : memref<512x256xbf16, #tpu.memory_space<any>>) dst(%arg7 : memref<512x256xbf16, #tpu.memory_space<vmem>>)
    %58 = arith.truncf %55 : vector<16x128xf32> to vector<16x128xbf16>
    %c128 = arith.constant 128 : index
    %c0_32 = arith.constant 0 : index
    %59 = vector.load %arg7[%c128, %c0_32] : memref<512x256xbf16, #tpu.memory_space<vmem>>, vector<128x256xbf16>
    %cst_33 = arith.constant dense<0.000000e+00> : vector<16x256xf32>
    %60 = tpu.matmul %58, %59, %cst_33 {dimension_numbers = #tpu.dot_dimension_numbers<[1], [0], [0], [1], [0, 0, 1, 1], [], []>} : vector<16x128xbf16>, vector<128x256xbf16>, vector<16x256xf32> -> vector<16x256xf32>
    %c8 = arith.constant 8 : index
    %c0_34 = arith.constant 0 : index
    %61 = vector.load %arg2[%c8, %c0_34] : memref<32x256xf32, #tpu.memory_space<vmem>>, vector<1x256xf32>
    %62 = vector.broadcast %61 : vector<1x256xf32> to vector<16x256xf32>
    %63 = arith.addf %60, %62 : vector<16x256xf32>
    %c0_35 = arith.constant 0 : index
    %c0_36 = arith.constant 0 : index
    %64 = vector.load %arg7[%c0_35, %c0_36] : memref<512x256xbf16, #tpu.memory_space<vmem>>, vector<128x256xbf16>
    %cst_37 = arith.constant dense<0.000000e+00> : vector<16x256xf32>
    %65 = tpu.matmul %58, %64, %cst_37 {dimension_numbers = #tpu.dot_dimension_numbers<[1], [0], [0], [1], [0, 0, 1, 1], [], []>} : vector<16x128xbf16>, vector<128x256xbf16>, vector<16x256xf32> -> vector<16x256xf32>
    %c4 = arith.constant 4 : index
    %c0_38 = arith.constant 0 : index
    %66 = vector.load %arg2[%c4, %c0_38] : memref<32x256xf32, #tpu.memory_space<vmem>>, vector<1x256xf32>
    %c5 = arith.constant 5 : index
    %c0_39 = arith.constant 0 : index
    %67 = vector.load %arg2[%c5, %c0_39] : memref<32x256xf32, #tpu.memory_space<vmem>>, vector<1x256xf32>
    %cst_40 = arith.constant dense<0.000000e+00> : vector<256xf32>
    %68 = vector.multi_reduction <add>, %65, %cst_40 [0] : vector<16x256xf32> to vector<256xf32>
    %69 = vector.shape_cast %68 : vector<256xf32> to vector<1x256xf32>
    %cst_41 = arith.constant 6.250000e-02 : f32
    %70 = vector.broadcast %cst_41 : f32 to vector<1x256xf32>
    %71 = arith.mulf %69, %70 : vector<1x256xf32>
    %72 = vector.broadcast %71 : vector<1x256xf32> to vector<16x256xf32>
    %73 = arith.subf %65, %72 : vector<16x256xf32>
    %74 = arith.mulf %73, %73 : vector<16x256xf32>
    %cst_42 = arith.constant dense<0.000000e+00> : vector<256xf32>
    %75 = vector.multi_reduction <add>, %74, %cst_42 [0] : vector<16x256xf32> to vector<256xf32>
    %76 = vector.shape_cast %75 : vector<256xf32> to vector<1x256xf32>
    %cst_43 = arith.constant 6.250000e-02 : f32
    %77 = vector.broadcast %cst_43 : f32 to vector<1x256xf32>
    %78 = arith.mulf %76, %77 : vector<1x256xf32>
    %cst_44 = arith.constant 9.99999974E-6 : f32
    %79 = vector.broadcast %cst_44 : f32 to vector<1x256xf32>
    %80 = arith.addf %78, %79 : vector<1x256xf32>
    %81 = math.rsqrt %80 : vector<1x256xf32>
    %82 = arith.mulf %81, %66 : vector<1x256xf32>
    %83 = vector.broadcast %82 : vector<1x256xf32> to vector<16x256xf32>
    %84 = arith.mulf %73, %83 : vector<16x256xf32>
    %85 = vector.broadcast %67 : vector<1x256xf32> to vector<16x256xf32>
    %86 = arith.addf %84, %85 : vector<16x256xf32>
    %cst_45 = arith.constant 0.000000e+00 : f32
    %87 = vector.broadcast %cst_45 : f32 to vector<16x256xf32>
    %88 = arith.maximumf %86, %87 : vector<16x256xf32>
    %89 = arith.truncf %88 : vector<16x256xf32> to vector<16x256xbf16>
    %c256 = arith.constant 256 : index
    %c0_46 = arith.constant 0 : index
    %90 = vector.load %arg7[%c256, %c0_46] : memref<512x256xbf16, #tpu.memory_space<vmem>>, vector<256x256xbf16>
    %cst_47 = arith.constant dense<0.000000e+00> : vector<16x256xf32>
    %91 = tpu.matmul %89, %90, %cst_47 {dimension_numbers = #tpu.dot_dimension_numbers<[1], [0], [0], [1], [0, 0, 1, 1], [], []>} : vector<16x256xbf16>, vector<256x256xbf16>, vector<16x256xf32> -> vector<16x256xf32>
    %c6 = arith.constant 6 : index
    %c0_48 = arith.constant 0 : index
    %92 = vector.load %arg2[%c6, %c0_48] : memref<32x256xf32, #tpu.memory_space<vmem>>, vector<1x256xf32>
    %c7 = arith.constant 7 : index
    %c0_49 = arith.constant 0 : index
    %93 = vector.load %arg2[%c7, %c0_49] : memref<32x256xf32, #tpu.memory_space<vmem>>, vector<1x256xf32>
    %cst_50 = arith.constant dense<0.000000e+00> : vector<256xf32>
    %94 = vector.multi_reduction <add>, %91, %cst_50 [0] : vector<16x256xf32> to vector<256xf32>
    %95 = vector.shape_cast %94 : vector<256xf32> to vector<1x256xf32>
    %cst_51 = arith.constant 6.250000e-02 : f32
    %96 = vector.broadcast %cst_51 : f32 to vector<1x256xf32>
    %97 = arith.mulf %95, %96 : vector<1x256xf32>
    %98 = vector.broadcast %97 : vector<1x256xf32> to vector<16x256xf32>
    %99 = arith.subf %91, %98 : vector<16x256xf32>
    %100 = arith.mulf %99, %99 : vector<16x256xf32>
    %cst_52 = arith.constant dense<0.000000e+00> : vector<256xf32>
    %101 = vector.multi_reduction <add>, %100, %cst_52 [0] : vector<16x256xf32> to vector<256xf32>
    %102 = vector.shape_cast %101 : vector<256xf32> to vector<1x256xf32>
    %cst_53 = arith.constant 6.250000e-02 : f32
    %103 = vector.broadcast %cst_53 : f32 to vector<1x256xf32>
    %104 = arith.mulf %102, %103 : vector<1x256xf32>
    %cst_54 = arith.constant 9.99999974E-6 : f32
    %105 = vector.broadcast %cst_54 : f32 to vector<1x256xf32>
    %106 = arith.addf %104, %105 : vector<1x256xf32>
    %107 = math.rsqrt %106 : vector<1x256xf32>
    %108 = arith.mulf %107, %92 : vector<1x256xf32>
    %109 = vector.broadcast %108 : vector<1x256xf32> to vector<16x256xf32>
    %110 = arith.mulf %99, %109 : vector<16x256xf32>
    %111 = vector.broadcast %93 : vector<1x256xf32> to vector<16x256xf32>
    %112 = arith.addf %110, %111 : vector<16x256xf32>
    %113 = arith.addf %112, %63 : vector<16x256xf32>
    %cst_55 = arith.constant 0.000000e+00 : f32
    %114 = vector.broadcast %cst_55 : f32 to vector<16x256xf32>
    %115 = arith.maximumf %113, %114 : vector<16x256xf32>
    %c0_i32_56 = arith.constant 0 : i32
    %c0_i32_57 = arith.constant 0 : i32
    %c1_i32_58 = arith.constant 1 : i32
    %c0_i32_59 = arith.constant 0 : i32
    %c0_i32_60 = arith.constant 0 : i32
    %116 = tpu.memref_slice %arg4[%c0_i32_56, %c0_i32_59, %c0_i32_60] : memref<3x512x256xbf16, #tpu.memory_space<any>> -> memref<1x512x256xbf16, #tpu.memory_space<any>>
    %117 = tpu.memref_squeeze %116 : memref<1x512x256xbf16, #tpu.memory_space<any>> -> memref<512x256xbf16, #tpu.memory_space<any>>
    %c0_i32_61 = arith.constant 0 : i32
    %c0_i32_62 = arith.constant 0 : i32
    %118 = tpu.memref_slice %arg8[%c0_i32_57, %c0_i32_61, %c0_i32_62] : memref<3x512x256xbf16, #tpu.memory_space<vmem>> -> memref<1x512x256xbf16, #tpu.memory_space<vmem>>
    %119 = tpu.memref_squeeze %118 : memref<1x512x256xbf16, #tpu.memory_space<vmem>> -> memref<512x256xbf16, #tpu.memory_space<vmem>>
    %120 = tpu.memref_slice %arg10[%c1_i32_58] : memref<5x!tpu.dma_semaphore, #tpu.memory_space<semaphore_mem>> -> memref<1x!tpu.dma_semaphore, #tpu.memory_space<semaphore_mem>>
    %121 = tpu.memref_squeeze %120 : memref<1x!tpu.dma_semaphore, #tpu.memory_space<semaphore_mem>> -> memref<!tpu.dma_semaphore, #tpu.memory_space<semaphore_mem>>
    tpu.wait_dma2 semaphore(%121 : memref<!tpu.dma_semaphore, #tpu.memory_space<semaphore_mem>>) src(%117 : memref<512x256xbf16, #tpu.memory_space<any>>) dst(%119 : memref<512x256xbf16, #tpu.memory_space<vmem>>)
    %122 = arith.truncf %115 : vector<16x256xf32> to vector<16x256xbf16>
    %c0_63 = arith.constant 0 : index
    %c0_64 = arith.constant 0 : index
    %c0_65 = arith.constant 0 : index
    %123 = vector.load %arg8[%c0_63, %c0_64, %c0_65] : memref<3x512x256xbf16, #tpu.memory_space<vmem>>, vector<1x256x256xbf16>
    %124 = vector.shape_cast %123 : vector<1x256x256xbf16> to vector<256x256xbf16>
    %cst_66 = arith.constant dense<0.000000e+00> : vector<16x256xf32>
    %125 = tpu.matmul %122, %124, %cst_66 {dimension_numbers = #tpu.dot_dimension_numbers<[1], [0], [0], [1], [0, 0, 1, 1], [], []>} : vector<16x256xbf16>, vector<256x256xbf16>, vector<16x256xf32> -> vector<16x256xf32>
    %c9 = arith.constant 9 : index
    %c0_67 = arith.constant 0 : index
    %126 = vector.load %arg2[%c9, %c0_67] : memref<32x256xf32, #tpu.memory_space<vmem>>, vector<1x256xf32>
    %c10 = arith.constant 10 : index
    %c0_68 = arith.constant 0 : index
    %127 = vector.load %arg2[%c10, %c0_68] : memref<32x256xf32, #tpu.memory_space<vmem>>, vector<1x256xf32>
    %cst_69 = arith.constant dense<0.000000e+00> : vector<256xf32>
    %128 = vector.multi_reduction <add>, %125, %cst_69 [0] : vector<16x256xf32> to vector<256xf32>
    %129 = vector.shape_cast %128 : vector<256xf32> to vector<1x256xf32>
    %cst_70 = arith.constant 6.250000e-02 : f32
    %130 = vector.broadcast %cst_70 : f32 to vector<1x256xf32>
    %131 = arith.mulf %129, %130 : vector<1x256xf32>
    %132 = vector.broadcast %131 : vector<1x256xf32> to vector<16x256xf32>
    %133 = arith.subf %125, %132 : vector<16x256xf32>
    %134 = arith.mulf %133, %133 : vector<16x256xf32>
    %cst_71 = arith.constant dense<0.000000e+00> : vector<256xf32>
    %135 = vector.multi_reduction <add>, %134, %cst_71 [0] : vector<16x256xf32> to vector<256xf32>
    %136 = vector.shape_cast %135 : vector<256xf32> to vector<1x256xf32>
    %cst_72 = arith.constant 6.250000e-02 : f32
    %137 = vector.broadcast %cst_72 : f32 to vector<1x256xf32>
    %138 = arith.mulf %136, %137 : vector<1x256xf32>
    %cst_73 = arith.constant 9.99999974E-6 : f32
    %139 = vector.broadcast %cst_73 : f32 to vector<1x256xf32>
    %140 = arith.addf %138, %139 : vector<1x256xf32>
    %141 = math.rsqrt %140 : vector<1x256xf32>
    %142 = arith.mulf %141, %126 : vector<1x256xf32>
    %143 = vector.broadcast %142 : vector<1x256xf32> to vector<16x256xf32>
    %144 = arith.mulf %133, %143 : vector<16x256xf32>
    %145 = vector.broadcast %127 : vector<1x256xf32> to vector<16x256xf32>
    %146 = arith.addf %144, %145 : vector<16x256xf32>
    %cst_74 = arith.constant 0.000000e+00 : f32
    %147 = vector.broadcast %cst_74 : f32 to vector<16x256xf32>
    %148 = arith.maximumf %146, %147 : vector<16x256xf32>
    %149 = arith.truncf %148 : vector<16x256xf32> to vector<16x256xbf16>
    %c0_75 = arith.constant 0 : index
    %c256_76 = arith.constant 256 : index
    %c0_77 = arith.constant 0 : index
    %150 = vector.load %arg8[%c0_75, %c256_76, %c0_77] : memref<3x512x256xbf16, #tpu.memory_space<vmem>>, vector<1x256x256xbf16>
    %151 = vector.shape_cast %150 : vector<1x256x256xbf16> to vector<256x256xbf16>
    %cst_78 = arith.constant dense<0.000000e+00> : vector<16x256xf32>
    %152 = tpu.matmul %149, %151, %cst_78 {dimension_numbers = #tpu.dot_dimension_numbers<[1], [0], [0], [1], [0, 0, 1, 1], [], []>} : vector<16x256xbf16>, vector<256x256xbf16>, vector<16x256xf32> -> vector<16x256xf32>
    %c11 = arith.constant 11 : index
    %c0_79 = arith.constant 0 : index
    %153 = vector.load %arg2[%c11, %c0_79] : memref<32x256xf32, #tpu.memory_space<vmem>>, vector<1x256xf32>
    %c12 = arith.constant 12 : index
    %c0_80 = arith.constant 0 : index
    %154 = vector.load %arg2[%c12, %c0_80] : memref<32x256xf32, #tpu.memory_space<vmem>>, vector<1x256xf32>
    %cst_81 = arith.constant dense<0.000000e+00> : vector<256xf32>
    %155 = vector.multi_reduction <add>, %152, %cst_81 [0] : vector<16x256xf32> to vector<256xf32>
    %156 = vector.shape_cast %155 : vector<256xf32> to vector<1x256xf32>
    %cst_82 = arith.constant 6.250000e-02 : f32
    %157 = vector.broadcast %cst_82 : f32 to vector<1x256xf32>
    %158 = arith.mulf %156, %157 : vector<1x256xf32>
    %159 = vector.broadcast %158 : vector<1x256xf32> to vector<16x256xf32>
    %160 = arith.subf %152, %159 : vector<16x256xf32>
    %161 = arith.mulf %160, %160 : vector<16x256xf32>
    %cst_83 = arith.constant dense<0.000000e+00> : vector<256xf32>
    %162 = vector.multi_reduction <add>, %161, %cst_83 [0] : vector<16x256xf32> to vector<256xf32>
    %163 = vector.shape_cast %162 : vector<256xf32> to vector<1x256xf32>
    %cst_84 = arith.constant 6.250000e-02 : f32
    %164 = vector.broadcast %cst_84 : f32 to vector<1x256xf32>
    %165 = arith.mulf %163, %164 : vector<1x256xf32>
    %cst_85 = arith.constant 9.99999974E-6 : f32
    %166 = vector.broadcast %cst_85 : f32 to vector<1x256xf32>
    %167 = arith.addf %165, %166 : vector<1x256xf32>
    %168 = math.rsqrt %167 : vector<1x256xf32>
    %169 = arith.mulf %168, %153 : vector<1x256xf32>
    %170 = vector.broadcast %169 : vector<1x256xf32> to vector<16x256xf32>
    %171 = arith.mulf %160, %170 : vector<16x256xf32>
    %172 = vector.broadcast %154 : vector<1x256xf32> to vector<16x256xf32>
    %173 = arith.addf %171, %172 : vector<16x256xf32>
    %174 = arith.addf %173, %115 : vector<16x256xf32>
    %cst_86 = arith.constant 0.000000e+00 : f32
    %175 = vector.broadcast %cst_86 : f32 to vector<16x256xf32>
    %176 = arith.maximumf %174, %175 : vector<16x256xf32>
    %c1_i32_87 = arith.constant 1 : i32
    %c1_i32_88 = arith.constant 1 : i32
    %c2_i32_89 = arith.constant 2 : i32
    %c0_i32_90 = arith.constant 0 : i32
    %c0_i32_91 = arith.constant 0 : i32
    %177 = tpu.memref_slice %arg4[%c1_i32_87, %c0_i32_90, %c0_i32_91] : memref<3x512x256xbf16, #tpu.memory_space<any>> -> memref<1x512x256xbf16, #tpu.memory_space<any>>
    %178 = tpu.memref_squeeze %177 : memref<1x512x256xbf16, #tpu.memory_space<any>> -> memref<512x256xbf16, #tpu.memory_space<any>>
    %c0_i32_92 = arith.constant 0 : i32
    %c0_i32_93 = arith.constant 0 : i32
    %179 = tpu.memref_slice %arg8[%c1_i32_88, %c0_i32_92, %c0_i32_93] : memref<3x512x256xbf16, #tpu.memory_space<vmem>> -> memref<1x512x256xbf16, #tpu.memory_space<vmem>>
    %180 = tpu.memref_squeeze %179 : memref<1x512x256xbf16, #tpu.memory_space<vmem>> -> memref<512x256xbf16, #tpu.memory_space<vmem>>
    %181 = tpu.memref_slice %arg10[%c2_i32_89] : memref<5x!tpu.dma_semaphore, #tpu.memory_space<semaphore_mem>> -> memref<1x!tpu.dma_semaphore, #tpu.memory_space<semaphore_mem>>
    %182 = tpu.memref_squeeze %181 : memref<1x!tpu.dma_semaphore, #tpu.memory_space<semaphore_mem>> -> memref<!tpu.dma_semaphore, #tpu.memory_space<semaphore_mem>>
    tpu.wait_dma2 semaphore(%182 : memref<!tpu.dma_semaphore, #tpu.memory_space<semaphore_mem>>) src(%178 : memref<512x256xbf16, #tpu.memory_space<any>>) dst(%180 : memref<512x256xbf16, #tpu.memory_space<vmem>>)
    %183 = arith.truncf %176 : vector<16x256xf32> to vector<16x256xbf16>
    %c1_94 = arith.constant 1 : index
    %c0_95 = arith.constant 0 : index
    %c0_96 = arith.constant 0 : index
    %184 = vector.load %arg8[%c1_94, %c0_95, %c0_96] : memref<3x512x256xbf16, #tpu.memory_space<vmem>>, vector<1x256x256xbf16>
    %185 = vector.shape_cast %184 : vector<1x256x256xbf16> to vector<256x256xbf16>
    %cst_97 = arith.constant dense<0.000000e+00> : vector<16x256xf32>
    %186 = tpu.matmul %183, %185, %cst_97 {dimension_numbers = #tpu.dot_dimension_numbers<[1], [0], [0], [1], [0, 0, 1, 1], [], []>} : vector<16x256xbf16>, vector<256x256xbf16>, vector<16x256xf32> -> vector<16x256xf32>
    %c13 = arith.constant 13 : index
    %c0_98 = arith.constant 0 : index
    %187 = vector.load %arg2[%c13, %c0_98] : memref<32x256xf32, #tpu.memory_space<vmem>>, vector<1x256xf32>
    %c14 = arith.constant 14 : index
    %c0_99 = arith.constant 0 : index
    %188 = vector.load %arg2[%c14, %c0_99] : memref<32x256xf32, #tpu.memory_space<vmem>>, vector<1x256xf32>
    %cst_100 = arith.constant dense<0.000000e+00> : vector<256xf32>
    %189 = vector.multi_reduction <add>, %186, %cst_100 [0] : vector<16x256xf32> to vector<256xf32>
    %190 = vector.shape_cast %189 : vector<256xf32> to vector<1x256xf32>
    %cst_101 = arith.constant 6.250000e-02 : f32
    %191 = vector.broadcast %cst_101 : f32 to vector<1x256xf32>
    %192 = arith.mulf %190, %191 : vector<1x256xf32>
    %193 = vector.broadcast %192 : vector<1x256xf32> to vector<16x256xf32>
    %194 = arith.subf %186, %193 : vector<16x256xf32>
    %195 = arith.mulf %194, %194 : vector<16x256xf32>
    %cst_102 = arith.constant dense<0.000000e+00> : vector<256xf32>
    %196 = vector.multi_reduction <add>, %195, %cst_102 [0] : vector<16x256xf32> to vector<256xf32>
    %197 = vector.shape_cast %196 : vector<256xf32> to vector<1x256xf32>
    %cst_103 = arith.constant 6.250000e-02 : f32
    %198 = vector.broadcast %cst_103 : f32 to vector<1x256xf32>
    %199 = arith.mulf %197, %198 : vector<1x256xf32>
    %cst_104 = arith.constant 9.99999974E-6 : f32
    %200 = vector.broadcast %cst_104 : f32 to vector<1x256xf32>
    %201 = arith.addf %199, %200 : vector<1x256xf32>
    %202 = math.rsqrt %201 : vector<1x256xf32>
    %203 = arith.mulf %202, %187 : vector<1x256xf32>
    %204 = vector.broadcast %203 : vector<1x256xf32> to vector<16x256xf32>
    %205 = arith.mulf %194, %204 : vector<16x256xf32>
    %206 = vector.broadcast %188 : vector<1x256xf32> to vector<16x256xf32>
    %207 = arith.addf %205, %206 : vector<16x256xf32>
    %cst_105 = arith.constant 0.000000e+00 : f32
    %208 = vector.broadcast %cst_105 : f32 to vector<16x256xf32>
    %209 = arith.maximumf %207, %208 : vector<16x256xf32>
    %210 = arith.truncf %209 : vector<16x256xf32> to vector<16x256xbf16>
    %c1_106 = arith.constant 1 : index
    %c256_107 = arith.constant 256 : index
    %c0_108 = arith.constant 0 : index
    %211 = vector.load %arg8[%c1_106, %c256_107, %c0_108] : memref<3x512x256xbf16, #tpu.memory_space<vmem>>, vector<1x256x256xbf16>
    %212 = vector.shape_cast %211 : vector<1x256x256xbf16> to vector<256x256xbf16>
    %cst_109 = arith.constant dense<0.000000e+00> : vector<16x256xf32>
    %213 = tpu.matmul %210, %212, %cst_109 {dimension_numbers = #tpu.dot_dimension_numbers<[1], [0], [0], [1], [0, 0, 1, 1], [], []>} : vector<16x256xbf16>, vector<256x256xbf16>, vector<16x256xf32> -> vector<16x256xf32>
    %c15 = arith.constant 15 : index
    %c0_110 = arith.constant 0 : index
    %214 = vector.load %arg2[%c15, %c0_110] : memref<32x256xf32, #tpu.memory_space<vmem>>, vector<1x256xf32>
    %c16 = arith.constant 16 : index
    %c0_111 = arith.constant 0 : index
    %215 = vector.load %arg2[%c16, %c0_111] : memref<32x256xf32, #tpu.memory_space<vmem>>, vector<1x256xf32>
    %cst_112 = arith.constant dense<0.000000e+00> : vector<256xf32>
    %216 = vector.multi_reduction <add>, %213, %cst_112 [0] : vector<16x256xf32> to vector<256xf32>
    %217 = vector.shape_cast %216 : vector<256xf32> to vector<1x256xf32>
    %cst_113 = arith.constant 6.250000e-02 : f32
    %218 = vector.broadcast %cst_113 : f32 to vector<1x256xf32>
    %219 = arith.mulf %217, %218 : vector<1x256xf32>
    %220 = vector.broadcast %219 : vector<1x256xf32> to vector<16x256xf32>
    %221 = arith.subf %213, %220 : vector<16x256xf32>
    %222 = arith.mulf %221, %221 : vector<16x256xf32>
    %cst_114 = arith.constant dense<0.000000e+00> : vector<256xf32>
    %223 = vector.multi_reduction <add>, %222, %cst_114 [0] : vector<16x256xf32> to vector<256xf32>
    %224 = vector.shape_cast %223 : vector<256xf32> to vector<1x256xf32>
    %cst_115 = arith.constant 6.250000e-02 : f32
    %225 = vector.broadcast %cst_115 : f32 to vector<1x256xf32>
    %226 = arith.mulf %224, %225 : vector<1x256xf32>
    %cst_116 = arith.constant 9.99999974E-6 : f32
    %227 = vector.broadcast %cst_116 : f32 to vector<1x256xf32>
    %228 = arith.addf %226, %227 : vector<1x256xf32>
    %229 = math.rsqrt %228 : vector<1x256xf32>
    %230 = arith.mulf %229, %214 : vector<1x256xf32>
    %231 = vector.broadcast %230 : vector<1x256xf32> to vector<16x256xf32>
    %232 = arith.mulf %221, %231 : vector<16x256xf32>
    %233 = vector.broadcast %215 : vector<1x256xf32> to vector<16x256xf32>
    %234 = arith.addf %232, %233 : vector<16x256xf32>
    %235 = arith.addf %234, %176 : vector<16x256xf32>
    %cst_117 = arith.constant 0.000000e+00 : f32
    %236 = vector.broadcast %cst_117 : f32 to vector<16x256xf32>
    %237 = arith.maximumf %235, %236 : vector<16x256xf32>
    %c2_i32_118 = arith.constant 2 : i32
    %c2_i32_119 = arith.constant 2 : i32
    %c3_i32_120 = arith.constant 3 : i32
    %c0_i32_121 = arith.constant 0 : i32
    %c0_i32_122 = arith.constant 0 : i32
    %238 = tpu.memref_slice %arg4[%c2_i32_118, %c0_i32_121, %c0_i32_122] : memref<3x512x256xbf16, #tpu.memory_space<any>> -> memref<1x512x256xbf16, #tpu.memory_space<any>>
    %239 = tpu.memref_squeeze %238 : memref<1x512x256xbf16, #tpu.memory_space<any>> -> memref<512x256xbf16, #tpu.memory_space<any>>
    %c0_i32_123 = arith.constant 0 : i32
    %c0_i32_124 = arith.constant 0 : i32
    %240 = tpu.memref_slice %arg8[%c2_i32_119, %c0_i32_123, %c0_i32_124] : memref<3x512x256xbf16, #tpu.memory_space<vmem>> -> memref<1x512x256xbf16, #tpu.memory_space<vmem>>
    %241 = tpu.memref_squeeze %240 : memref<1x512x256xbf16, #tpu.memory_space<vmem>> -> memref<512x256xbf16, #tpu.memory_space<vmem>>
    %242 = tpu.memref_slice %arg10[%c3_i32_120] : memref<5x!tpu.dma_semaphore, #tpu.memory_space<semaphore_mem>> -> memref<1x!tpu.dma_semaphore, #tpu.memory_space<semaphore_mem>>
    %243 = tpu.memref_squeeze %242 : memref<1x!tpu.dma_semaphore, #tpu.memory_space<semaphore_mem>> -> memref<!tpu.dma_semaphore, #tpu.memory_space<semaphore_mem>>
    tpu.wait_dma2 semaphore(%243 : memref<!tpu.dma_semaphore, #tpu.memory_space<semaphore_mem>>) src(%239 : memref<512x256xbf16, #tpu.memory_space<any>>) dst(%241 : memref<512x256xbf16, #tpu.memory_space<vmem>>)
    %244 = arith.truncf %237 : vector<16x256xf32> to vector<16x256xbf16>
    %c2_125 = arith.constant 2 : index
    %c0_126 = arith.constant 0 : index
    %c0_127 = arith.constant 0 : index
    %245 = vector.load %arg8[%c2_125, %c0_126, %c0_127] : memref<3x512x256xbf16, #tpu.memory_space<vmem>>, vector<1x256x256xbf16>
    %246 = vector.shape_cast %245 : vector<1x256x256xbf16> to vector<256x256xbf16>
    %cst_128 = arith.constant dense<0.000000e+00> : vector<16x256xf32>
    %247 = tpu.matmul %244, %246, %cst_128 {dimension_numbers = #tpu.dot_dimension_numbers<[1], [0], [0], [1], [0, 0, 1, 1], [], []>} : vector<16x256xbf16>, vector<256x256xbf16>, vector<16x256xf32> -> vector<16x256xf32>
    %c17 = arith.constant 17 : index
    %c0_129 = arith.constant 0 : index
    %248 = vector.load %arg2[%c17, %c0_129] : memref<32x256xf32, #tpu.memory_space<vmem>>, vector<1x256xf32>
    %c18 = arith.constant 18 : index
    %c0_130 = arith.constant 0 : index
    %249 = vector.load %arg2[%c18, %c0_130] : memref<32x256xf32, #tpu.memory_space<vmem>>, vector<1x256xf32>
    %cst_131 = arith.constant dense<0.000000e+00> : vector<256xf32>
    %250 = vector.multi_reduction <add>, %247, %cst_131 [0] : vector<16x256xf32> to vector<256xf32>
    %251 = vector.shape_cast %250 : vector<256xf32> to vector<1x256xf32>
    %cst_132 = arith.constant 6.250000e-02 : f32
    %252 = vector.broadcast %cst_132 : f32 to vector<1x256xf32>
    %253 = arith.mulf %251, %252 : vector<1x256xf32>
    %254 = vector.broadcast %253 : vector<1x256xf32> to vector<16x256xf32>
    %255 = arith.subf %247, %254 : vector<16x256xf32>
    %256 = arith.mulf %255, %255 : vector<16x256xf32>
    %cst_133 = arith.constant dense<0.000000e+00> : vector<256xf32>
    %257 = vector.multi_reduction <add>, %256, %cst_133 [0] : vector<16x256xf32> to vector<256xf32>
    %258 = vector.shape_cast %257 : vector<256xf32> to vector<1x256xf32>
    %cst_134 = arith.constant 6.250000e-02 : f32
    %259 = vector.broadcast %cst_134 : f32 to vector<1x256xf32>
    %260 = arith.mulf %258, %259 : vector<1x256xf32>
    %cst_135 = arith.constant 9.99999974E-6 : f32
    %261 = vector.broadcast %cst_135 : f32 to vector<1x256xf32>
    %262 = arith.addf %260, %261 : vector<1x256xf32>
    %263 = math.rsqrt %262 : vector<1x256xf32>
    %264 = arith.mulf %263, %248 : vector<1x256xf32>
    %265 = vector.broadcast %264 : vector<1x256xf32> to vector<16x256xf32>
    %266 = arith.mulf %255, %265 : vector<16x256xf32>
    %267 = vector.broadcast %249 : vector<1x256xf32> to vector<16x256xf32>
    %268 = arith.addf %266, %267 : vector<16x256xf32>
    %cst_136 = arith.constant 0.000000e+00 : f32
    %269 = vector.broadcast %cst_136 : f32 to vector<16x256xf32>
    %270 = arith.maximumf %268, %269 : vector<16x256xf32>
    %271 = arith.truncf %270 : vector<16x256xf32> to vector<16x256xbf16>
    %c2_137 = arith.constant 2 : index
    %c256_138 = arith.constant 256 : index
    %c0_139 = arith.constant 0 : index
    %272 = vector.load %arg8[%c2_137, %c256_138, %c0_139] : memref<3x512x256xbf16, #tpu.memory_space<vmem>>, vector<1x256x256xbf16>
    %273 = vector.shape_cast %272 : vector<1x256x256xbf16> to vector<256x256xbf16>
    %cst_140 = arith.constant dense<0.000000e+00> : vector<16x256xf32>
    %274 = tpu.matmul %271, %273, %cst_140 {dimension_numbers = #tpu.dot_dimension_numbers<[1], [0], [0], [1], [0, 0, 1, 1], [], []>} : vector<16x256xbf16>, vector<256x256xbf16>, vector<16x256xf32> -> vector<16x256xf32>
    %c19 = arith.constant 19 : index
    %c0_141 = arith.constant 0 : index
    %275 = vector.load %arg2[%c19, %c0_141] : memref<32x256xf32, #tpu.memory_space<vmem>>, vector<1x256xf32>
    %c20 = arith.constant 20 : index
    %c0_142 = arith.constant 0 : index
    %276 = vector.load %arg2[%c20, %c0_142] : memref<32x256xf32, #tpu.memory_space<vmem>>, vector<1x256xf32>
    %cst_143 = arith.constant dense<0.000000e+00> : vector<256xf32>
    %277 = vector.multi_reduction <add>, %274, %cst_143 [0] : vector<16x256xf32> to vector<256xf32>
    %278 = vector.shape_cast %277 : vector<256xf32> to vector<1x256xf32>
    %cst_144 = arith.constant 6.250000e-02 : f32
    %279 = vector.broadcast %cst_144 : f32 to vector<1x256xf32>
    %280 = arith.mulf %278, %279 : vector<1x256xf32>
    %281 = vector.broadcast %280 : vector<1x256xf32> to vector<16x256xf32>
    %282 = arith.subf %274, %281 : vector<16x256xf32>
    %283 = arith.mulf %282, %282 : vector<16x256xf32>
    %cst_145 = arith.constant dense<0.000000e+00> : vector<256xf32>
    %284 = vector.multi_reduction <add>, %283, %cst_145 [0] : vector<16x256xf32> to vector<256xf32>
    %285 = vector.shape_cast %284 : vector<256xf32> to vector<1x256xf32>
    %cst_146 = arith.constant 6.250000e-02 : f32
    %286 = vector.broadcast %cst_146 : f32 to vector<1x256xf32>
    %287 = arith.mulf %285, %286 : vector<1x256xf32>
    %cst_147 = arith.constant 9.99999974E-6 : f32
    %288 = vector.broadcast %cst_147 : f32 to vector<1x256xf32>
    %289 = arith.addf %287, %288 : vector<1x256xf32>
    %290 = math.rsqrt %289 : vector<1x256xf32>
    %291 = arith.mulf %290, %275 : vector<1x256xf32>
    %292 = vector.broadcast %291 : vector<1x256xf32> to vector<16x256xf32>
    %293 = arith.mulf %282, %292 : vector<16x256xf32>
    %294 = vector.broadcast %276 : vector<1x256xf32> to vector<16x256xf32>
    %295 = arith.addf %293, %294 : vector<16x256xf32>
    %296 = arith.addf %295, %237 : vector<16x256xf32>
    %cst_148 = arith.constant 0.000000e+00 : f32
    %297 = vector.broadcast %cst_148 : f32 to vector<16x256xf32>
    %298 = arith.maximumf %296, %297 : vector<16x256xf32>
    %c4_i32_149 = arith.constant 4 : i32
    %299 = tpu.memref_slice %arg10[%c4_i32_149] : memref<5x!tpu.dma_semaphore, #tpu.memory_space<semaphore_mem>> -> memref<1x!tpu.dma_semaphore, #tpu.memory_space<semaphore_mem>>
    %300 = tpu.memref_squeeze %299 : memref<1x!tpu.dma_semaphore, #tpu.memory_space<semaphore_mem>> -> memref<!tpu.dma_semaphore, #tpu.memory_space<semaphore_mem>>
    tpu.wait_dma2 semaphore(%300 : memref<!tpu.dma_semaphore, #tpu.memory_space<semaphore_mem>>) src(%arg5 : memref<768x128xbf16, #tpu.memory_space<any>>) dst(%arg9 : memref<768x128xbf16, #tpu.memory_space<vmem>>)
    %301 = arith.truncf %298 : vector<16x256xf32> to vector<16x256xbf16>
    %c256_150 = arith.constant 256 : index
    %c0_151 = arith.constant 0 : index
    %302 = vector.load %arg9[%c256_150, %c0_151] : memref<768x128xbf16, #tpu.memory_space<vmem>>, vector<256x128xbf16>
    %cst_152 = arith.constant dense<0.000000e+00> : vector<16x128xf32>
    %303 = tpu.matmul %301, %302, %cst_152 {dimension_numbers = #tpu.dot_dimension_numbers<[1], [0], [0], [1], [0, 0, 1, 1], [], []>} : vector<16x256xbf16>, vector<256x128xbf16>, vector<16x128xf32> -> vector<16x128xf32>
    %c25 = arith.constant 25 : index
    %c0_153 = arith.constant 0 : index
    %304 = vector.load %arg2[%c25, %c0_153] : memref<32x256xf32, #tpu.memory_space<vmem>>, vector<1x128xf32>
    %305 = vector.broadcast %304 : vector<1x128xf32> to vector<16x128xf32>
    %306 = arith.addf %303, %305 : vector<16x128xf32>
    %c0_154 = arith.constant 0 : index
    %c0_155 = arith.constant 0 : index
    %307 = vector.load %arg9[%c0_154, %c0_155] : memref<768x128xbf16, #tpu.memory_space<vmem>>, vector<256x128xbf16>
    %cst_156 = arith.constant dense<0.000000e+00> : vector<16x128xf32>
    %308 = tpu.matmul %301, %307, %cst_156 {dimension_numbers = #tpu.dot_dimension_numbers<[1], [0], [0], [1], [0, 0, 1, 1], [], []>} : vector<16x256xbf16>, vector<256x128xbf16>, vector<16x128xf32> -> vector<16x128xf32>
    %c21 = arith.constant 21 : index
    %c0_157 = arith.constant 0 : index
    %309 = vector.load %arg2[%c21, %c0_157] : memref<32x256xf32, #tpu.memory_space<vmem>>, vector<1x128xf32>
    %c22 = arith.constant 22 : index
    %c0_158 = arith.constant 0 : index
    %310 = vector.load %arg2[%c22, %c0_158] : memref<32x256xf32, #tpu.memory_space<vmem>>, vector<1x128xf32>
    %cst_159 = arith.constant dense<0.000000e+00> : vector<128xf32>
    %311 = vector.multi_reduction <add>, %308, %cst_159 [0] : vector<16x128xf32> to vector<128xf32>
    %312 = vector.shape_cast %311 : vector<128xf32> to vector<1x128xf32>
    %cst_160 = arith.constant 6.250000e-02 : f32
    %313 = vector.broadcast %cst_160 : f32 to vector<1x128xf32>
    %314 = arith.mulf %312, %313 : vector<1x128xf32>
    %315 = vector.broadcast %314 : vector<1x128xf32> to vector<16x128xf32>
    %316 = arith.subf %308, %315 : vector<16x128xf32>
    %317 = arith.mulf %316, %316 : vector<16x128xf32>
    %cst_161 = arith.constant dense<0.000000e+00> : vector<128xf32>
    %318 = vector.multi_reduction <add>, %317, %cst_161 [0] : vector<16x128xf32> to vector<128xf32>
    %319 = vector.shape_cast %318 : vector<128xf32> to vector<1x128xf32>
    %cst_162 = arith.constant 6.250000e-02 : f32
    %320 = vector.broadcast %cst_162 : f32 to vector<1x128xf32>
    %321 = arith.mulf %319, %320 : vector<1x128xf32>
    %cst_163 = arith.constant 9.99999974E-6 : f32
    %322 = vector.broadcast %cst_163 : f32 to vector<1x128xf32>
    %323 = arith.addf %321, %322 : vector<1x128xf32>
    %324 = math.rsqrt %323 : vector<1x128xf32>
    %325 = arith.mulf %324, %309 : vector<1x128xf32>
    %326 = vector.broadcast %325 : vector<1x128xf32> to vector<16x128xf32>
    %327 = arith.mulf %316, %326 : vector<16x128xf32>
    %328 = vector.broadcast %310 : vector<1x128xf32> to vector<16x128xf32>
    %329 = arith.addf %327, %328 : vector<16x128xf32>
    %cst_164 = arith.constant 0.000000e+00 : f32
    %330 = vector.broadcast %cst_164 : f32 to vector<16x128xf32>
    %331 = arith.maximumf %329, %330 : vector<16x128xf32>
    %332 = arith.truncf %331 : vector<16x128xf32> to vector<16x128xbf16>
    %c512 = arith.constant 512 : index
    %c0_165 = arith.constant 0 : index
    %333 = vector.load %arg9[%c512, %c0_165] : memref<768x128xbf16, #tpu.memory_space<vmem>>, vector<128x128xbf16>
    %cst_166 = arith.constant dense<0.000000e+00> : vector<16x128xf32>
    %334 = tpu.matmul %332, %333, %cst_166 {dimension_numbers = #tpu.dot_dimension_numbers<[1], [0], [0], [1], [0, 0, 1, 1], [], []>} : vector<16x128xbf16>, vector<128x128xbf16>, vector<16x128xf32> -> vector<16x128xf32>
    %c23 = arith.constant 23 : index
    %c0_167 = arith.constant 0 : index
    %335 = vector.load %arg2[%c23, %c0_167] : memref<32x256xf32, #tpu.memory_space<vmem>>, vector<1x128xf32>
    %c24 = arith.constant 24 : index
    %c0_168 = arith.constant 0 : index
    %336 = vector.load %arg2[%c24, %c0_168] : memref<32x256xf32, #tpu.memory_space<vmem>>, vector<1x128xf32>
    %cst_169 = arith.constant dense<0.000000e+00> : vector<128xf32>
    %337 = vector.multi_reduction <add>, %334, %cst_169 [0] : vector<16x128xf32> to vector<128xf32>
    %338 = vector.shape_cast %337 : vector<128xf32> to vector<1x128xf32>
    %cst_170 = arith.constant 6.250000e-02 : f32
    %339 = vector.broadcast %cst_170 : f32 to vector<1x128xf32>
    %340 = arith.mulf %338, %339 : vector<1x128xf32>
    %341 = vector.broadcast %340 : vector<1x128xf32> to vector<16x128xf32>
    %342 = arith.subf %334, %341 : vector<16x128xf32>
    %343 = arith.mulf %342, %342 : vector<16x128xf32>
    %cst_171 = arith.constant dense<0.000000e+00> : vector<128xf32>
    %344 = vector.multi_reduction <add>, %343, %cst_171 [0] : vector<16x128xf32> to vector<128xf32>
    %345 = vector.shape_cast %344 : vector<128xf32> to vector<1x128xf32>
    %cst_172 = arith.constant 6.250000e-02 : f32
    %346 = vector.broadcast %cst_172 : f32 to vector<1x128xf32>
    %347 = arith.mulf %345, %346 : vector<1x128xf32>
    %cst_173 = arith.constant 9.99999974E-6 : f32
    %348 = vector.broadcast %cst_173 : f32 to vector<1x128xf32>
    %349 = arith.addf %347, %348 : vector<1x128xf32>
    %350 = math.rsqrt %349 : vector<1x128xf32>
    %351 = arith.mulf %350, %335 : vector<1x128xf32>
    %352 = vector.broadcast %351 : vector<1x128xf32> to vector<16x128xf32>
    %353 = arith.mulf %342, %352 : vector<16x128xf32>
    %354 = vector.broadcast %336 : vector<1x128xf32> to vector<16x128xf32>
    %355 = arith.addf %353, %354 : vector<16x128xf32>
    %356 = arith.addf %355, %306 : vector<16x128xf32>
    %cst_174 = arith.constant 0.000000e+00 : f32
    %357 = vector.broadcast %cst_174 : f32 to vector<16x128xf32>
    %358 = arith.maximumf %356, %357 : vector<16x128xf32>
    %359 = arith.truncf %358 : vector<16x128xf32> to vector<16x128xbf16>
    %c640 = arith.constant 640 : index
    %c0_175 = arith.constant 0 : index
    %360 = vector.load %arg9[%c640, %c0_175] : memref<768x128xbf16, #tpu.memory_space<vmem>>, vector<128x128xbf16>
    %cst_176 = arith.constant dense<0.000000e+00> : vector<16x128xf32>
    %361 = tpu.matmul %359, %360, %cst_176 {dimension_numbers = #tpu.dot_dimension_numbers<[1], [0], [0], [1], [0, 0, 1, 1], [], []>} : vector<16x128xbf16>, vector<128x128xbf16>, vector<16x128xf32> -> vector<16x128xf32>
    %c26 = arith.constant 26 : index
    %c0_177 = arith.constant 0 : index
    %362 = vector.load %arg2[%c26, %c0_177] : memref<32x256xf32, #tpu.memory_space<vmem>>, vector<1x128xf32>
    %363 = vector.broadcast %362 : vector<1x128xf32> to vector<16x128xf32>
    %364 = arith.addf %361, %363 : vector<16x128xf32>
    %c0_178 = arith.constant 0 : index
    %c0_179 = arith.constant 0 : index
    %365 = vector.load %arg6[%c0_178, %c0_179] : memref<16x128xf32, #tpu.memory_space<vmem>>, vector<16x128xf32>
    tpu.vector_store %arg6[%c0_178, %c0_179], %364 {strides = array<i32>} : memref<16x128xf32, #tpu.memory_space<vmem>>, vector<16x128xf32>,
    return
  }
  func.func @transform_0(%arg0: i32) -> (i32, i32) {
    %c0_i32 = arith.constant 0 : i32
    %c0_i32_0 = arith.constant 0 : i32
    %c0_i32_1 = arith.constant 0 : i32
    return %c0_i32, %c0_i32_0 : i32, i32
  }
  func.func @transform_1(%arg0: i32) -> (i32, i32) {
    %c0_i32 = arith.constant 0 : i32
    %c0_i32_0 = arith.constant 0 : i32
    %c0_i32_1 = arith.constant 0 : i32
    return %c0_i32, %c0_i32_0 : i32, i32
  }
  func.func @transform_5(%arg0: i32) -> (i32, i32) {
    %c0_i32 = arith.constant 0 : i32
    %c0_i32_0 = arith.constant 0 : i32
    %c0_i32_1 = arith.constant 0 : i32
    return %c0_i32, %c0_i32_0 : i32, i32
  }
}

</mosaic_0001>

<bundles_post_ra>
// kernel: tpu_custom_call.1
= control target key start
LH: loop header
LB: loop body
LE: loop exit
PB: predicated region body
PF: predicated region fallthrough
CT: control target
= control target key end

     0   :  { %10 = vsyncpa [#allocation7], 0  ;;  %s2624_s0 = inlined_call_operand.vmem [shape: f32[16,2], index: 0, kind: input, shape index: {}]   ;;  %s2625_s1 = inlined_call_operand.hbm [shape: f32[32,256], index: 1, kind: input, shape index: {}]   ;;  %s2626_s2 = inlined_call_operand.hbm [shape: bf16[512,256], index: 2, kind: input, shape index: {}]   ;;  %s2627_s3 = inlined_call_operand.hbm [shape: bf16[3,512,256], index: 3, kind: input, shape index: {}]   ;;  %s2628_s4 = inlined_call_operand.hbm [shape: bf16[768,128], index: 4, kind: input, shape index: {}]   ;;  %s2629_s5 = inlined_call_operand.hbm [shape: f32[16,128], index: 5, kind: output, shape index: {}]  }
   0x1   :  { %11 = vsyncpa [#allocation8], 0  ;;  %s2279_s18 = smov [#allocation6]   ;;  %s2199_s22 = scalar_lea.hbm %s2625_s1, 1024 }
   0x2   :  { %s19_s19 = sshll.u32 %s2279_s18, 4  ;;  %p2200_p0 = scmp.ne.s32.totalorder %s2625_s1, %s2199_s22  ;;  %s20_s19 = int_to_ptr.vmem [resolvable:$true] %s19_s19 }
   0x3   :  { %p2203_p1 = scmp.lt.u32.totalorder %s2199_s22, %s2625_s1 }
   0x5   :  { %p2205_p2 = pnand %p2203_p1, %p2200_p0 }
   0x7   :  { %2208 = shalt.err (!%p2205_p2)
}
   0x8   :  { %s2209_s27 = scalar_lea.vmem %s20_s19, 1024  ;;  %p2214_p4 = scmp.lt.s32.totalorder %s20_s19, %s20_s19 }
   0x9   :  { %p2210_p3 = scmp.ne.s32.totalorder %s20_s19, %s2209_s27  ;;  %p2215_p5 = scmp.lt.s32.totalorder %s2209_s27, %s2209_s27 }
   0xb   :  { %p2216_p6 = por %p2215_p5, %p2214_p4 }
   0xd   :  { %p2217_p7 = pnand %p2216_p6, %p2210_p3 }
   0xf   :  { %2220 = shalt.err (!%p2217_p7)
}
  0x10   :  { %s2280_s28 = smov 256   ;;  %s2281_s29 = smov 16  }
  0x11   :  { %25 = dma.hbm_to_vmem [thread:$0]  %s2625_s1, 1024, %s20_s19, [#allocation7], %s2280_s28, %s2280_s28, %s2281_s29  }
  0x12   :  { %2265 = dma.done.wait [#allocation7], 1024  }
  0x13   :  { %2266 = vsyncadd [#allocation7], 4294966272  ;;  %s34_s7 = sld [smem:[#allocation0]]   ;;  %46 = sst [smem:[#allocation11]] %s2280_s28  ;;  %v2282_v0 = vmov 1   ;;  %v2283_v1 = vmov 0  }
  0x14   :  { %2159 = vset.pattern.permute.xlu1 %v2282_v0  ;;  %2158 = vset.pattern.permute.xlu0 %v2283_v1  ;;  %48 = sst [smem:[#allocation11 + $0x1]] %s2280_s28  ;;  %s2284_s8 = smov 2  }
  0x15   :  { %50 = sst [smem:[#allocation11 + $0x2]] %s2284_s8  ;;  %s2285_s9 = smov 64  }
  0x16   :  { %52 = sst [smem:[#allocation11 + $0x3]] %s2285_s9  ;;  %s2286_s1 = smov [#allocation2]  }
  0x17   :  { %s42_s10 = sshll.u32 %s2286_s1, 4  ;;  %s2287_s11 = smov 128   ;;  %s43_s10 = int_to_ptr.vmem [resolvable:$true] %s42_s10 }
  0x18   :  { %54 = sst [smem:[#allocation11 + $0x4]] %s2287_s11  ;;  %s2288_s14 = smov 4  }
  0x19   :  { %56 = sst [smem:[#allocation11 + $0x5]] %s2284_s8  ;;  %s2017_s12 = sshll.u32 %s34_s7, 26 }
  0x1a   :  { %58 = sst [smem:[#allocation11 + $0x6]] %s2287_s11  ;;  %s2358_s13 = sadd.s32 134217728, %s2017_s12 }
  0x1b   :  { %60 = sst [smem:[#allocation11 + $0x7]] %s2285_s9  ;;  %s2289_s15 = smov [#allocation5]  }
  0x1c   :  { %62 = sst [smem:[#allocation11 + $0x8]] %s2288_s14  ;;  %s2290_s16 = smov [#allocation10]  }
  0x1d   :  { %64 = dma.general %s2626_s2, 8192, %s43_s10, %s2289_s15, %s2290_s16, [#allocation11], %s2358_s13, 0  }
  0x1e   :  { %81 = sst [smem:[#allocation13]] %s2280_s28  ;;  %s2291_s19 = smov [#allocation3]  }
  0x1f   :  { %83 = sst [smem:[#allocation13 + $0x1]] %s2280_s28  ;;  %s77_s20 = sshll.u32 %s2291_s19, 4  ;;  %s78_s20 = int_to_ptr.vmem [resolvable:$true] %s77_s20 }
  0x20   :  { %85 = sst [smem:[#allocation13 + $0x2]] %s2284_s8  ;;  %s2292_s2 = smov [#allocation5 + $0x1]  }
  0x21   :  { %87 = sst [smem:[#allocation13 + $0x3]] %s2285_s9  ;;  %s2293_s21 = smov [#allocation12]  }
  0x22   :  { %89 = sst [smem:[#allocation13 + $0x4]] %s2287_s11  ;;  %s2294_s24 = smov [#allocation3 + $0x200]  }
  0x23   :  { %91 = sst [smem:[#allocation13 + $0x5]] %s2284_s8  ;;  %s114_s25 = sshll.u32 %s2294_s24, 4  ;;  %s115_s25 = int_to_ptr.vmem [resolvable:$true] %s114_s25 }
  0x24   :  { %93 = sst [smem:[#allocation13 + $0x6]] %s2287_s11  ;;  %s100_s29 = scalar_lea.hbm %s2627_s3, 8192 }
  0x25   :  { %95 = sst [smem:[#allocation13 + $0x7]] %s2285_s9  ;;  %s2295_s30 = smov [#allocation5 + $0x2]  }
  0x26   :  { %97 = sst [smem:[#allocation13 + $0x8]] %s2288_s14  ;;  %s2296_s6 = smov [#allocation14]  }
  0x27   :  { %99 = dma.general %s2627_s3, 8192, %s78_s20, %s2292_s2, %s2293_s21, [#allocation13], %s2358_s13, 0  }
  0x28   :  { %118 = sst [smem:[#allocation15]] %s2280_s28  ;;  %s2297_s7 = smov [#allocation3 + $0x400]  }
  0x29   :  { %120 = sst [smem:[#allocation15 + $0x1]] %s2280_s28  ;;  %s151_s1 = sshll.u32 %s2297_s7, 4  ;;  %s152_s1 = int_to_ptr.vmem [resolvable:$true] %s151_s1 }
  0x2a   :  { %122 = sst [smem:[#allocation15 + $0x2]] %s2284_s8  ;;  %s137_s15 = scalar_lea.hbm %s2627_s3, 16384 }
  0x2b   :  { %124 = sst [smem:[#allocation15 + $0x3]] %s2285_s9  ;;  %s2299_s16 = smov [#allocation16]  }
  0x2c   :  { %126 = sst [smem:[#allocation15 + $0x4]] %s2287_s11 }
  0x2d   :  { %128 = sst [smem:[#allocation15 + $0x5]] %s2284_s8 }
  0x2e   :  { %130 = sst [smem:[#allocation15 + $0x6]] %s2287_s11 }
  0x2f   :  { %132 = sst [smem:[#allocation15 + $0x7]] %s2285_s9 }
  0x30   :  { %134 = sst [smem:[#allocation15 + $0x8]] %s2288_s14 }
  0x31   :  { %136 = dma.general %s100_s29, 8192, %s115_s25, %s2295_s30, %s2296_s6, [#allocation15], %s2358_s13, 0  }
  0x32   :  { %155 = sst [smem:[#allocation17]] %s2280_s28 }
  0x33   :  { %157 = sst [smem:[#allocation17 + $0x1]] %s2280_s28  ;;  %s2298_s28 = smov [#allocation5 + $0x3]  }
  0x34   :  { %159 = sst [smem:[#allocation17 + $0x2]] %s2284_s8 }
  0x35   :  { %161 = sst [smem:[#allocation17 + $0x3]] %s2285_s9 }
  0x36   :  { %163 = sst [smem:[#allocation17 + $0x4]] %s2287_s11 }
  0x37   :  { %165 = sst [smem:[#allocation17 + $0x5]] %s2284_s8  ;;  %s2300_s8 = smov [#allocation4]  }
  0x38   :  { %167 = sst [smem:[#allocation17 + $0x6]] %s2287_s11 }
  0x39   :  { %169 = sst [smem:[#allocation17 + $0x7]] %s2285_s9  ;;  %s182_s9 = sshll.u32 %s2300_s8, 4  ;;  %s183_s9 = int_to_ptr.vmem [resolvable:$true] %s182_s9 }
  0x3a   :  { %171 = sst [smem:[#allocation17 + $0x8]] %s2288_s14 }
  0x3b   :  { %173 = dma.general %s137_s15, 8192, %s152_s1, %s2298_s28, %s2299_s16, [#allocation17], %s2358_s13, 0  }
  0x3c   :  { %v186_v2 = vld [vmem:[%s2624_s0] sm:$0xff]  ;;  %v187_v3 = vld [vmem:[%s2624_s0 + $0x8] sm:$0xff]  ;;  %s2221_s13 = scalar_lea.hbm %s2628_s4, 6144 }
  0x3d   :  { %203 = vperm.xlu1 %2159, %v186_v2   ;;  %191 = vperm.xlu0 %2158, %v186_v2   ;;  %p2222_p8 = scmp.ne.s32.totalorder %s2628_s4, %s2221_s13  ;;  %p2225_p9 = scmp.lt.u32.totalorder %s2221_s13, %s2628_s4 }
  0x3f   :  { %p2227_p10 = pnand %p2225_p9, %p2222_p8 }
  0x41   :  { %207 = vperm.xlu1 %2159, %v187_v3   ;;  %196 = vperm.xlu0 %2158, %v187_v3  }
  0x45   :  { %2160 = vset.pattern.permute.xlu0 %v2282_v0 }
  0x46   :  { %2230 = shalt.err (!%p2227_p10)  }
  0x47   :  { %s2231_s0 = scalar_lea.vmem %s183_s9, 6144  ;;  %p2236_p12 = scmp.lt.s32.totalorder %s183_s9, %s183_s9 }
  0x48   :  { %p2232_p11 = scmp.ne.s32.totalorder %s183_s9, %s2231_s0  ;;  %p2237_p13 = scmp.lt.s32.totalorder %s2231_s0, %s2231_s0 }
  0x4a   :  { %p2238_p0 = por %p2237_p13, %p2236_p12 }
  0x4c   :  { %p2239_p1 = pnand %p2238_p0, %p2232_p11 }
  0x4e   :  { %2242 = shalt.err (!%p2239_p1)  }
  0x4f   :  { %185 = dma.hbm_to_vmem [thread:$0]  %s2628_s4, 6144, %s183_s9, [#allocation5 + $0x4]  ;;  %v201_v4 = vld [vmem:[#allocation6 + $0x1] ss:$0 sm:$0xff]  ;;  %v188_v6 = vld [vmem:[#allocation6] ss:$0 sm:$0xff] }
  0x50   :  { %v214_v37 = vld [vmem:[#allocation6 + $0x2] ss:$0 sm:$0xff]  ;;  %v215_v40 = vld [vmem:[#allocation6 + $0x3] ss:$0 sm:$0xff] }
  0xbc   :  { %v204_v5 = vpop.permute.xlu1 %203  ;;  %v192_v7 = vpop.permute.xlu0 %191 }
  0xbd   :  { %v210_v8 = vmul.f32 %v204_v5, %v201_v4  ;;  %v199_v9 = vmul.f32 %v192_v7, %v188_v6 }
  0xbf   :  { %v212_v14 = vadd.f32 %v210_v8, %v199_v9 }
  0xc0   :  { %v208_v10 = vpop.permute.xlu1 %207  ;;  %v197_v11 = vpop.permute.xlu0 %196 }
  0xc1   :  { %v211_v12 = vmul.f32 %v208_v10, %v201_v4  ;;  %v200_v13 = vmul.f32 %v197_v11, %v188_v6 }
  0xc3   :  { %v213_v15 = vadd.f32 %v211_v12, %v200_v13 }
  0xc5   :  { %v216_v16 = vadd.f32 %v213_v15, %v212_v14 }
  0xc7   :  { %v217_v17 = vrot.slane %v216_v16, 4 }
  0xc9   :  { %v218_v18 = vadd.f32 %v217_v17, %v216_v16 }
  0xcb   :  { %v219_v19 = vrot.slane %v218_v18, 2 }
  0xcd   :  { %v220_v20 = vadd.f32 %v219_v19, %v218_v18 }
  0xcf   :  { %v221_v21 = vrot.slane %v220_v20, 1 }
  0xd1   :  { %v222_v22 = vadd.f32 %v221_v21, %v220_v20 }
  0xd3   :  { %v223_v23 = vmul.f32 0.0625, %v222_v22 }
  0xd5   :  { %v224_v24 = vsub.f32 %v212_v14, %v223_v23  ;;  %v225_v25 = vsub.f32 %v213_v15, %v223_v23 }
  0xd7   :  { %v226_v26 = vmul.f32 %v224_v24, %v224_v24  ;;  %v227_v27 = vmul.f32 %v225_v25, %v225_v25 }
  0xd9   :  { %v228_v28 = vadd.f32 %v227_v27, %v226_v26 }
  0xdb   :  { %v229_v29 = vrot.slane %v228_v28, 4 }
  0xdd   :  { %v230_v30 = vadd.f32 %v229_v29, %v228_v28 }
  0xdf   :  { %v231_v31 = vrot.slane %v230_v30, 2 }
  0xe1   :  { %v232_v32 = vadd.f32 %v231_v31, %v230_v30 }
  0xe3   :  { %v233_v33 = vrot.slane %v232_v32, 1 }
  0xe5   :  { %v234_v34 = vadd.f32 %v233_v33, %v232_v32 }
  0xe7   :  { %v235_v35 = vmul.f32 0.0625, %v234_v34 }
  0xe9   :  { %v236_v36 = vadd.f32 1e-05, %v235_v35 }
  0xeb   :  { %2161 = vrsqrt.f32 %v236_v36 }
  0xf5   :  { %v2162_v38 = vpop.eup %2161 }
  0xf6   :  { %v238_v39 = vmul.f32 %v2162_v38, %v214_v37 }
  0xf8   :  { %v239_v41 = vmul.f32 %v238_v39, %v224_v24  ;;  %v240_v42 = vmul.f32 %v238_v39, %v225_v25 }
  0xfa   :  { %v2424_v43 = vadd.f32 %v239_v41, %v215_v40  ;;  %v2426_v44 = vadd.f32 %v240_v42, %v215_v40 }
  0xfc   :  { %v243_v45 = vmax.f32 %v2424_v43, 0.0  ;;  %v244_v46 = vmax.f32 %v2426_v44, 0.0 }
  0xfd   :  { %2267 = dma.done.wait [#allocation5], 8192 }
  0xfe   :  { %2268 = vsyncadd [#allocation5], 4294959104  ;;  %370 = vmatprep.mubr.bf16.mxu1 %v2283_v1  ;;  %311 = vmatprep.mubr.bf16.mxu0 %v2283_v1  ;;  %v323_v47 = vld [vmem:[#allocation2 + $0x8] sm:$0xff]  ;;  %v322_v48 = vld [vmem:[#allocation2] sm:$0xff]  ;;  %v249_v13 = vpack.c.bf16 %v244_v46, %v243_v45 }
  0xff   :  { %v325_v49 = vld [vmem:[#allocation2 + $0x18] sm:$0xff]  ;;  %338 = vmatprep.subr.bf16.mxu1 %v323_v47  ;;  %v324_v50 = vld [vmem:[#allocation2 + $0x10] sm:$0xff]  ;;  %v327_v51 = vld [vmem:[#allocation2 + $0x28] sm:$0xff] }
 0x100   :  { %339 = vmatpush1.bf16.msra.mxu1 %v322_v48  ;;  %v251_v52 = vld [vmem:[#allocation2 + $0x88] sm:$0xff]  ;;  %v250_v53 = vld [vmem:[#allocation2 + $0x80] sm:$0xff]  ;;  %v253_v54 = vld [vmem:[#allocation2 + $0x98] sm:$0xff] }
 0x101   :  { %340 = vmatprep.subr.bf16.mxu1 %v325_v49  ;;  %279 = vmatprep.subr.bf16.mxu0 %v251_v52  ;;  %v326_v55 = vld [vmem:[#allocation2 + $0x20] sm:$0xff]  ;;  %v329_v56 = vld [vmem:[#allocation2 + $0x38] sm:$0xff]  ;;  %v252_v57 = vld [vmem:[#allocation2 + $0x90] sm:$0xff] }
 0x102   :  { %280 = vmatpush1.bf16.msra.mxu0 %v250_v53  ;;  %v255_v58 = vld [vmem:[#allocation2 + $0xa8] sm:$0xff]  ;;  %v328_v59 = vld [vmem:[#allocation2 + $0x30] sm:$0xff]  ;;  %v254_v61 = vld [vmem:[#allocation2 + $0xa0] sm:$0xff] }
 0x103   :  { %281 = vmatprep.subr.bf16.mxu0 %v253_v54  ;;  %v331_v60 = vld [vmem:[#allocation2 + $0x48] sm:$0xff]  ;;  %v257_v62 = vld [vmem:[#allocation2 + $0xb8] sm:$0xff]  ;;  %v330_v63 = vld [vmem:[#allocation2 + $0x40] sm:$0xff] }
 0x104   :  { %341 = vmatpush1.bf16.msra.mxu1 %v324_v50  ;;  %v333_v0 = vld [vmem:[#allocation2 + $0x58] sm:$0xff]  ;;  %v256_v1 = vld [vmem:[#allocation2 + $0xb0] sm:$0xff]  ;;  %v259_v2 = vld [vmem:[#allocation2 + $0xc8] sm:$0xff] }
 0x105   :  { %342 = vmatprep.subr.bf16.mxu1 %v327_v51  ;;  %v332_v3 = vld [vmem:[#allocation2 + $0x50] sm:$0xff]  ;;  %v335_v4 = vld [vmem:[#allocation2 + $0x68] sm:$0xff]  ;;  %v258_v5 = vld [vmem:[#allocation2 + $0xc0] sm:$0xff] }
 0x106   :  { %282 = vmatpush1.bf16.msra.mxu0 %v252_v57  ;;  %v261_v6 = vld [vmem:[#allocation2 + $0xd8] sm:$0xff]  ;;  %v334_v7 = vld [vmem:[#allocation2 + $0x60] sm:$0xff]  ;;  %v260_v9 = vld [vmem:[#allocation2 + $0xd0] sm:$0xff] }
 0x107   :  { %283 = vmatprep.subr.bf16.mxu0 %v255_v58  ;;  %v337_v8 = vld [vmem:[#allocation2 + $0x78] sm:$0xff]  ;;  %v263_v10 = vld [vmem:[#allocation2 + $0xe8] sm:$0xff]  ;;  %v336_v11 = vld [vmem:[#allocation2 + $0x70] sm:$0xff] }
 0x108   :  { %343 = vmatpush1.bf16.msra.mxu1 %v326_v55  ;;  %v262_v12 = vld [vmem:[#allocation2 + $0xe0] sm:$0xff]  ;;  %v265_v14 = vld [vmem:[#allocation2 + $0xf8] sm:$0xff]  ;;  %v264_v15 = vld [vmem:[#allocation2 + $0xf0] sm:$0xff] }
 0x109   :  { %344 = vmatprep.subr.bf16.mxu1 %v329_v56  ;;  %v476_v16 = vld [vmem:[#allocation2 + $0x108] sm:$0xff]  ;;  %v475_v17 = vld [vmem:[#allocation2 + $0x100] sm:$0xff]  ;;  %v478_v18 = vld [vmem:[#allocation2 + $0x118] sm:$0xff] }
 0x10a   :  { %284 = vmatpush1.bf16.msra.mxu0 %v254_v61  ;;  %v477_v19 = vld [vmem:[#allocation2 + $0x110] sm:$0xff]  ;;  %v480_v20 = vld [vmem:[#allocation2 + $0x128] sm:$0xff]  ;;  %v479_v21 = vld [vmem:[#allocation2 + $0x120] sm:$0xff] }
 0x10b   :  { %285 = vmatprep.subr.bf16.mxu0 %v257_v62  ;;  %v482_v22 = vld [vmem:[#allocation2 + $0x138] sm:$0xff]  ;;  %v481_v23 = vld [vmem:[#allocation2 + $0x130] sm:$0xff]  ;;  %v484_v24 = vld [vmem:[#allocation2 + $0x148] sm:$0xff] }
 0x10c   :  { %345 = vmatpush1.bf16.msra.mxu1 %v328_v59  ;;  %v483_v25 = vld [vmem:[#allocation2 + $0x140] sm:$0xff]  ;;  %v486_v26 = vld [vmem:[#allocation2 + $0x158] sm:$0xff]  ;;  %v485_v27 = vld [vmem:[#allocation2 + $0x150] sm:$0xff] }
 0x10d   :  { %346 = vmatprep.subr.bf16.mxu1 %v331_v60  ;;  %v488_v28 = vld [vmem:[#allocation2 + $0x168] sm:$0xff]  ;;  %v487_v29 = vld [vmem:[#allocation2 + $0x160] sm:$0xff]  ;;  %v490_v30 = vld [vmem:[#allocation2 + $0x178] sm:$0xff] }
 0x10e   :  { %286 = vmatpush1.bf16.msra.mxu0 %v256_v1  ;;  %v489_v31 = vld [vmem:[#allocation2 + $0x170] sm:$0xff]  ;;  %v492_v32 = vld [vmem:[#allocation2 + $0x188] sm:$0xff]  ;;  %v491_v33 = vld [vmem:[#allocation2 + $0x180] sm:$0xff] }
 0x10f   :  { %287 = vmatprep.subr.bf16.mxu0 %v259_v2  ;;  %v494_v34 = vld [vmem:[#allocation2 + $0x198] sm:$0xff]  ;;  %v493_v35 = vld [vmem:[#allocation2 + $0x190] sm:$0xff]  ;;  %v496_v36 = vld [vmem:[#allocation2 + $0x1a8] sm:$0xff] }
 0x110   :  { %347 = vmatpush1.bf16.msra.mxu1 %v330_v63  ;;  %v495_v37 = vld [vmem:[#allocation2 + $0x1a0] sm:$0xff]  ;;  %v498_v38 = vld [vmem:[#allocation2 + $0x1b8] sm:$0xff]  ;;  %v497_v39 = vld [vmem:[#allocation2 + $0x1b0] sm:$0xff] }
 0x111   :  { %348 = vmatprep.subr.bf16.mxu1 %v333_v0  ;;  %v500_v40 = vld [vmem:[#allocation2 + $0x1c8] sm:$0xff]  ;;  %v499_v41 = vld [vmem:[#allocation2 + $0x1c0] sm:$0xff]  ;;  %v502_v42 = vld [vmem:[#allocation2 + $0x1d8] sm:$0xff] }
 0x112   :  { %288 = vmatpush1.bf16.msra.mxu0 %v258_v5  ;;  %v501_v43 = vld [vmem:[#allocation2 + $0x1d0] sm:$0xff]  ;;  %v504_v44 = vld [vmem:[#allocation2 + $0x1e8] sm:$0xff]  ;;  %v503_v45 = vld [vmem:[#allocation2 + $0x1e0] sm:$0xff] }
 0x113   :  { %289 = vmatprep.subr.bf16.mxu0 %v261_v6  ;;  %v506_v46 = vld [vmem:[#allocation2 + $0x1f8] sm:$0xff]  ;;  %v505_v47 = vld [vmem:[#allocation2 + $0x1f0] sm:$0xff] }
 0x114   :  { %349 = vmatpush1.bf16.msra.mxu1 %v332_v3 }
 0x115   :  { %350 = vmatprep.subr.bf16.mxu1 %v335_v4 }
 0x116   :  { %290 = vmatpush1.bf16.msra.mxu0 %v260_v9 }
 0x117   :  { %291 = vmatprep.subr.bf16.mxu0 %v263_v10 }
 0x118   :  { %351 = vmatpush1.bf16.msra.mxu1 %v334_v7 }
 0x119   :  { %352 = vmatprep.subr.bf16.mxu1 %v337_v8 }
 0x11a   :  { %292 = vmatpush1.bf16.msra.mxu0 %v262_v12 }
 0x11b   :  { %293 = vmatprep.subr.bf16.mxu0 %v265_v14 }
 0x11c   :  { %353 = vmatpush1.bf16.msra.mxu1 %v336_v11 }
 0x11e   :  { %294 = vmatpush1.bf16.msra.mxu0 %v264_v15 }
 0x11f   :  { %371 = vmatmul.mubr.bf16.vlgmr.msra.gmra.mrb[0].mxu1 %v249_v13  ;;  %507 = vmatprep.subr.bf16.mxu0 %v476_v16 }
 0x121   :  { %312 = vmatmul.mubr.bf16.vlgmr.msra.gmra.mrb[0].mxu0 %v249_v13 }
 0x122   :  { %508 = vmatpush1.bf16.msra.mxu0 %v475_v17 }
 0x123   :  { %509 = vmatprep.subr.bf16.mxu0 %v478_v18 }
 0x126   :  { %510 = vmatpush1.bf16.msra.mxu0 %v477_v19 }
 0x127   :  { %511 = vmatprep.subr.bf16.mxu0 %v480_v20 }
 0x12a   :  { %512 = vmatpush1.bf16.msra.mxu0 %v479_v21 }
 0x12b   :  { %513 = vmatprep.subr.bf16.mxu0 %v482_v22 }
 0x12e   :  { %514 = vmatpush1.bf16.msra.mxu0 %v481_v23 }
 0x12f   :  { %515 = vmatprep.subr.bf16.mxu0 %v484_v24 }
 0x132   :  { %516 = vmatpush1.bf16.msra.mxu0 %v483_v25 }
 0x133   :  { %517 = vmatprep.subr.bf16.mxu0 %v486_v26 }
 0x136   :  { %518 = vmatpush1.bf16.msra.mxu0 %v485_v27 }
 0x137   :  { %519 = vmatprep.subr.bf16.mxu0 %v488_v28 }
 0x13a   :  { %520 = vmatpush1.bf16.msra.mxu0 %v487_v29  ;;  %v269_v29 = vlaneseq }
 0x13b   :  { %521 = vmatprep.subr.bf16.mxu0 %v490_v30 }
 0x13e   :  { %522 = vmatpush1.bf16.msra.mxu0 %v489_v31 }
 0x13f   :  { %523 = vmatprep.subr.bf16.mxu0 %v492_v32 }
 0x142   :  { %524 = vmatpush1.bf16.msra.mxu0 %v491_v33 }
 0x143   :  { %525 = vmatprep.subr.bf16.mxu0 %v494_v34  ;;  %v270_v34 = vshrl.u32 %v269_v29, 7 }
 0x146   :  { %526 = vmatpush1.bf16.msra.mxu0 %v493_v35 }
 0x147   :  { %527 = vmatprep.subr.bf16.mxu0 %v496_v36  ;;  %v2444_v36 = vsub.s32 0, %v270_v34 }
 0x14a   :  { %528 = vmatpush1.bf16.msra.mxu0 %v495_v37  ;;  %v382_v37 = vld [vmem:[#allocation6 + $0x4] ss:$8 sm:$0x3] }
 0x14b   :  { %529 = vmatprep.subr.bf16.mxu0 %v498_v38  ;;  %v2446_v38 = vsub.s32 1, %v270_v34 }
 0x14e   :  { %530 = vmatpush1.bf16.msra.mxu0 %v497_v39  ;;  %v433_v39 = vrot.slane %v382_v37, %v2444_v36 }
 0x14f   :  { %531 = vmatprep.subr.bf16.mxu0 %v500_v40  ;;  %v437_v40 = vrot.slane %v382_v37, %v2446_v38 }
 0x152   :  { %532 = vmatpush1.bf16.msra.mxu0 %v499_v41 }
 0x153   :  { %533 = vmatprep.subr.bf16.mxu0 %v502_v42  ;;  %v384_v42 = vld [vmem:[#allocation6 + $0x5] ss:$8 sm:$0x3] }
 0x156   :  { %534 = vmatpush1.bf16.msra.mxu0 %v501_v43 }
 0x157   :  { %535 = vmatprep.subr.bf16.mxu0 %v504_v44 }
 0x15a   :  { %536 = vmatpush1.bf16.msra.mxu0 %v503_v45 }
 0x15b   :  { %537 = vmatprep.subr.bf16.mxu0 %v506_v46 }
 0x15e   :  { %538 = vmatpush1.bf16.msra.mxu0 %v505_v47  ;;  %v458_v47 = vrot.slane %v384_v42, %v2444_v36 }
 0x1f2   :  { %v372_v48 = vpop.f32.mrb[0].mxu1 }
 0x1f3   :  { %v374_v49 = vpop.f32.mrb[1].mxu1 }
 0x1f4   :  { %v376_v50 = vpop.f32.mrb[2].mxu1  ;;  %v2436_v55 = vpop.f32.mrb[0].mxu0 }
 0x1f5   :  { %v385_v51 = vadd.f32 %v376_v50, %v372_v48  ;;  %v378_v52 = vpop.f32.mrb[3].mxu1  ;;  %v2438_v57 = vpop.f32.mrb[1].mxu0 }
 0x1f6   :  { %v392_v53 = vadd.f32 %v378_v52, %v374_v49  ;;  %v2440_v59 = vpop.f32.mrb[2].mxu0 }
 0x1f7   :  { %v386_v54 = vrot.slane %v385_v51, 4  ;;  %v2442_v61 = vpop.f32.mrb[3].mxu0 }
 0x1f8   :  { %v393_v56 = vrot.slane %v392_v53, 4 }
 0x1f9   :  { %v387_v58 = vadd.f32 %v386_v54, %v385_v51 }
 0x1fa   :  { %v394_v60 = vadd.f32 %v393_v56, %v392_v53 }
 0x1fb   :  { %v388_v62 = vrot.slane %v387_v58, 2 }
 0x1fc   :  { %v395_v63 = vrot.slane %v394_v60, 2 }
 0x1fd   :  { %v389_v0 = vadd.f32 %v388_v62, %v387_v58 }
 0x1fe   :  { %v396_v1 = vadd.f32 %v395_v63, %v394_v60 }
 0x1ff   :  { %v390_v2 = vrot.slane %v389_v0, 1 }
 0x200   :  { %v397_v3 = vrot.slane %v396_v1, 1 }
 0x201   :  { %v391_v4 = vadd.f32 %v390_v2, %v389_v0 }
 0x202   :  { %v398_v5 = vadd.f32 %v397_v3, %v396_v1 }
 0x203   :  { %v399_v6 = vmul.f32 0.0625, %v391_v4 }
 0x204   :  { %v400_v7 = vmul.f32 0.0625, %v398_v5 }
 0x205   :  { %v401_v8 = vsub.f32 %v372_v48, %v399_v6  ;;  %v403_v9 = vsub.f32 %v376_v50, %v399_v6 }
 0x206   :  { %v402_v10 = vsub.f32 %v374_v49, %v400_v7  ;;  %v404_v11 = vsub.f32 %v378_v52, %v400_v7  ;;  %v462_v49 = vrot.slane %v384_v42, %v2446_v38 }
 0x207   :  { %v405_v12 = vmul.f32 %v401_v8, %v401_v8  ;;  %v407_v13 = vmul.f32 %v403_v9, %v403_v9 }
 0x208   :  { %v406_v14 = vmul.f32 %v402_v10, %v402_v10  ;;  %v408_v15 = vmul.f32 %v404_v11, %v404_v11 }
 0x209   :  { %v409_v16 = vadd.f32 %v407_v13, %v405_v12 }
 0x20a   :  { %v416_v17 = vadd.f32 %v408_v15, %v406_v14 }
 0x20b   :  { %v410_v18 = vrot.slane %v409_v16, 4 }
 0x20c   :  { %v417_v19 = vrot.slane %v416_v17, 4 }
 0x20d   :  { %v411_v20 = vadd.f32 %v410_v18, %v409_v16 }
 0x20e   :  { %v418_v21 = vadd.f32 %v417_v19, %v416_v17 }
 0x20f   :  { %v412_v22 = vrot.slane %v411_v20, 2 }
 0x210   :  { %v419_v23 = vrot.slane %v418_v21, 2 }
 0x211   :  { %v413_v24 = vadd.f32 %v412_v22, %v411_v20 }
 0x212   :  { %v420_v25 = vadd.f32 %v419_v23, %v418_v21 }
 0x213   :  { %v414_v26 = vrot.slane %v413_v24, 1 }
 0x214   :  { %v421_v27 = vrot.slane %v420_v25, 1 }
 0x215   :  { %v415_v28 = vadd.f32 %v414_v26, %v413_v24 }
 0x216   :  { %v422_v30 = vadd.f32 %v421_v27, %v420_v25 }
 0x217   :  { %v423_v31 = vmul.f32 0.0625, %v415_v28 }
 0x218   :  { %v424_v32 = vmul.f32 0.0625, %v422_v30 }
 0x219   :  { %v425_v33 = vadd.f32 1e-05, %v423_v31 }
 0x21a   :  { %v426_v35 = vadd.f32 1e-05, %v424_v32 }
 0x21b   :  { %2163 = vrsqrt.f32 %v425_v33 }
 0x21c   :  { %2165 = vrsqrt.f32 %v426_v35 }
 0x225   :  { %v2164_v41 = vpop.eup %2163 }
 0x226   :  { %v2166_v43 = vpop.eup %2165  ;;  %v440_v44 = vmul.f32 %v2164_v41, %v433_v39 }
 0x227   :  { %v441_v45 = vmul.f32 %v2166_v43, %v437_v40 }
 0x228   :  { %v445_v46 = vrot.slane %v440_v44, %v2444_v36 }
 0x229   :  { %v449_v48 = vrot.slane %v441_v45, %v2444_v36 }
 0x22a   :  { %v450_v50 = vmul.f32 %v445_v46, %v401_v8  ;;  %v452_v51 = vmul.f32 %v445_v46, %v403_v9 }
 0x22b   :  { %v451_v52 = vmul.f32 %v449_v48, %v402_v10  ;;  %v453_v53 = vmul.f32 %v449_v48, %v404_v11 }
 0x22c   :  { %v465_v54 = vadd.f32 %v458_v47, %v450_v50  ;;  %v467_v56 = vadd.f32 %v458_v47, %v452_v51 }
 0x22d   :  { %v468_v58 = vadd.f32 %v462_v49, %v453_v53  ;;  %v466_v60 = vadd.f32 %v462_v49, %v451_v52  ;;  %v551_v52 = vld [vmem:[#allocation6 + $0x6] ss:$8 sm:$0x3] }
 0x22e   :  { %v471_v62 = vmax.f32 %v467_v56, 0.0  ;;  %v469_v63 = vmax.f32 %v465_v54, 0.0  ;;  %v602_v53 = vrot.slane %v551_v52, %v2444_v36  ;;  %v606_v54 = vrot.slane %v551_v52, %v2446_v38 }
 0x22f   :  { %v472_v0 = vmax.f32 %v468_v58, 0.0  ;;  %v470_v1 = vmax.f32 %v466_v60, 0.0  ;;  %v267_v58 = vld [vmem:[#allocation6 + $0x10] ss:$8 sm:$0x3] }
 0x230   :  { %v473_v2 = vpack.c.bf16 %v471_v62, %v469_v63  ;;  %v553_v60 = vld [vmem:[#allocation6 + $0x7] ss:$8 sm:$0x3] }
 0x231   :  { %v474_v3 = vpack.c.bf16 %v472_v0, %v470_v1  ;;  %v272_v1 = vrot.slane %v267_v58, %v2444_v36 }
 0x233   :  { %539 = vmatprep.mubr.bf16.mxu0 %v474_v3  ;;  %v627_v3 = vrot.slane %v553_v60, %v2444_v36 }
 0x234   :  { %540 = vmatmul.mubr.bf16.vlgmr.msra.gmra.mrb[4].mxu0 %v473_v2 }
 0x307   :  { %v541_v4 = vpop.f32.mrb[4].mxu0 }
 0x308   :  { %v543_v5 = vpop.f32.mrb[5].mxu0 }
 0x309   :  { %v545_v6 = vpop.f32.mrb[6].mxu0 }
 0x30a   :  { %v554_v7 = vadd.f32 %v545_v6, %v541_v4  ;;  %v547_v8 = vpop.f32.mrb[7].mxu0 }
 0x30b   :  { %v561_v9 = vadd.f32 %v547_v8, %v543_v5 }
 0x30c   :  { %v555_v10 = vrot.slane %v554_v7, 4 }
 0x30d   :  { %v562_v11 = vrot.slane %v561_v9, 4 }
 0x30e   :  { %v556_v12 = vadd.f32 %v555_v10, %v554_v7 }
 0x30f   :  { %v563_v13 = vadd.f32 %v562_v11, %v561_v9  ;;  %v314_v11 = vadd.f32 %v2436_v55, %v272_v1 }
 0x310   :  { %v557_v14 = vrot.slane %v556_v12, 2 }
 0x311   :  { %v564_v15 = vrot.slane %v563_v13, 2 }
 0x312   :  { %v558_v16 = vadd.f32 %v557_v14, %v556_v12  ;;  %v318_v12 = vadd.f32 %v2440_v59, %v272_v1 }
 0x313   :  { %v565_v17 = vadd.f32 %v564_v15, %v563_v13 }
 0x314   :  { %v559_v18 = vrot.slane %v558_v16, 1 }
 0x315   :  { %v566_v19 = vrot.slane %v565_v17, 1 }
 0x316   :  { %v560_v20 = vadd.f32 %v559_v18, %v558_v16 }
 0x317   :  { %v567_v21 = vadd.f32 %v566_v19, %v565_v17 }
 0x318   :  { %v568_v22 = vmul.f32 0.0625, %v560_v20 }
 0x319   :  { %v569_v23 = vmul.f32 0.0625, %v567_v21 }
 0x31a   :  { %v570_v24 = vsub.f32 %v541_v4, %v568_v22  ;;  %v572_v25 = vsub.f32 %v545_v6, %v568_v22  ;;  %v276_v4 = vrot.slane %v267_v58, %v2446_v38  ;;  %v631_v6 = vrot.slane %v553_v60, %v2446_v38 }
 0x31b   :  { %v571_v26 = vsub.f32 %v543_v5, %v569_v23  ;;  %v573_v27 = vsub.f32 %v547_v8, %v569_v23 }
 0x31c   :  { %v574_v28 = vmul.f32 %v570_v24, %v570_v24  ;;  %v576_v29 = vmul.f32 %v572_v25, %v572_v25  ;;  %v316_v15 = vadd.f32 %v2438_v57, %v276_v4  ;;  %v320_v16 = vadd.f32 %v2442_v61, %v276_v4 }
 0x31d   :  { %v575_v30 = vmul.f32 %v571_v26, %v571_v26  ;;  %v577_v31 = vmul.f32 %v573_v27, %v573_v27 }
 0x31e   :  { %v578_v32 = vadd.f32 %v576_v29, %v574_v28 }
 0x31f   :  { %v585_v33 = vadd.f32 %v577_v31, %v575_v30 }
 0x320   :  { %v579_v34 = vrot.slane %v578_v32, 4 }
 0x321   :  { %v586_v35 = vrot.slane %v585_v33, 4 }
 0x322   :  { %v580_v37 = vadd.f32 %v579_v34, %v578_v32 }
 0x323   :  { %v587_v39 = vadd.f32 %v586_v35, %v585_v33 }
 0x324   :  { %v581_v40 = vrot.slane %v580_v37, 2 }
 0x325   :  { %v588_v41 = vrot.slane %v587_v39, 2 }
 0x326   :  { %v582_v42 = vadd.f32 %v581_v40, %v580_v37 }
 0x327   :  { %v589_v43 = vadd.f32 %v588_v41, %v587_v39 }
 0x328   :  { %v583_v44 = vrot.slane %v582_v42, 1 }
 0x329   :  { %v590_v45 = vrot.slane %v589_v43, 1 }
 0x32a   :  { %v584_v46 = vadd.f32 %v583_v44, %v582_v42 }
 0x32b   :  { %v591_v47 = vadd.f32 %v590_v45, %v589_v43 }
 0x32c   :  { %v592_v48 = vmul.f32 0.0625, %v584_v46 }
 0x32d   :  { %v593_v49 = vmul.f32 0.0625, %v591_v47 }
 0x32e   :  { %v594_v50 = vadd.f32 1e-05, %v592_v48 }
 0x32f   :  { %v595_v51 = vadd.f32 1e-05, %v593_v49 }
 0x330   :  { %2167 = vrsqrt.f32 %v594_v50 }
 0x331   :  { %2169 = vrsqrt.f32 %v595_v51 }
 0x33a   :  { %v2168_v56 = vpop.eup %2167 }
 0x33b   :  { %v2170_v62 = vpop.eup %2169  ;;  %v609_v63 = vmul.f32 %v2168_v56, %v602_v53 }
 0x33c   :  { %v610_v0 = vmul.f32 %v2170_v62, %v606_v54 }
 0x33d   :  { %v614_v2 = vrot.slane %v609_v63, %v2444_v36 }
 0x33e   :  { %v618_v5 = vrot.slane %v610_v0, %v2444_v36 }
 0x33f   :  { %v619_v7 = vmul.f32 %v614_v2, %v570_v24  ;;  %v621_v8 = vmul.f32 %v614_v2, %v572_v25 }
 0x340   :  { %v620_v9 = vmul.f32 %v618_v5, %v571_v26  ;;  %v622_v10 = vmul.f32 %v618_v5, %v573_v27 }
 0x341   :  { %v634_v13 = vadd.f32 %v627_v3, %v619_v7  ;;  %v636_v14 = vadd.f32 %v627_v3, %v621_v8 }
 0x342   :  { %v635_v17 = vadd.f32 %v631_v6, %v620_v9  ;;  %v637_v18 = vadd.f32 %v631_v6, %v622_v10 }
 0x343   :  { %v2466_v19 = vadd.f32 %v634_v13, %v314_v11  ;;  %v2468_v20 = vadd.f32 %v636_v14, %v318_v12 }
 0x344   :  { %v2470_v21 = vadd.f32 %v635_v17, %v316_v15  ;;  %v2472_v22 = vadd.f32 %v637_v18, %v320_v16 }
 0x345   :  { %v642_v55 = vmax.f32 %v2466_v19, 0.0  ;;  %v644_v59 = vmax.f32 %v2468_v20, 0.0 }
 0x346   :  { %v643_v23 = vmax.f32 %v2470_v21, 0.0  ;;  %v645_v57 = vmax.f32 %v2472_v22, 0.0 }
 0x347   :  { %2269 = dma.done.wait [#allocation5 + $0x1], 8192 }
 0x348   :  { %2270 = vsyncadd [#allocation5 + $0x1], 4294959104  ;;  %v649_v61 = vpack.c.bf16 %v645_v57, %v643_v23  ;;  %v651_v24 = vld [vmem:[#allocation3 + $0x8] sm:$0xff]  ;;  %v650_v25 = vld [vmem:[#allocation3] sm:$0xff]  ;;  %v648_v62 = vpack.c.bf16 %v644_v59, %v642_v55 }
 0x349   :  { %v653_v26 = vld [vmem:[#allocation3 + $0x18] sm:$0xff]  ;;  %682 = vmatprep.subr.bf16.mxu1 %v651_v24  ;;  %v652_v27 = vld [vmem:[#allocation3 + $0x10] sm:$0xff]  ;;  %v655_v28 = vld [vmem:[#allocation3 + $0x28] sm:$0xff] }
 0x34a   :  { %714 = vmatprep.mubr.bf16.mxu1 %v649_v61  ;;  %683 = vmatpush1.bf16.msra.mxu1 %v650_v25  ;;  %v654_v29 = vld [vmem:[#allocation3 + $0x20] sm:$0xff]  ;;  %v657_v30 = vld [vmem:[#allocation3 + $0x38] sm:$0xff]  ;;  %v656_v31 = vld [vmem:[#allocation3 + $0x30] sm:$0xff] }
 0x34b   :  { %684 = vmatprep.subr.bf16.mxu1 %v653_v26  ;;  %v659_v32 = vld [vmem:[#allocation3 + $0x48] sm:$0xff]  ;;  %v658_v33 = vld [vmem:[#allocation3 + $0x40] sm:$0xff]  ;;  %v661_v34 = vld [vmem:[#allocation3 + $0x58] sm:$0xff] }
 0x34c   :  { %v660_v35 = vld [vmem:[#allocation3 + $0x50] sm:$0xff]  ;;  %v663_v37 = vld [vmem:[#allocation3 + $0x68] sm:$0xff]  ;;  %v662_v39 = vld [vmem:[#allocation3 + $0x60] sm:$0xff] }
 0x34d   :  { %v665_v40 = vld [vmem:[#allocation3 + $0x78] sm:$0xff]  ;;  %v664_v41 = vld [vmem:[#allocation3 + $0x70] sm:$0xff]  ;;  %v667_v42 = vld [vmem:[#allocation3 + $0x88] sm:$0xff] }
 0x34e   :  { %685 = vmatpush1.bf16.msra.mxu1 %v652_v27  ;;  %v666_v43 = vld [vmem:[#allocation3 + $0x80] sm:$0xff]  ;;  %v669_v44 = vld [vmem:[#allocation3 + $0x98] sm:$0xff]  ;;  %v668_v45 = vld [vmem:[#allocation3 + $0x90] sm:$0xff] }
 0x34f   :  { %686 = vmatprep.subr.bf16.mxu1 %v655_v28  ;;  %v671_v46 = vld [vmem:[#allocation3 + $0xa8] sm:$0xff]  ;;  %v670_v47 = vld [vmem:[#allocation3 + $0xa0] sm:$0xff]  ;;  %v673_v48 = vld [vmem:[#allocation3 + $0xb8] sm:$0xff] }
 0x350   :  { %v672_v49 = vld [vmem:[#allocation3 + $0xb0] sm:$0xff]  ;;  %v675_v50 = vld [vmem:[#allocation3 + $0xc8] sm:$0xff]  ;;  %v674_v51 = vld [vmem:[#allocation3 + $0xc0] sm:$0xff] }
 0x351   :  { %v677_v52 = vld [vmem:[#allocation3 + $0xd8] sm:$0xff]  ;;  %v676_v53 = vld [vmem:[#allocation3 + $0xd0] sm:$0xff]  ;;  %v679_v54 = vld [vmem:[#allocation3 + $0xe8] sm:$0xff] }
 0x352   :  { %687 = vmatpush1.bf16.msra.mxu1 %v654_v29  ;;  %v678_v56 = vld [vmem:[#allocation3 + $0xe0] sm:$0xff]  ;;  %v681_v58 = vld [vmem:[#allocation3 + $0xf8] sm:$0xff]  ;;  %v680_v60 = vld [vmem:[#allocation3 + $0xf0] sm:$0xff] }
 0x353   :  { %688 = vmatprep.subr.bf16.mxu1 %v657_v30  ;;  %v820_v63 = vld [vmem:[#allocation3 + $0x108] sm:$0xff]  ;;  %v819_v0 = vld [vmem:[#allocation3 + $0x100] sm:$0xff]  ;;  %v822_v1 = vld [vmem:[#allocation3 + $0x118] sm:$0xff] }
 0x354   :  { %851 = vmatprep.subr.bf16.mxu0 %v820_v63  ;;  %v821_v2 = vld [vmem:[#allocation3 + $0x110] sm:$0xff]  ;;  %v824_v3 = vld [vmem:[#allocation3 + $0x128] sm:$0xff]  ;;  %v823_v4 = vld [vmem:[#allocation3 + $0x120] sm:$0xff] }
 0x355   :  { %852 = vmatpush1.bf16.msra.mxu0 %v819_v0  ;;  %v826_v5 = vld [vmem:[#allocation3 + $0x138] sm:$0xff]  ;;  %v825_v6 = vld [vmem:[#allocation3 + $0x130] sm:$0xff]  ;;  %v828_v7 = vld [vmem:[#allocation3 + $0x148] sm:$0xff] }
 0x356   :  { %689 = vmatpush1.bf16.msra.mxu1 %v656_v31  ;;  %853 = vmatprep.subr.bf16.mxu0 %v822_v1  ;;  %v827_v8 = vld [vmem:[#allocation3 + $0x140] sm:$0xff]  ;;  %v830_v9 = vld [vmem:[#allocation3 + $0x158] sm:$0xff]  ;;  %v829_v10 = vld [vmem:[#allocation3 + $0x150] sm:$0xff] }
 0x357   :  { %690 = vmatprep.subr.bf16.mxu1 %v659_v32  ;;  %v832_v11 = vld [vmem:[#allocation3 + $0x168] sm:$0xff]  ;;  %v831_v12 = vld [vmem:[#allocation3 + $0x160] sm:$0xff]  ;;  %v834_v13 = vld [vmem:[#allocation3 + $0x178] sm:$0xff] }
 0x358   :  { %v833_v14 = vld [vmem:[#allocation3 + $0x170] sm:$0xff]  ;;  %v836_v15 = vld [vmem:[#allocation3 + $0x188] sm:$0xff]  ;;  %v835_v16 = vld [vmem:[#allocation3 + $0x180] sm:$0xff] }
 0x359   :  { %854 = vmatpush1.bf16.msra.mxu0 %v821_v2  ;;  %v838_v17 = vld [vmem:[#allocation3 + $0x198] sm:$0xff]  ;;  %v837_v18 = vld [vmem:[#allocation3 + $0x190] sm:$0xff]  ;;  %v840_v61 = vld [vmem:[#allocation3 + $0x1a8] sm:$0xff] }
 0x35a   :  { %691 = vmatpush1.bf16.msra.mxu1 %v658_v33  ;;  %855 = vmatprep.subr.bf16.mxu0 %v824_v3  ;;  %v839_v24 = vld [vmem:[#allocation3 + $0x1a0] sm:$0xff]  ;;  %v842_v25 = vld [vmem:[#allocation3 + $0x1b8] sm:$0xff]  ;;  %v841_v26 = vld [vmem:[#allocation3 + $0x1b0] sm:$0xff] }
 0x35b   :  { %692 = vmatprep.subr.bf16.mxu1 %v661_v34  ;;  %v844_v27 = vld [vmem:[#allocation3 + $0x1c8] sm:$0xff]  ;;  %v843_v28 = vld [vmem:[#allocation3 + $0x1c0] sm:$0xff]  ;;  %v846_v29 = vld [vmem:[#allocation3 + $0x1d8] sm:$0xff] }
 0x35c   :  { %v845_v30 = vld [vmem:[#allocation3 + $0x1d0] sm:$0xff]  ;;  %v848_v31 = vld [vmem:[#allocation3 + $0x1e8] sm:$0xff]  ;;  %v847_v32 = vld [vmem:[#allocation3 + $0x1e0] sm:$0xff] }
 0x35d   :  { %856 = vmatpush1.bf16.msra.mxu0 %v823_v4  ;;  %v850_v33 = vld [vmem:[#allocation3 + $0x1f8] sm:$0xff]  ;;  %v849_v34 = vld [vmem:[#allocation3 + $0x1f0] sm:$0xff] }
 0x35e   :  { %693 = vmatpush1.bf16.msra.mxu1 %v660_v35  ;;  %857 = vmatprep.subr.bf16.mxu0 %v826_v5 }
 0x35f   :  { %694 = vmatprep.subr.bf16.mxu1 %v663_v37 }
 0x361   :  { %858 = vmatpush1.bf16.msra.mxu0 %v825_v6 }
 0x362   :  { %695 = vmatpush1.bf16.msra.mxu1 %v662_v39  ;;  %859 = vmatprep.subr.bf16.mxu0 %v828_v7 }
 0x363   :  { %696 = vmatprep.subr.bf16.mxu1 %v665_v40 }
 0x365   :  { %860 = vmatpush1.bf16.msra.mxu0 %v827_v8 }
 0x366   :  { %697 = vmatpush1.bf16.msra.mxu1 %v664_v41  ;;  %861 = vmatprep.subr.bf16.mxu0 %v830_v9 }
 0x367   :  { %698 = vmatprep.subr.bf16.mxu1 %v667_v42 }
 0x369   :  { %862 = vmatpush1.bf16.msra.mxu0 %v829_v10 }
 0x36a   :  { %699 = vmatpush1.bf16.msra.mxu1 %v666_v43  ;;  %863 = vmatprep.subr.bf16.mxu0 %v832_v11 }
 0x36b   :  { %700 = vmatprep.subr.bf16.mxu1 %v669_v44 }
 0x36d   :  { %864 = vmatpush1.bf16.msra.mxu0 %v831_v12 }
 0x36e   :  { %701 = vmatpush1.bf16.msra.mxu1 %v668_v45  ;;  %865 = vmatprep.subr.bf16.mxu0 %v834_v13 }
 0x36f   :  { %702 = vmatprep.subr.bf16.mxu1 %v671_v46 }
 0x371   :  { %866 = vmatpush1.bf16.msra.mxu0 %v833_v14 }
 0x372   :  { %703 = vmatpush1.bf16.msra.mxu1 %v670_v47  ;;  %867 = vmatprep.subr.bf16.mxu0 %v836_v15 }
 0x373   :  { %704 = vmatprep.subr.bf16.mxu1 %v673_v48 }
 0x375   :  { %868 = vmatpush1.bf16.msra.mxu0 %v835_v16 }
 0x376   :  { %705 = vmatpush1.bf16.msra.mxu1 %v672_v49  ;;  %869 = vmatprep.subr.bf16.mxu0 %v838_v17 }
 0x377   :  { %706 = vmatprep.subr.bf16.mxu1 %v675_v50 }
 0x379   :  { %870 = vmatpush1.bf16.msra.mxu0 %v837_v18 }
 0x37a   :  { %707 = vmatpush1.bf16.msra.mxu1 %v674_v51  ;;  %871 = vmatprep.subr.bf16.mxu0 %v840_v61 }
 0x37b   :  { %708 = vmatprep.subr.bf16.mxu1 %v677_v52 }
 0x37d   :  { %872 = vmatpush1.bf16.msra.mxu0 %v839_v24 }
 0x37e   :  { %709 = vmatpush1.bf16.msra.mxu1 %v676_v53  ;;  %873 = vmatprep.subr.bf16.mxu0 %v842_v25 }
 0x37f   :  { %710 = vmatprep.subr.bf16.mxu1 %v679_v54 }
 0x381   :  { %874 = vmatpush1.bf16.msra.mxu0 %v841_v26 }
 0x382   :  { %711 = vmatpush1.bf16.msra.mxu1 %v678_v56  ;;  %875 = vmatprep.subr.bf16.mxu0 %v844_v27  ;;  %v726_v27 = vld [vmem:[#allocation6 + $0x11] ss:$8 sm:$0x3] }
 0x383   :  { %712 = vmatprep.subr.bf16.mxu1 %v681_v58 }
 0x385   :  { %876 = vmatpush1.bf16.msra.mxu0 %v843_v28  ;;  %v777_v28 = vrot.slane %v726_v27, %v2444_v36 }
 0x386   :  { %713 = vmatpush1.bf16.msra.mxu1 %v680_v60  ;;  %877 = vmatprep.subr.bf16.mxu0 %v846_v29  ;;  %v781_v29 = vrot.slane %v726_v27, %v2446_v38 }
 0x389   :  { %715 = vmatmul.mubr.bf16.vlgmr.msra.gmra.mrb[4].mxu1 %v648_v62  ;;  %878 = vmatpush1.bf16.msra.mxu0 %v845_v30 }
 0x38a   :  { %879 = vmatprep.subr.bf16.mxu0 %v848_v31  ;;  %v728_v31 = vld [vmem:[#allocation6 + $0x12] ss:$8 sm:$0x3] }
 0x38d   :  { %880 = vmatpush1.bf16.msra.mxu0 %v847_v32 }
 0x38e   :  { %881 = vmatprep.subr.bf16.mxu0 %v850_v33 }
 0x391   :  { %882 = vmatpush1.bf16.msra.mxu0 %v849_v34 }
 0x45c   :  { %v716_v35 = vpop.f32.mrb[4].mxu1 }
 0x45d   :  { %v718_v37 = vpop.f32.mrb[5].mxu1 }
 0x45e   :  { %v720_v39 = vpop.f32.mrb[6].mxu1 }
 0x45f   :  { %v729_v40 = vadd.f32 %v720_v39, %v716_v35  ;;  %v722_v41 = vpop.f32.mrb[7].mxu1 }
 0x460   :  { %v736_v42 = vadd.f32 %v722_v41, %v718_v37 }
 0x461   :  { %v730_v43 = vrot.slane %v729_v40, 4 }
 0x462   :  { %v737_v44 = vrot.slane %v736_v42, 4 }
 0x463   :  { %v731_v45 = vadd.f32 %v730_v43, %v729_v40  ;;  %v806_v40 = vrot.slane %v728_v31, %v2446_v38 }
 0x464   :  { %v738_v46 = vadd.f32 %v737_v44, %v736_v42 }
 0x465   :  { %v732_v47 = vrot.slane %v731_v45, 2 }
 0x466   :  { %v739_v48 = vrot.slane %v738_v46, 2 }
 0x467   :  { %v733_v49 = vadd.f32 %v732_v47, %v731_v45 }
 0x468   :  { %v740_v50 = vadd.f32 %v739_v48, %v738_v46 }
 0x469   :  { %v734_v51 = vrot.slane %v733_v49, 1 }
 0x46a   :  { %v741_v52 = vrot.slane %v740_v50, 1 }
 0x46b   :  { %v735_v53 = vadd.f32 %v734_v51, %v733_v49 }
 0x46c   :  { %v742_v54 = vadd.f32 %v741_v52, %v740_v50 }
 0x46d   :  { %v743_v56 = vmul.f32 0.0625, %v735_v53 }
 0x46e   :  { %v744_v58 = vmul.f32 0.0625, %v742_v54 }
 0x46f   :  { %v745_v60 = vsub.f32 %v716_v35, %v743_v56  ;;  %v747_v62 = vsub.f32 %v720_v39, %v743_v56 }
 0x470   :  { %v746_v63 = vsub.f32 %v718_v37, %v744_v58  ;;  %v748_v0 = vsub.f32 %v722_v41, %v744_v58  ;;  %v802_v37 = vrot.slane %v728_v31, %v2444_v36 }
 0x471   :  { %v749_v1 = vmul.f32 %v745_v60, %v745_v60  ;;  %v751_v2 = vmul.f32 %v747_v62, %v747_v62 }
 0x472   :  { %v750_v3 = vmul.f32 %v746_v63, %v746_v63  ;;  %v752_v4 = vmul.f32 %v748_v0, %v748_v0 }
 0x473   :  { %v753_v5 = vadd.f32 %v751_v2, %v749_v1 }
 0x474   :  { %v760_v6 = vadd.f32 %v752_v4, %v750_v3 }
 0x475   :  { %v754_v7 = vrot.slane %v753_v5, 4 }
 0x476   :  { %v761_v8 = vrot.slane %v760_v6, 4 }
 0x477   :  { %v755_v9 = vadd.f32 %v754_v7, %v753_v5 }
 0x478   :  { %v762_v10 = vadd.f32 %v761_v8, %v760_v6 }
 0x479   :  { %v756_v11 = vrot.slane %v755_v9, 2 }
 0x47a   :  { %v763_v12 = vrot.slane %v762_v10, 2 }
 0x47b   :  { %v757_v13 = vadd.f32 %v756_v11, %v755_v9 }
 0x47c   :  { %v764_v14 = vadd.f32 %v763_v12, %v762_v10 }
 0x47d   :  { %v758_v15 = vrot.slane %v757_v13, 1 }
 0x47e   :  { %v765_v16 = vrot.slane %v764_v14, 1 }
 0x47f   :  { %v759_v17 = vadd.f32 %v758_v15, %v757_v13 }
 0x480   :  { %v766_v18 = vadd.f32 %v765_v16, %v764_v14 }
 0x481   :  { %v767_v61 = vmul.f32 0.0625, %v759_v17 }
 0x482   :  { %v768_v24 = vmul.f32 0.0625, %v766_v18 }
 0x483   :  { %v769_v25 = vadd.f32 1e-05, %v767_v61 }
 0x484   :  { %v770_v26 = vadd.f32 1e-05, %v768_v24 }
 0x485   :  { %2171 = vrsqrt.f32 %v769_v25 }
 0x486   :  { %2173 = vrsqrt.f32 %v770_v26 }
 0x48f   :  { %v2172_v30 = vpop.eup %2171 }
 0x490   :  { %v2174_v32 = vpop.eup %2173  ;;  %v784_v33 = vmul.f32 %v2172_v30, %v777_v28 }
 0x491   :  { %v785_v34 = vmul.f32 %v2174_v32, %v781_v29 }
 0x492   :  { %v789_v35 = vrot.slane %v784_v33, %v2444_v36 }
 0x493   :  { %v793_v39 = vrot.slane %v785_v34, %v2444_v36 }
 0x494   :  { %v794_v41 = vmul.f32 %v789_v35, %v745_v60  ;;  %v796_v42 = vmul.f32 %v789_v35, %v747_v62 }
 0x495   :  { %v797_v43 = vmul.f32 %v793_v39, %v748_v0  ;;  %v795_v44 = vmul.f32 %v793_v39, %v746_v63 }
 0x496   :  { %v809_v45 = vadd.f32 %v802_v37, %v794_v41  ;;  %v811_v46 = vadd.f32 %v802_v37, %v796_v42 }
 0x497   :  { %v810_v47 = vadd.f32 %v806_v40, %v795_v44  ;;  %v812_v48 = vadd.f32 %v806_v40, %v797_v43 }
 0x498   :  { %v813_v49 = vmax.f32 %v809_v45, 0.0  ;;  %v815_v50 = vmax.f32 %v811_v46, 0.0 }
 0x499   :  { %v814_v51 = vmax.f32 %v810_v47, 0.0  ;;  %v816_v52 = vmax.f32 %v812_v48, 0.0  ;;  %v895_v47 = vld [vmem:[#allocation6 + $0x13] ss:$8 sm:$0x3] }
 0x49a   :  { %v817_v53 = vpack.c.bf16 %v815_v50, %v813_v49  ;;  %v946_v48 = vrot.slane %v895_v47, %v2444_v36  ;;  %v950_v49 = vrot.slane %v895_v47, %v2446_v38 }
 0x49b   :  { %v818_v54 = vpack.c.bf16 %v816_v52, %v814_v51  ;;  %v897_v51 = vld [vmem:[#allocation6 + $0x14] ss:$8 sm:$0x3] }
 0x49d   :  { %883 = vmatprep.mubr.bf16.mxu0 %v818_v54 }
 0x49e   :  { %884 = vmatmul.mubr.bf16.vlgmr.msra.gmra.mrb[8].mxu0 %v817_v53 }
 0x571   :  { %v885_v56 = vpop.f32.mrb[8].mxu0 }
 0x572   :  { %v887_v58 = vpop.f32.mrb[9].mxu0 }
 0x573   :  { %v889_v1 = vpop.f32.mrb[10].mxu0 }
 0x574   :  { %v898_v2 = vadd.f32 %v889_v1, %v885_v56  ;;  %v891_v60 = vpop.f32.mrb[11].mxu0 }
 0x575   :  { %v905_v62 = vadd.f32 %v891_v60, %v887_v58 }
 0x576   :  { %v899_v0 = vrot.slane %v898_v2, 4 }
 0x577   :  { %v906_v63 = vrot.slane %v905_v62, 4 }
 0x578   :  { %v900_v3 = vadd.f32 %v899_v0, %v898_v2  ;;  %v975_v2 = vrot.slane %v897_v51, %v2446_v38 }
 0x579   :  { %v907_v4 = vadd.f32 %v906_v63, %v905_v62 }
 0x57a   :  { %v901_v5 = vrot.slane %v900_v3, 2 }
 0x57b   :  { %v908_v6 = vrot.slane %v907_v4, 2 }
 0x57c   :  { %v902_v7 = vadd.f32 %v901_v5, %v900_v3 }
 0x57d   :  { %v909_v8 = vadd.f32 %v908_v6, %v907_v4 }
 0x57e   :  { %v903_v9 = vrot.slane %v902_v7, 1 }
 0x57f   :  { %v910_v10 = vrot.slane %v909_v8, 1 }
 0x580   :  { %v904_v11 = vadd.f32 %v903_v9, %v902_v7 }
 0x581   :  { %v911_v12 = vadd.f32 %v910_v10, %v909_v8 }
 0x582   :  { %v912_v13 = vmul.f32 0.0625, %v904_v11 }
 0x583   :  { %v913_v14 = vmul.f32 0.0625, %v911_v12 }
 0x584   :  { %v914_v15 = vsub.f32 %v885_v56, %v912_v13  ;;  %v916_v16 = vsub.f32 %v889_v1, %v912_v13 }
 0x585   :  { %v915_v17 = vsub.f32 %v887_v58, %v913_v14  ;;  %v917_v18 = vsub.f32 %v891_v60, %v913_v14  ;;  %v971_v58 = vrot.slane %v897_v51, %v2444_v36 }
 0x586   :  { %v918_v61 = vmul.f32 %v914_v15, %v914_v15  ;;  %v920_v24 = vmul.f32 %v916_v16, %v916_v16 }
 0x587   :  { %v919_v25 = vmul.f32 %v915_v17, %v915_v17  ;;  %v921_v26 = vmul.f32 %v917_v18, %v917_v18 }
 0x588   :  { %v922_v27 = vadd.f32 %v920_v24, %v918_v61 }
 0x589   :  { %v929_v28 = vadd.f32 %v921_v26, %v919_v25 }
 0x58a   :  { %v923_v29 = vrot.slane %v922_v27, 4 }
 0x58b   :  { %v930_v30 = vrot.slane %v929_v28, 4 }
 0x58c   :  { %v924_v31 = vadd.f32 %v923_v29, %v922_v27 }
 0x58d   :  { %v931_v32 = vadd.f32 %v930_v30, %v929_v28 }
 0x58e   :  { %v925_v33 = vrot.slane %v924_v31, 2 }
 0x58f   :  { %v932_v34 = vrot.slane %v931_v32, 2 }
 0x590   :  { %v926_v35 = vadd.f32 %v925_v33, %v924_v31 }
 0x591   :  { %v933_v37 = vadd.f32 %v932_v34, %v931_v32 }
 0x592   :  { %v927_v39 = vrot.slane %v926_v35, 1 }
 0x593   :  { %v934_v40 = vrot.slane %v933_v37, 1 }
 0x594   :  { %v928_v41 = vadd.f32 %v927_v39, %v926_v35 }
 0x595   :  { %v935_v42 = vadd.f32 %v934_v40, %v933_v37 }
 0x596   :  { %v936_v43 = vmul.f32 0.0625, %v928_v41 }
 0x597   :  { %v937_v44 = vmul.f32 0.0625, %v935_v42 }
 0x598   :  { %v938_v45 = vadd.f32 1e-05, %v936_v43 }
 0x599   :  { %v939_v46 = vadd.f32 1e-05, %v937_v44 }
 0x59a   :  { %2175 = vrsqrt.f32 %v938_v45 }
 0x59b   :  { %2177 = vrsqrt.f32 %v939_v46 }
 0x5a4   :  { %v2176_v50 = vpop.eup %2175 }
 0x5a5   :  { %v2178_v52 = vpop.eup %2177  ;;  %v953_v53 = vmul.f32 %v2176_v50, %v946_v48 }
 0x5a6   :  { %v954_v54 = vmul.f32 %v2178_v52, %v950_v49 }
 0x5a7   :  { %v958_v56 = vrot.slane %v953_v53, %v2444_v36 }
 0x5a8   :  { %v962_v1 = vrot.slane %v954_v54, %v2444_v36 }
 0x5a9   :  { %v963_v60 = vmul.f32 %v958_v56, %v914_v15  ;;  %v965_v62 = vmul.f32 %v958_v56, %v916_v16 }
 0x5aa   :  { %v964_v0 = vmul.f32 %v962_v1, %v915_v17  ;;  %v966_v63 = vmul.f32 %v962_v1, %v917_v18 }
 0x5ab   :  { %v978_v3 = vadd.f32 %v971_v58, %v963_v60  ;;  %v980_v4 = vadd.f32 %v971_v58, %v965_v62 }
 0x5ac   :  { %v979_v5 = vadd.f32 %v975_v2, %v964_v0  ;;  %v981_v6 = vadd.f32 %v975_v2, %v966_v63 }
 0x5ad   :  { %v2500_v7 = vadd.f32 %v978_v3, %v642_v55  ;;  %v2504_v8 = vadd.f32 %v980_v4, %v644_v59 }
 0x5ae   :  { %v2508_v9 = vadd.f32 %v979_v5, %v643_v23  ;;  %v2512_v10 = vadd.f32 %v981_v6, %v645_v57 }
 0x5af   :  { %v986_v11 = vmax.f32 %v2500_v7, 0.0  ;;  %v988_v12 = vmax.f32 %v2504_v8, 0.0 }
 0x5b0   :  { %v987_v19 = vmax.f32 %v2508_v9, 0.0  ;;  %v989_v55 = vmax.f32 %v2512_v10, 0.0 }
 0x5b1   :  { %2271 = dma.done.wait [#allocation5 + $0x2], 8192 }
 0x5b2   :  { %2272 = vsyncadd [#allocation5 + $0x2], 4294959104  ;;  %v993_v20 = vpack.c.bf16 %v989_v55, %v987_v19  ;;  %v995_v21 = vld [vmem:[#allocation3 + $0x208] sm:$0xff]  ;;  %v994_v22 = vld [vmem:[#allocation3 + $0x200] sm:$0xff]  ;;  %v992_v46 = vpack.c.bf16 %v988_v12, %v986_v11 }
 0x5b3   :  { %v997_v59 = vld [vmem:[#allocation3 + $0x218] sm:$0xff]  ;;  %1026 = vmatprep.subr.bf16.mxu1 %v995_v21  ;;  %v996_v23 = vld [vmem:[#allocation3 + $0x210] sm:$0xff]  ;;  %v999_v57 = vld [vmem:[#allocation3 + $0x228] sm:$0xff] }
 0x5b4   :  { %1058 = vmatprep.mubr.bf16.mxu1 %v993_v20  ;;  %1027 = vmatpush1.bf16.msra.mxu1 %v994_v22  ;;  %v998_v13 = vld [vmem:[#allocation3 + $0x220] sm:$0xff]  ;;  %v1001_v14 = vld [vmem:[#allocation3 + $0x238] sm:$0xff]  ;;  %v1000_v15 = vld [vmem:[#allocation3 + $0x230] sm:$0xff] }
 0x5b5   :  { %1028 = vmatprep.subr.bf16.mxu1 %v997_v59  ;;  %v1003_v16 = vld [vmem:[#allocation3 + $0x248] sm:$0xff]  ;;  %v1002_v17 = vld [vmem:[#allocation3 + $0x240] sm:$0xff]  ;;  %v1005_v18 = vld [vmem:[#allocation3 + $0x258] sm:$0xff] }
 0x5b6   :  { %v1004_v61 = vld [vmem:[#allocation3 + $0x250] sm:$0xff]  ;;  %v1007_v24 = vld [vmem:[#allocation3 + $0x268] sm:$0xff]  ;;  %v1006_v25 = vld [vmem:[#allocation3 + $0x260] sm:$0xff] }
 0x5b7   :  { %v1009_v26 = vld [vmem:[#allocation3 + $0x278] sm:$0xff]  ;;  %v1008_v27 = vld [vmem:[#allocation3 + $0x270] sm:$0xff]  ;;  %v1011_v28 = vld [vmem:[#allocation3 + $0x288] sm:$0xff] }
 0x5b8   :  { %1029 = vmatpush1.bf16.msra.mxu1 %v996_v23  ;;  %v1010_v29 = vld [vmem:[#allocation3 + $0x280] sm:$0xff]  ;;  %v1013_v30 = vld [vmem:[#allocation3 + $0x298] sm:$0xff]  ;;  %v1012_v31 = vld [vmem:[#allocation3 + $0x290] sm:$0xff] }
 0x5b9   :  { %1030 = vmatprep.subr.bf16.mxu1 %v999_v57  ;;  %v1015_v32 = vld [vmem:[#allocation3 + $0x2a8] sm:$0xff]  ;;  %v1014_v33 = vld [vmem:[#allocation3 + $0x2a0] sm:$0xff]  ;;  %v1017_v34 = vld [vmem:[#allocation3 + $0x2b8] sm:$0xff] }
 0x5ba   :  { %v1016_v35 = vld [vmem:[#allocation3 + $0x2b0] sm:$0xff]  ;;  %v1019_v37 = vld [vmem:[#allocation3 + $0x2c8] sm:$0xff]  ;;  %v1018_v39 = vld [vmem:[#allocation3 + $0x2c0] sm:$0xff] }
 0x5bb   :  { %v1021_v40 = vld [vmem:[#allocation3 + $0x2d8] sm:$0xff]  ;;  %v1020_v41 = vld [vmem:[#allocation3 + $0x2d0] sm:$0xff]  ;;  %v1023_v42 = vld [vmem:[#allocation3 + $0x2e8] sm:$0xff] }
 0x5bc   :  { %1031 = vmatpush1.bf16.msra.mxu1 %v998_v13  ;;  %v1022_v43 = vld [vmem:[#allocation3 + $0x2e0] sm:$0xff]  ;;  %v1025_v44 = vld [vmem:[#allocation3 + $0x2f8] sm:$0xff]  ;;  %v1024_v45 = vld [vmem:[#allocation3 + $0x2f0] sm:$0xff] }
 0x5bd   :  { %1032 = vmatprep.subr.bf16.mxu1 %v1001_v14  ;;  %v1164_v47 = vld [vmem:[#allocation3 + $0x308] sm:$0xff]  ;;  %v1163_v48 = vld [vmem:[#allocation3 + $0x300] sm:$0xff]  ;;  %v1166_v49 = vld [vmem:[#allocation3 + $0x318] sm:$0xff] }
 0x5be   :  { %1195 = vmatprep.subr.bf16.mxu0 %v1164_v47  ;;  %v1165_v50 = vld [vmem:[#allocation3 + $0x310] sm:$0xff]  ;;  %v1168_v51 = vld [vmem:[#allocation3 + $0x328] sm:$0xff]  ;;  %v1167_v52 = vld [vmem:[#allocation3 + $0x320] sm:$0xff] }
 0x5bf   :  { %1196 = vmatpush1.bf16.msra.mxu0 %v1163_v48  ;;  %v1170_v53 = vld [vmem:[#allocation3 + $0x338] sm:$0xff]  ;;  %v1169_v54 = vld [vmem:[#allocation3 + $0x330] sm:$0xff]  ;;  %v1172_v56 = vld [vmem:[#allocation3 + $0x348] sm:$0xff] }
 0x5c0   :  { %1033 = vmatpush1.bf16.msra.mxu1 %v1000_v15  ;;  %1197 = vmatprep.subr.bf16.mxu0 %v1166_v49  ;;  %v1171_v58 = vld [vmem:[#allocation3 + $0x340] sm:$0xff]  ;;  %v1174_v1 = vld [vmem:[#allocation3 + $0x358] sm:$0xff]  ;;  %v1173_v2 = vld [vmem:[#allocation3 + $0x350] sm:$0xff] }
 0x5c1   :  { %1034 = vmatprep.subr.bf16.mxu1 %v1003_v16  ;;  %v1176_v60 = vld [vmem:[#allocation3 + $0x368] sm:$0xff]  ;;  %v1175_v62 = vld [vmem:[#allocation3 + $0x360] sm:$0xff]  ;;  %v1178_v0 = vld [vmem:[#allocation3 + $0x378] sm:$0xff] }
 0x5c2   :  { %v1177_v63 = vld [vmem:[#allocation3 + $0x370] sm:$0xff]  ;;  %v1180_v3 = vld [vmem:[#allocation3 + $0x388] sm:$0xff]  ;;  %v1179_v4 = vld [vmem:[#allocation3 + $0x380] sm:$0xff] }
 0x5c3   :  { %1198 = vmatpush1.bf16.msra.mxu0 %v1165_v50  ;;  %v1182_v5 = vld [vmem:[#allocation3 + $0x398] sm:$0xff]  ;;  %v1181_v6 = vld [vmem:[#allocation3 + $0x390] sm:$0xff]  ;;  %v1184_v20 = vld [vmem:[#allocation3 + $0x3a8] sm:$0xff] }
 0x5c4   :  { %1035 = vmatpush1.bf16.msra.mxu1 %v1002_v17  ;;  %1199 = vmatprep.subr.bf16.mxu0 %v1168_v51  ;;  %v1183_v21 = vld [vmem:[#allocation3 + $0x3a0] sm:$0xff]  ;;  %v1186_v22 = vld [vmem:[#allocation3 + $0x3b8] sm:$0xff]  ;;  %v1185_v59 = vld [vmem:[#allocation3 + $0x3b0] sm:$0xff] }
 0x5c5   :  { %1036 = vmatprep.subr.bf16.mxu1 %v1005_v18  ;;  %v1188_v23 = vld [vmem:[#allocation3 + $0x3c8] sm:$0xff]  ;;  %v1187_v57 = vld [vmem:[#allocation3 + $0x3c0] sm:$0xff]  ;;  %v1190_v13 = vld [vmem:[#allocation3 + $0x3d8] sm:$0xff] }
 0x5c6   :  { %v1189_v14 = vld [vmem:[#allocation3 + $0x3d0] sm:$0xff]  ;;  %v1192_v15 = vld [vmem:[#allocation3 + $0x3e8] sm:$0xff]  ;;  %v1191_v16 = vld [vmem:[#allocation3 + $0x3e0] sm:$0xff] }
 0x5c7   :  { %1200 = vmatpush1.bf16.msra.mxu0 %v1167_v52  ;;  %v1194_v17 = vld [vmem:[#allocation3 + $0x3f8] sm:$0xff]  ;;  %v1193_v18 = vld [vmem:[#allocation3 + $0x3f0] sm:$0xff] }
 0x5c8   :  { %1037 = vmatpush1.bf16.msra.mxu1 %v1004_v61  ;;  %1201 = vmatprep.subr.bf16.mxu0 %v1170_v53 }
 0x5c9   :  { %1038 = vmatprep.subr.bf16.mxu1 %v1007_v24 }
 0x5cb   :  { %1202 = vmatpush1.bf16.msra.mxu0 %v1169_v54 }
 0x5cc   :  { %1039 = vmatpush1.bf16.msra.mxu1 %v1006_v25  ;;  %1203 = vmatprep.subr.bf16.mxu0 %v1172_v56 }
 0x5cd   :  { %1040 = vmatprep.subr.bf16.mxu1 %v1009_v26 }
 0x5cf   :  { %1204 = vmatpush1.bf16.msra.mxu0 %v1171_v58 }
 0x5d0   :  { %1041 = vmatpush1.bf16.msra.mxu1 %v1008_v27  ;;  %1205 = vmatprep.subr.bf16.mxu0 %v1174_v1 }
 0x5d1   :  { %1042 = vmatprep.subr.bf16.mxu1 %v1011_v28 }
 0x5d3   :  { %1206 = vmatpush1.bf16.msra.mxu0 %v1173_v2 }
 0x5d4   :  { %1043 = vmatpush1.bf16.msra.mxu1 %v1010_v29  ;;  %1207 = vmatprep.subr.bf16.mxu0 %v1176_v60 }
 0x5d5   :  { %1044 = vmatprep.subr.bf16.mxu1 %v1013_v30 }
 0x5d7   :  { %1208 = vmatpush1.bf16.msra.mxu0 %v1175_v62 }
 0x5d8   :  { %1045 = vmatpush1.bf16.msra.mxu1 %v1012_v31  ;;  %1209 = vmatprep.subr.bf16.mxu0 %v1178_v0 }
 0x5d9   :  { %1046 = vmatprep.subr.bf16.mxu1 %v1015_v32 }
 0x5db   :  { %1210 = vmatpush1.bf16.msra.mxu0 %v1177_v63 }
 0x5dc   :  { %1047 = vmatpush1.bf16.msra.mxu1 %v1014_v33  ;;  %1211 = vmatprep.subr.bf16.mxu0 %v1180_v3 }
 0x5dd   :  { %1048 = vmatprep.subr.bf16.mxu1 %v1017_v34 }
 0x5df   :  { %1212 = vmatpush1.bf16.msra.mxu0 %v1179_v4 }
 0x5e0   :  { %1049 = vmatpush1.bf16.msra.mxu1 %v1016_v35  ;;  %1213 = vmatprep.subr.bf16.mxu0 %v1182_v5 }
 0x5e1   :  { %1050 = vmatprep.subr.bf16.mxu1 %v1019_v37 }
 0x5e3   :  { %1214 = vmatpush1.bf16.msra.mxu0 %v1181_v6 }
 0x5e4   :  { %1051 = vmatpush1.bf16.msra.mxu1 %v1018_v39  ;;  %1215 = vmatprep.subr.bf16.mxu0 %v1184_v20 }
 0x5e5   :  { %1052 = vmatprep.subr.bf16.mxu1 %v1021_v40 }
 0x5e7   :  { %1216 = vmatpush1.bf16.msra.mxu0 %v1183_v21 }
 0x5e8   :  { %1053 = vmatpush1.bf16.msra.mxu1 %v1020_v41  ;;  %1217 = vmatprep.subr.bf16.mxu0 %v1186_v22 }
 0x5e9   :  { %1054 = vmatprep.subr.bf16.mxu1 %v1023_v42 }
 0x5eb   :  { %1218 = vmatpush1.bf16.msra.mxu0 %v1185_v59 }
 0x5ec   :  { %1055 = vmatpush1.bf16.msra.mxu1 %v1022_v43  ;;  %1219 = vmatprep.subr.bf16.mxu0 %v1188_v23  ;;  %v1070_v23 = vld [vmem:[#allocation6 + $0x15] ss:$8 sm:$0x3] }
 0x5ed   :  { %1056 = vmatprep.subr.bf16.mxu1 %v1025_v44 }
 0x5ef   :  { %1220 = vmatpush1.bf16.msra.mxu0 %v1187_v57  ;;  %v1121_v57 = vrot.slane %v1070_v23, %v2444_v36 }
 0x5f0   :  { %1057 = vmatpush1.bf16.msra.mxu1 %v1024_v45  ;;  %1221 = vmatprep.subr.bf16.mxu0 %v1190_v13  ;;  %v1125_v13 = vrot.slane %v1070_v23, %v2446_v38 }
 0x5f3   :  { %1059 = vmatmul.mubr.bf16.vlgmr.msra.gmra.mrb[8].mxu1 %v992_v46  ;;  %1222 = vmatpush1.bf16.msra.mxu0 %v1189_v14 }
 0x5f4   :  { %1223 = vmatprep.subr.bf16.mxu0 %v1192_v15  ;;  %v1072_v15 = vld [vmem:[#allocation6 + $0x16] ss:$8 sm:$0x3] }
 0x5f7   :  { %1224 = vmatpush1.bf16.msra.mxu0 %v1191_v16 }
 0x5f8   :  { %1225 = vmatprep.subr.bf16.mxu0 %v1194_v17 }
 0x5fb   :  { %1226 = vmatpush1.bf16.msra.mxu0 %v1193_v18 }
 0x6c6   :  { %v1060_v61 = vpop.f32.mrb[8].mxu1 }
 0x6c7   :  { %v1062_v24 = vpop.f32.mrb[9].mxu1 }
 0x6c8   :  { %v1064_v25 = vpop.f32.mrb[10].mxu1 }
 0x6c9   :  { %v1073_v26 = vadd.f32 %v1064_v25, %v1060_v61  ;;  %v1066_v27 = vpop.f32.mrb[11].mxu1 }
 0x6ca   :  { %v1080_v28 = vadd.f32 %v1066_v27, %v1062_v24 }
 0x6cb   :  { %v1074_v29 = vrot.slane %v1073_v26, 4 }
 0x6cc   :  { %v1081_v30 = vrot.slane %v1080_v28, 4 }
 0x6cd   :  { %v1075_v31 = vadd.f32 %v1074_v29, %v1073_v26  ;;  %v1150_v26 = vrot.slane %v1072_v15, %v2446_v38 }
 0x6ce   :  { %v1082_v32 = vadd.f32 %v1081_v30, %v1080_v28 }
 0x6cf   :  { %v1076_v33 = vrot.slane %v1075_v31, 2 }
 0x6d0   :  { %v1083_v34 = vrot.slane %v1082_v32, 2 }
 0x6d1   :  { %v1077_v35 = vadd.f32 %v1076_v33, %v1075_v31 }
 0x6d2   :  { %v1084_v37 = vadd.f32 %v1083_v34, %v1082_v32 }
 0x6d3   :  { %v1078_v39 = vrot.slane %v1077_v35, 1 }
 0x6d4   :  { %v1085_v40 = vrot.slane %v1084_v37, 1 }
 0x6d5   :  { %v1079_v41 = vadd.f32 %v1078_v39, %v1077_v35 }
 0x6d6   :  { %v1086_v42 = vadd.f32 %v1085_v40, %v1084_v37 }
 0x6d7   :  { %v1087_v43 = vmul.f32 0.0625, %v1079_v41 }
 0x6d8   :  { %v1088_v44 = vmul.f32 0.0625, %v1086_v42 }
 0x6d9   :  { %v1089_v45 = vsub.f32 %v1060_v61, %v1087_v43  ;;  %v1091_v46 = vsub.f32 %v1064_v25, %v1087_v43 }
 0x6da   :  { %v1090_v47 = vsub.f32 %v1062_v24, %v1088_v44  ;;  %v1092_v48 = vsub.f32 %v1066_v27, %v1088_v44  ;;  %v1146_v24 = vrot.slane %v1072_v15, %v2444_v36 }
 0x6db   :  { %v1093_v49 = vmul.f32 %v1089_v45, %v1089_v45  ;;  %v1095_v50 = vmul.f32 %v1091_v46, %v1091_v46 }
 0x6dc   :  { %v1094_v51 = vmul.f32 %v1090_v47, %v1090_v47  ;;  %v1096_v52 = vmul.f32 %v1092_v48, %v1092_v48 }
 0x6dd   :  { %v1097_v53 = vadd.f32 %v1095_v50, %v1093_v49 }
 0x6de   :  { %v1104_v54 = vadd.f32 %v1096_v52, %v1094_v51 }
 0x6df   :  { %v1098_v56 = vrot.slane %v1097_v53, 4 }
 0x6e0   :  { %v1105_v58 = vrot.slane %v1104_v54, 4 }
 0x6e1   :  { %v1099_v1 = vadd.f32 %v1098_v56, %v1097_v53 }
 0x6e2   :  { %v1106_v2 = vadd.f32 %v1105_v58, %v1104_v54 }
 0x6e3   :  { %v1100_v60 = vrot.slane %v1099_v1, 2 }
 0x6e4   :  { %v1107_v62 = vrot.slane %v1106_v2, 2 }
 0x6e5   :  { %v1101_v0 = vadd.f32 %v1100_v60, %v1099_v1 }
 0x6e6   :  { %v1108_v63 = vadd.f32 %v1107_v62, %v1106_v2 }
 0x6e7   :  { %v1102_v3 = vrot.slane %v1101_v0, 1 }
 0x6e8   :  { %v1109_v4 = vrot.slane %v1108_v63, 1 }
 0x6e9   :  { %v1103_v5 = vadd.f32 %v1102_v3, %v1101_v0 }
 0x6ea   :  { %v1110_v6 = vadd.f32 %v1109_v4, %v1108_v63 }
 0x6eb   :  { %v1111_v20 = vmul.f32 0.0625, %v1103_v5 }
 0x6ec   :  { %v1112_v21 = vmul.f32 0.0625, %v1110_v6 }
 0x6ed   :  { %v1113_v22 = vadd.f32 1e-05, %v1111_v20 }
 0x6ee   :  { %v1114_v59 = vadd.f32 1e-05, %v1112_v21 }
 0x6ef   :  { %2179 = vrsqrt.f32 %v1113_v22 }
 0x6f0   :  { %2181 = vrsqrt.f32 %v1114_v59 }
 0x6f9   :  { %v2180_v14 = vpop.eup %2179 }
 0x6fa   :  { %v2182_v16 = vpop.eup %2181  ;;  %v1128_v17 = vmul.f32 %v2180_v14, %v1121_v57 }
 0x6fb   :  { %v1129_v18 = vmul.f32 %v2182_v16, %v1125_v13 }
 0x6fc   :  { %v1133_v61 = vrot.slane %v1128_v17, %v2444_v36 }
 0x6fd   :  { %v1137_v25 = vrot.slane %v1129_v18, %v2444_v36 }
 0x6fe   :  { %v1138_v27 = vmul.f32 %v1133_v61, %v1089_v45  ;;  %v1140_v28 = vmul.f32 %v1133_v61, %v1091_v46 }
 0x6ff   :  { %v1141_v29 = vmul.f32 %v1137_v25, %v1092_v48  ;;  %v1139_v30 = vmul.f32 %v1137_v25, %v1090_v47 }
 0x700   :  { %v1153_v31 = vadd.f32 %v1146_v24, %v1138_v27  ;;  %v1155_v32 = vadd.f32 %v1146_v24, %v1140_v28 }
 0x701   :  { %v1154_v33 = vadd.f32 %v1150_v26, %v1139_v30  ;;  %v1156_v34 = vadd.f32 %v1150_v26, %v1141_v29 }
 0x702   :  { %v1157_v35 = vmax.f32 %v1153_v31, 0.0  ;;  %v1159_v37 = vmax.f32 %v1155_v32, 0.0 }
 0x703   :  { %v1158_v39 = vmax.f32 %v1154_v33, 0.0  ;;  %v1160_v40 = vmax.f32 %v1156_v34, 0.0  ;;  %v1239_v33 = vld [vmem:[#allocation6 + $0x17] ss:$8 sm:$0x3] }
 0x704   :  { %v1161_v41 = vpack.c.bf16 %v1159_v37, %v1157_v35  ;;  %v1290_v34 = vrot.slane %v1239_v33, %v2444_v36  ;;  %v1294_v35 = vrot.slane %v1239_v33, %v2446_v38 }
 0x705   :  { %v1162_v42 = vpack.c.bf16 %v1160_v40, %v1158_v39  ;;  %v1241_v39 = vld [vmem:[#allocation6 + $0x20] ss:$8 sm:$0x3] }
 0x707   :  { %1227 = vmatprep.mubr.bf16.mxu0 %v1162_v42 }
 0x708   :  { %1228 = vmatmul.mubr.bf16.vlgmr.msra.gmra.mrb[12].mxu0 %v1161_v41 }
 0x7db   :  { %v1229_v43 = vpop.f32.mrb[12].mxu0 }
 0x7dc   :  { %v1231_v44 = vpop.f32.mrb[13].mxu0 }
 0x7dd   :  { %v1233_v49 = vpop.f32.mrb[14].mxu0 }
 0x7de   :  { %v1242_v50 = vadd.f32 %v1233_v49, %v1229_v43  ;;  %v1235_v45 = vpop.f32.mrb[15].mxu0 }
 0x7df   :  { %v1249_v46 = vadd.f32 %v1235_v45, %v1231_v44 }
 0x7e0   :  { %v1243_v48 = vrot.slane %v1242_v50, 4 }
 0x7e1   :  { %v1250_v47 = vrot.slane %v1249_v46, 4 }
 0x7e2   :  { %v1244_v51 = vadd.f32 %v1243_v48, %v1242_v50  ;;  %v1319_v50 = vrot.slane %v1241_v39, %v2446_v38 }
 0x7e3   :  { %v1251_v52 = vadd.f32 %v1250_v47, %v1249_v46 }
 0x7e4   :  { %v1245_v53 = vrot.slane %v1244_v51, 2 }
 0x7e5   :  { %v1252_v54 = vrot.slane %v1251_v52, 2 }
 0x7e6   :  { %v1246_v56 = vadd.f32 %v1245_v53, %v1244_v51 }
 0x7e7   :  { %v1253_v58 = vadd.f32 %v1252_v54, %v1251_v52 }
 0x7e8   :  { %v1247_v1 = vrot.slane %v1246_v56, 1 }
 0x7e9   :  { %v1254_v2 = vrot.slane %v1253_v58, 1 }
 0x7ea   :  { %v1248_v60 = vadd.f32 %v1247_v1, %v1246_v56 }
 0x7eb   :  { %v1255_v62 = vadd.f32 %v1254_v2, %v1253_v58 }
 0x7ec   :  { %v1256_v0 = vmul.f32 0.0625, %v1248_v60 }
 0x7ed   :  { %v1257_v63 = vmul.f32 0.0625, %v1255_v62 }
 0x7ee   :  { %v1258_v3 = vsub.f32 %v1229_v43, %v1256_v0  ;;  %v1260_v4 = vsub.f32 %v1233_v49, %v1256_v0 }
 0x7ef   :  { %v1259_v5 = vsub.f32 %v1231_v44, %v1257_v63  ;;  %v1261_v6 = vsub.f32 %v1235_v45, %v1257_v63  ;;  %v1315_v44 = vrot.slane %v1241_v39, %v2444_v36 }
 0x7f0   :  { %v1262_v20 = vmul.f32 %v1258_v3, %v1258_v3  ;;  %v1264_v21 = vmul.f32 %v1260_v4, %v1260_v4 }
 0x7f1   :  { %v1263_v22 = vmul.f32 %v1259_v5, %v1259_v5  ;;  %v1265_v59 = vmul.f32 %v1261_v6, %v1261_v6 }
 0x7f2   :  { %v1266_v23 = vadd.f32 %v1264_v21, %v1262_v20 }
 0x7f3   :  { %v1273_v57 = vadd.f32 %v1265_v59, %v1263_v22 }
 0x7f4   :  { %v1267_v13 = vrot.slane %v1266_v23, 4 }
 0x7f5   :  { %v1274_v14 = vrot.slane %v1273_v57, 4 }
 0x7f6   :  { %v1268_v15 = vadd.f32 %v1267_v13, %v1266_v23 }
 0x7f7   :  { %v1275_v16 = vadd.f32 %v1274_v14, %v1273_v57 }
 0x7f8   :  { %v1269_v17 = vrot.slane %v1268_v15, 2 }
 0x7f9   :  { %v1276_v18 = vrot.slane %v1275_v16, 2 }
 0x7fa   :  { %v1270_v61 = vadd.f32 %v1269_v17, %v1268_v15 }
 0x7fb   :  { %v1277_v24 = vadd.f32 %v1276_v18, %v1275_v16 }
 0x7fc   :  { %v1271_v25 = vrot.slane %v1270_v61, 1 }
 0x7fd   :  { %v1278_v26 = vrot.slane %v1277_v24, 1 }
 0x7fe   :  { %v1272_v27 = vadd.f32 %v1271_v25, %v1270_v61 }
 0x7ff   :  { %v1279_v28 = vadd.f32 %v1278_v26, %v1277_v24 }
 0x800   :  { %v1280_v29 = vmul.f32 0.0625, %v1272_v27 }
 0x801   :  { %v1281_v30 = vmul.f32 0.0625, %v1279_v28 }
 0x802   :  { %v1282_v31 = vadd.f32 1e-05, %v1280_v29 }
 0x803   :  { %v1283_v32 = vadd.f32 1e-05, %v1281_v30 }
 0x804   :  { %2183 = vrsqrt.f32 %v1282_v31 }
 0x805   :  { %2185 = vrsqrt.f32 %v1283_v32 }
 0x80e   :  { %v2184_v37 = vpop.eup %2183 }
 0x80f   :  { %v2186_v40 = vpop.eup %2185  ;;  %v1297_v41 = vmul.f32 %v2184_v37, %v1290_v34 }
 0x810   :  { %v1298_v42 = vmul.f32 %v2186_v40, %v1294_v35 }
 0x811   :  { %v1302_v43 = vrot.slane %v1297_v41, %v2444_v36 }
 0x812   :  { %v1306_v49 = vrot.slane %v1298_v42, %v2444_v36 }
 0x813   :  { %v1307_v45 = vmul.f32 %v1302_v43, %v1258_v3  ;;  %v1309_v46 = vmul.f32 %v1302_v43, %v1260_v4 }
 0x814   :  { %v1308_v48 = vmul.f32 %v1306_v49, %v1259_v5  ;;  %v1310_v47 = vmul.f32 %v1306_v49, %v1261_v6 }
 0x815   :  { %v1322_v51 = vadd.f32 %v1315_v44, %v1307_v45  ;;  %v1324_v52 = vadd.f32 %v1315_v44, %v1309_v46 }
 0x816   :  { %v1323_v53 = vadd.f32 %v1319_v50, %v1308_v48  ;;  %v1325_v54 = vadd.f32 %v1319_v50, %v1310_v47 }
 0x817   :  { %v2540_v56 = vadd.f32 %v1322_v51, %v986_v11  ;;  %v2544_v58 = vadd.f32 %v1324_v52, %v988_v12 }
 0x818   :  { %v2548_v1 = vadd.f32 %v1323_v53, %v987_v19  ;;  %v2552_v2 = vadd.f32 %v1325_v54, %v989_v55 }
 0x819   :  { %v1330_v60 = vmax.f32 %v2540_v56, 0.0  ;;  %v1332_v62 = vmax.f32 %v2544_v58, 0.0 }
 0x81a   :  { %v1331_v7 = vmax.f32 %v2548_v1, 0.0  ;;  %v1333_v11 = vmax.f32 %v2552_v2, 0.0 }
 0x81b   :  { %2273 = dma.done.wait [#allocation5 + $0x3], 8192 }
 0x81c   :  { %2274 = vsyncadd [#allocation5 + $0x3], 4294959104  ;;  %v1337_v8 = vpack.c.bf16 %v1333_v11, %v1331_v7  ;;  %v1339_v9 = vld [vmem:[#allocation3 + $0x408] sm:$0xff]  ;;  %v1338_v10 = vld [vmem:[#allocation3 + $0x400] sm:$0xff]  ;;  %v1336_v32 = vpack.c.bf16 %v1332_v62, %v1330_v60 }
 0x81d   :  { %v1341_v12 = vld [vmem:[#allocation3 + $0x418] sm:$0xff]  ;;  %1370 = vmatprep.subr.bf16.mxu1 %v1339_v9  ;;  %v1340_v19 = vld [vmem:[#allocation3 + $0x410] sm:$0xff]  ;;  %v1343_v55 = vld [vmem:[#allocation3 + $0x428] sm:$0xff] }
 0x81e   :  { %1402 = vmatprep.mubr.bf16.mxu1 %v1337_v8  ;;  %1371 = vmatpush1.bf16.msra.mxu1 %v1338_v10  ;;  %v1342_v0 = vld [vmem:[#allocation3 + $0x420] sm:$0xff]  ;;  %v1345_v63 = vld [vmem:[#allocation3 + $0x438] sm:$0xff]  ;;  %v1344_v3 = vld [vmem:[#allocation3 + $0x430] sm:$0xff] }
 0x81f   :  { %1372 = vmatprep.subr.bf16.mxu1 %v1341_v12  ;;  %v1347_v4 = vld [vmem:[#allocation3 + $0x448] sm:$0xff]  ;;  %v1346_v5 = vld [vmem:[#allocation3 + $0x440] sm:$0xff]  ;;  %v1349_v6 = vld [vmem:[#allocation3 + $0x458] sm:$0xff] }
 0x820   :  { %v1348_v20 = vld [vmem:[#allocation3 + $0x450] sm:$0xff]  ;;  %v1351_v21 = vld [vmem:[#allocation3 + $0x468] sm:$0xff]  ;;  %v1350_v22 = vld [vmem:[#allocation3 + $0x460] sm:$0xff] }
 0x821   :  { %v1353_v59 = vld [vmem:[#allocation3 + $0x478] sm:$0xff]  ;;  %v1352_v23 = vld [vmem:[#allocation3 + $0x470] sm:$0xff]  ;;  %v1355_v57 = vld [vmem:[#allocation3 + $0x488] sm:$0xff] }
 0x822   :  { %1373 = vmatpush1.bf16.msra.mxu1 %v1340_v19  ;;  %v1354_v13 = vld [vmem:[#allocation3 + $0x480] sm:$0xff]  ;;  %v1357_v14 = vld [vmem:[#allocation3 + $0x498] sm:$0xff]  ;;  %v1356_v15 = vld [vmem:[#allocation3 + $0x490] sm:$0xff] }
 0x823   :  { %1374 = vmatprep.subr.bf16.mxu1 %v1343_v55  ;;  %v1359_v16 = vld [vmem:[#allocation3 + $0x4a8] sm:$0xff]  ;;  %v1358_v17 = vld [vmem:[#allocation3 + $0x4a0] sm:$0xff]  ;;  %v1361_v18 = vld [vmem:[#allocation3 + $0x4b8] sm:$0xff] }
 0x824   :  { %v1360_v61 = vld [vmem:[#allocation3 + $0x4b0] sm:$0xff]  ;;  %v1363_v24 = vld [vmem:[#allocation3 + $0x4c8] sm:$0xff]  ;;  %v1362_v25 = vld [vmem:[#allocation3 + $0x4c0] sm:$0xff] }
 0x825   :  { %v1365_v26 = vld [vmem:[#allocation3 + $0x4d8] sm:$0xff]  ;;  %v1364_v27 = vld [vmem:[#allocation3 + $0x4d0] sm:$0xff]  ;;  %v1367_v28 = vld [vmem:[#allocation3 + $0x4e8] sm:$0xff] }
 0x826   :  { %1375 = vmatpush1.bf16.msra.mxu1 %v1342_v0  ;;  %v1366_v29 = vld [vmem:[#allocation3 + $0x4e0] sm:$0xff]  ;;  %v1369_v30 = vld [vmem:[#allocation3 + $0x4f8] sm:$0xff]  ;;  %v1368_v31 = vld [vmem:[#allocation3 + $0x4f0] sm:$0xff] }
 0x827   :  { %1376 = vmatprep.subr.bf16.mxu1 %v1345_v63  ;;  %v1508_v33 = vld [vmem:[#allocation3 + $0x508] sm:$0xff]  ;;  %v1507_v34 = vld [vmem:[#allocation3 + $0x500] sm:$0xff]  ;;  %v1510_v35 = vld [vmem:[#allocation3 + $0x518] sm:$0xff] }
 0x828   :  { %1539 = vmatprep.subr.bf16.mxu0 %v1508_v33  ;;  %v1509_v37 = vld [vmem:[#allocation3 + $0x510] sm:$0xff]  ;;  %v1512_v39 = vld [vmem:[#allocation3 + $0x528] sm:$0xff]  ;;  %v1511_v40 = vld [vmem:[#allocation3 + $0x520] sm:$0xff] }
 0x829   :  { %1540 = vmatpush1.bf16.msra.mxu0 %v1507_v34  ;;  %v1514_v41 = vld [vmem:[#allocation3 + $0x538] sm:$0xff]  ;;  %v1513_v42 = vld [vmem:[#allocation3 + $0x530] sm:$0xff]  ;;  %v1516_v43 = vld [vmem:[#allocation3 + $0x548] sm:$0xff] }
 0x82a   :  { %1377 = vmatpush1.bf16.msra.mxu1 %v1344_v3  ;;  %1541 = vmatprep.subr.bf16.mxu0 %v1510_v35  ;;  %v1515_v44 = vld [vmem:[#allocation3 + $0x540] sm:$0xff]  ;;  %v1518_v49 = vld [vmem:[#allocation3 + $0x558] sm:$0xff]  ;;  %v1517_v50 = vld [vmem:[#allocation3 + $0x550] sm:$0xff] }
 0x82b   :  { %1378 = vmatprep.subr.bf16.mxu1 %v1347_v4  ;;  %v1520_v45 = vld [vmem:[#allocation3 + $0x568] sm:$0xff]  ;;  %v1519_v46 = vld [vmem:[#allocation3 + $0x560] sm:$0xff]  ;;  %v1522_v48 = vld [vmem:[#allocation3 + $0x578] sm:$0xff] }
 0x82c   :  { %v1521_v47 = vld [vmem:[#allocation3 + $0x570] sm:$0xff]  ;;  %v1524_v51 = vld [vmem:[#allocation3 + $0x588] sm:$0xff]  ;;  %v1523_v52 = vld [vmem:[#allocation3 + $0x580] sm:$0xff] }
 0x82d   :  { %1542 = vmatpush1.bf16.msra.mxu0 %v1509_v37  ;;  %v1526_v53 = vld [vmem:[#allocation3 + $0x598] sm:$0xff]  ;;  %v1525_v54 = vld [vmem:[#allocation3 + $0x590] sm:$0xff]  ;;  %v1528_v8 = vld [vmem:[#allocation3 + $0x5a8] sm:$0xff] }
 0x82e   :  { %1379 = vmatpush1.bf16.msra.mxu1 %v1346_v5  ;;  %1543 = vmatprep.subr.bf16.mxu0 %v1512_v39  ;;  %v1527_v9 = vld [vmem:[#allocation3 + $0x5a0] sm:$0xff]  ;;  %v1530_v10 = vld [vmem:[#allocation3 + $0x5b8] sm:$0xff]  ;;  %v1529_v12 = vld [vmem:[#allocation3 + $0x5b0] sm:$0xff] }
 0x82f   :  { %1380 = vmatprep.subr.bf16.mxu1 %v1349_v6  ;;  %v1532_v19 = vld [vmem:[#allocation3 + $0x5c8] sm:$0xff]  ;;  %v1531_v55 = vld [vmem:[#allocation3 + $0x5c0] sm:$0xff]  ;;  %v1534_v0 = vld [vmem:[#allocation3 + $0x5d8] sm:$0xff] }
 0x830   :  { %v1533_v63 = vld [vmem:[#allocation3 + $0x5d0] sm:$0xff]  ;;  %v1536_v3 = vld [vmem:[#allocation3 + $0x5e8] sm:$0xff]  ;;  %v1535_v4 = vld [vmem:[#allocation3 + $0x5e0] sm:$0xff] }
 0x831   :  { %1544 = vmatpush1.bf16.msra.mxu0 %v1511_v40  ;;  %v1538_v5 = vld [vmem:[#allocation3 + $0x5f8] sm:$0xff]  ;;  %v1537_v6 = vld [vmem:[#allocation3 + $0x5f0] sm:$0xff] }
 0x832   :  { %1381 = vmatpush1.bf16.msra.mxu1 %v1348_v20  ;;  %1545 = vmatprep.subr.bf16.mxu0 %v1514_v41 }
 0x833   :  { %1382 = vmatprep.subr.bf16.mxu1 %v1351_v21 }
 0x835   :  { %1546 = vmatpush1.bf16.msra.mxu0 %v1513_v42 }
 0x836   :  { %1383 = vmatpush1.bf16.msra.mxu1 %v1350_v22  ;;  %1547 = vmatprep.subr.bf16.mxu0 %v1516_v43 }
 0x837   :  { %1384 = vmatprep.subr.bf16.mxu1 %v1353_v59 }
 0x839   :  { %1548 = vmatpush1.bf16.msra.mxu0 %v1515_v44 }
 0x83a   :  { %1385 = vmatpush1.bf16.msra.mxu1 %v1352_v23  ;;  %1549 = vmatprep.subr.bf16.mxu0 %v1518_v49 }
 0x83b   :  { %1386 = vmatprep.subr.bf16.mxu1 %v1355_v57 }
 0x83d   :  { %1550 = vmatpush1.bf16.msra.mxu0 %v1517_v50 }
 0x83e   :  { %1387 = vmatpush1.bf16.msra.mxu1 %v1354_v13  ;;  %1551 = vmatprep.subr.bf16.mxu0 %v1520_v45 }
 0x83f   :  { %1388 = vmatprep.subr.bf16.mxu1 %v1357_v14 }
 0x841   :  { %1552 = vmatpush1.bf16.msra.mxu0 %v1519_v46 }
 0x842   :  { %1389 = vmatpush1.bf16.msra.mxu1 %v1356_v15  ;;  %1553 = vmatprep.subr.bf16.mxu0 %v1522_v48 }
 0x843   :  { %1390 = vmatprep.subr.bf16.mxu1 %v1359_v16 }
 0x845   :  { %1554 = vmatpush1.bf16.msra.mxu0 %v1521_v47 }
 0x846   :  { %1391 = vmatpush1.bf16.msra.mxu1 %v1358_v17  ;;  %1555 = vmatprep.subr.bf16.mxu0 %v1524_v51 }
 0x847   :  { %1392 = vmatprep.subr.bf16.mxu1 %v1361_v18 }
 0x849   :  { %1556 = vmatpush1.bf16.msra.mxu0 %v1523_v52 }
 0x84a   :  { %1393 = vmatpush1.bf16.msra.mxu1 %v1360_v61  ;;  %1557 = vmatprep.subr.bf16.mxu0 %v1526_v53 }
 0x84b   :  { %1394 = vmatprep.subr.bf16.mxu1 %v1363_v24 }
 0x84d   :  { %1558 = vmatpush1.bf16.msra.mxu0 %v1525_v54 }
 0x84e   :  { %1395 = vmatpush1.bf16.msra.mxu1 %v1362_v25  ;;  %1559 = vmatprep.subr.bf16.mxu0 %v1528_v8 }
 0x84f   :  { %1396 = vmatprep.subr.bf16.mxu1 %v1365_v26 }
 0x851   :  { %1560 = vmatpush1.bf16.msra.mxu0 %v1527_v9 }
 0x852   :  { %1397 = vmatpush1.bf16.msra.mxu1 %v1364_v27  ;;  %1561 = vmatprep.subr.bf16.mxu0 %v1530_v10 }
 0x853   :  { %1398 = vmatprep.subr.bf16.mxu1 %v1367_v28 }
 0x855   :  { %1562 = vmatpush1.bf16.msra.mxu0 %v1529_v12 }
 0x856   :  { %1399 = vmatpush1.bf16.msra.mxu1 %v1366_v29  ;;  %1563 = vmatprep.subr.bf16.mxu0 %v1532_v19  ;;  %v1414_v19 = vld [vmem:[#allocation6 + $0x21] ss:$8 sm:$0x3] }
 0x857   :  { %1400 = vmatprep.subr.bf16.mxu1 %v1369_v30 }
 0x859   :  { %1564 = vmatpush1.bf16.msra.mxu0 %v1531_v55  ;;  %v1465_v55 = vrot.slane %v1414_v19, %v2444_v36 }
 0x85a   :  { %1401 = vmatpush1.bf16.msra.mxu1 %v1368_v31  ;;  %1565 = vmatprep.subr.bf16.mxu0 %v1534_v0  ;;  %v1469_v0 = vrot.slane %v1414_v19, %v2446_v38 }
 0x85d   :  { %1403 = vmatmul.mubr.bf16.vlgmr.msra.gmra.mrb[12].mxu1 %v1336_v32  ;;  %1566 = vmatpush1.bf16.msra.mxu0 %v1533_v63 }
 0x85e   :  { %1567 = vmatprep.subr.bf16.mxu0 %v1536_v3  ;;  %v1416_v3 = vld [vmem:[#allocation6 + $0x22] ss:$8 sm:$0x3] }
 0x861   :  { %1568 = vmatpush1.bf16.msra.mxu0 %v1535_v4 }
 0x862   :  { %1569 = vmatprep.subr.bf16.mxu0 %v1538_v5 }
 0x865   :  { %1570 = vmatpush1.bf16.msra.mxu0 %v1537_v6 }
 0x930   :  { %v1404_v20 = vpop.f32.mrb[12].mxu1 }
 0x931   :  { %v1406_v21 = vpop.f32.mrb[13].mxu1 }
 0x932   :  { %v1408_v22 = vpop.f32.mrb[14].mxu1 }
 0x933   :  { %v1417_v59 = vadd.f32 %v1408_v22, %v1404_v20  ;;  %v1410_v23 = vpop.f32.mrb[15].mxu1 }
 0x934   :  { %v1424_v57 = vadd.f32 %v1410_v23, %v1406_v21 }
 0x935   :  { %v1418_v13 = vrot.slane %v1417_v59, 4 }
 0x936   :  { %v1425_v14 = vrot.slane %v1424_v57, 4 }
 0x937   :  { %v1419_v15 = vadd.f32 %v1418_v13, %v1417_v59  ;;  %v1494_v59 = vrot.slane %v1416_v3, %v2446_v38 }
 0x938   :  { %v1426_v16 = vadd.f32 %v1425_v14, %v1424_v57 }
 0x939   :  { %v1420_v17 = vrot.slane %v1419_v15, 2 }
 0x93a   :  { %v1427_v18 = vrot.slane %v1426_v16, 2 }
 0x93b   :  { %v1421_v61 = vadd.f32 %v1420_v17, %v1419_v15 }
 0x93c   :  { %v1428_v24 = vadd.f32 %v1427_v18, %v1426_v16 }
 0x93d   :  { %v1422_v25 = vrot.slane %v1421_v61, 1 }
 0x93e   :  { %v1429_v26 = vrot.slane %v1428_v24, 1 }
 0x93f   :  { %v1423_v27 = vadd.f32 %v1422_v25, %v1421_v61 }
 0x940   :  { %v1430_v28 = vadd.f32 %v1429_v26, %v1428_v24 }
 0x941   :  { %v1431_v29 = vmul.f32 0.0625, %v1423_v27 }
 0x942   :  { %v1432_v30 = vmul.f32 0.0625, %v1430_v28 }
 0x943   :  { %v1433_v31 = vsub.f32 %v1404_v20, %v1431_v29  ;;  %v1435_v32 = vsub.f32 %v1408_v22, %v1431_v29 }
 0x944   :  { %v1434_v33 = vsub.f32 %v1406_v21, %v1432_v30  ;;  %v1436_v34 = vsub.f32 %v1410_v23, %v1432_v30  ;;  %v1490_v21 = vrot.slane %v1416_v3, %v2444_v36 }
 0x945   :  { %v1437_v35 = vmul.f32 %v1433_v31, %v1433_v31  ;;  %v1439_v37 = vmul.f32 %v1435_v32, %v1435_v32 }
 0x946   :  { %v1438_v39 = vmul.f32 %v1434_v33, %v1434_v33  ;;  %v1440_v40 = vmul.f32 %v1436_v34, %v1436_v34 }
 0x947   :  { %v1441_v41 = vadd.f32 %v1439_v37, %v1437_v35 }
 0x948   :  { %v1448_v42 = vadd.f32 %v1440_v40, %v1438_v39 }
 0x949   :  { %v1442_v43 = vrot.slane %v1441_v41, 4 }
 0x94a   :  { %v1449_v44 = vrot.slane %v1448_v42, 4 }
 0x94b   :  { %v1443_v49 = vadd.f32 %v1442_v43, %v1441_v41 }
 0x94c   :  { %v1450_v50 = vadd.f32 %v1449_v44, %v1448_v42 }
 0x94d   :  { %v1444_v45 = vrot.slane %v1443_v49, 2 }
 0x94e   :  { %v1451_v46 = vrot.slane %v1450_v50, 2 }
 0x94f   :  { %v1445_v48 = vadd.f32 %v1444_v45, %v1443_v49 }
 0x950   :  { %v1452_v47 = vadd.f32 %v1451_v46, %v1450_v50 }
 0x951   :  { %v1446_v51 = vrot.slane %v1445_v48, 1 }
 0x952   :  { %v1453_v52 = vrot.slane %v1452_v47, 1 }
 0x953   :  { %v1447_v53 = vadd.f32 %v1446_v51, %v1445_v48 }
 0x954   :  { %v1454_v54 = vadd.f32 %v1453_v52, %v1452_v47 }
 0x955   :  { %v1455_v8 = vmul.f32 0.0625, %v1447_v53 }
 0x956   :  { %v1456_v9 = vmul.f32 0.0625, %v1454_v54 }
 0x957   :  { %v1457_v10 = vadd.f32 1e-05, %v1455_v8 }
 0x958   :  { %v1458_v12 = vadd.f32 1e-05, %v1456_v9 }
 0x959   :  { %2187 = vrsqrt.f32 %v1457_v10 }
 0x95a   :  { %2189 = vrsqrt.f32 %v1458_v12 }
 0x963   :  { %v2188_v63 = vpop.eup %2187 }
 0x964   :  { %v2190_v4 = vpop.eup %2189  ;;  %v1472_v5 = vmul.f32 %v2188_v63, %v1465_v55 }
 0x965   :  { %v1473_v6 = vmul.f32 %v2190_v4, %v1469_v0 }
 0x966   :  { %v1477_v20 = vrot.slane %v1472_v5, %v2444_v36 }
 0x967   :  { %v1481_v22 = vrot.slane %v1473_v6, %v2444_v36 }
 0x968   :  { %v1482_v23 = vmul.f32 %v1477_v20, %v1433_v31  ;;  %v1484_v57 = vmul.f32 %v1477_v20, %v1435_v32 }
 0x969   :  { %v1485_v13 = vmul.f32 %v1481_v22, %v1436_v34  ;;  %v1483_v14 = vmul.f32 %v1481_v22, %v1434_v33 }
 0x96a   :  { %v1497_v15 = vadd.f32 %v1490_v21, %v1482_v23  ;;  %v1499_v16 = vadd.f32 %v1490_v21, %v1484_v57 }
 0x96b   :  { %v1498_v17 = vadd.f32 %v1494_v59, %v1483_v14  ;;  %v1500_v18 = vadd.f32 %v1494_v59, %v1485_v13 }
 0x96c   :  { %v1501_v61 = vmax.f32 %v1497_v15, 0.0  ;;  %v1503_v24 = vmax.f32 %v1499_v16, 0.0 }
 0x96d   :  { %v1502_v25 = vmax.f32 %v1498_v17, 0.0  ;;  %v1504_v26 = vmax.f32 %v1500_v18, 0.0  ;;  %v1583_v17 = vld [vmem:[#allocation6 + $0x23] ss:$8 sm:$0x3] }
 0x96e   :  { %v1505_v27 = vpack.c.bf16 %v1503_v24, %v1501_v61  ;;  %v1634_v18 = vrot.slane %v1583_v17, %v2444_v36  ;;  %v1638_v61 = vrot.slane %v1583_v17, %v2446_v38 }
 0x96f   :  { %v1506_v28 = vpack.c.bf16 %v1504_v26, %v1502_v25  ;;  %v1585_v25 = vld [vmem:[#allocation6 + $0x24] ss:$8 sm:$0x3] }
 0x971   :  { %1571 = vmatprep.mubr.bf16.mxu0 %v1506_v28 }
 0x972   :  { %1572 = vmatmul.mubr.bf16.vlgmr.msra.gmra.mrb[16].mxu0 %v1505_v27 }
 0xa45   :  { %v1573_v29 = vpop.f32.mrb[16].mxu0 }
 0xa46   :  { %v1575_v30 = vpop.f32.mrb[17].mxu0 }
 0xa47   :  { %v1577_v35 = vpop.f32.mrb[18].mxu0 }
 0xa48   :  { %v1586_v37 = vadd.f32 %v1577_v35, %v1573_v29  ;;  %v1579_v31 = vpop.f32.mrb[19].mxu0 }
 0xa49   :  { %v1593_v32 = vadd.f32 %v1579_v31, %v1575_v30 }
 0xa4a   :  { %v1587_v34 = vrot.slane %v1586_v37, 4 }
 0xa4b   :  { %v1594_v33 = vrot.slane %v1593_v32, 4 }
 0xa4c   :  { %v1588_v39 = vadd.f32 %v1587_v34, %v1586_v37  ;;  %v1663_v37 = vrot.slane %v1585_v25, %v2446_v38 }
 0xa4d   :  { %v1595_v40 = vadd.f32 %v1594_v33, %v1593_v32 }
 0xa4e   :  { %v1589_v41 = vrot.slane %v1588_v39, 2 }
 0xa4f   :  { %v1596_v42 = vrot.slane %v1595_v40, 2 }
 0xa50   :  { %v1590_v43 = vadd.f32 %v1589_v41, %v1588_v39 }
 0xa51   :  { %v1597_v44 = vadd.f32 %v1596_v42, %v1595_v40 }
 0xa52   :  { %v1591_v49 = vrot.slane %v1590_v43, 1 }
 0xa53   :  { %v1598_v50 = vrot.slane %v1597_v44, 1 }
 0xa54   :  { %v1592_v45 = vadd.f32 %v1591_v49, %v1590_v43 }
 0xa55   :  { %v1599_v46 = vadd.f32 %v1598_v50, %v1597_v44 }
 0xa56   :  { %v1600_v48 = vmul.f32 0.0625, %v1592_v45 }
 0xa57   :  { %v1601_v47 = vmul.f32 0.0625, %v1599_v46 }
 0xa58   :  { %v1602_v51 = vsub.f32 %v1573_v29, %v1600_v48  ;;  %v1604_v52 = vsub.f32 %v1577_v35, %v1600_v48 }
 0xa59   :  { %v1603_v53 = vsub.f32 %v1575_v30, %v1601_v47  ;;  %v1605_v54 = vsub.f32 %v1579_v31, %v1601_v47  ;;  %v1659_v30 = vrot.slane %v1585_v25, %v2444_v36 }
 0xa5a   :  { %v1606_v8 = vmul.f32 %v1602_v51, %v1602_v51  ;;  %v1608_v9 = vmul.f32 %v1604_v52, %v1604_v52 }
 0xa5b   :  { %v1607_v10 = vmul.f32 %v1603_v53, %v1603_v53  ;;  %v1609_v12 = vmul.f32 %v1605_v54, %v1605_v54 }
 0xa5c   :  { %v1610_v19 = vadd.f32 %v1608_v9, %v1606_v8 }
 0xa5d   :  { %v1617_v55 = vadd.f32 %v1609_v12, %v1607_v10 }
 0xa5e   :  { %v1611_v0 = vrot.slane %v1610_v19, 4 }
 0xa5f   :  { %v1618_v63 = vrot.slane %v1617_v55, 4 }
 0xa60   :  { %v1612_v3 = vadd.f32 %v1611_v0, %v1610_v19 }
 0xa61   :  { %v1619_v4 = vadd.f32 %v1618_v63, %v1617_v55 }
 0xa62   :  { %v1613_v5 = vrot.slane %v1612_v3, 2 }
 0xa63   :  { %v1620_v6 = vrot.slane %v1619_v4, 2 }
 0xa64   :  { %v1614_v20 = vadd.f32 %v1613_v5, %v1612_v3 }
 0xa65   :  { %v1621_v21 = vadd.f32 %v1620_v6, %v1619_v4 }
 0xa66   :  { %v1615_v22 = vrot.slane %v1614_v20, 1 }
 0xa67   :  { %v1622_v59 = vrot.slane %v1621_v21, 1 }
 0xa68   :  { %v1616_v23 = vadd.f32 %v1615_v22, %v1614_v20 }
 0xa69   :  { %v1623_v57 = vadd.f32 %v1622_v59, %v1621_v21 }
 0xa6a   :  { %v1624_v13 = vmul.f32 0.0625, %v1616_v23 }
 0xa6b   :  { %v1625_v14 = vmul.f32 0.0625, %v1623_v57 }
 0xa6c   :  { %v1626_v15 = vadd.f32 1e-05, %v1624_v13 }
 0xa6d   :  { %v1627_v16 = vadd.f32 1e-05, %v1625_v14 }
 0xa6e   :  { %2191 = vrsqrt.f32 %v1626_v15 }
 0xa6f   :  { %2193 = vrsqrt.f32 %v1627_v16 }
 0xa78   :  { %v2192_v24 = vpop.eup %2191 }
 0xa79   :  { %v2194_v26 = vpop.eup %2193  ;;  %v1641_v27 = vmul.f32 %v2192_v24, %v1634_v18 }
 0xa7a   :  { %v1642_v28 = vmul.f32 %v2194_v26, %v1638_v61 }
 0xa7b   :  { %v1646_v29 = vrot.slane %v1641_v27, %v2444_v36 }
 0xa7c   :  { %v1650_v35 = vrot.slane %v1642_v28, %v2444_v36 }
 0xa7d   :  { %v1651_v31 = vmul.f32 %v1646_v29, %v1602_v51  ;;  %v1653_v32 = vmul.f32 %v1646_v29, %v1604_v52 }
 0xa7e   :  { %v1652_v34 = vmul.f32 %v1650_v35, %v1603_v53  ;;  %v1654_v33 = vmul.f32 %v1650_v35, %v1605_v54 }
 0xa7f   :  { %v1666_v39 = vadd.f32 %v1659_v30, %v1651_v31  ;;  %v1668_v40 = vadd.f32 %v1659_v30, %v1653_v32 }
 0xa80   :  { %v1667_v41 = vadd.f32 %v1663_v37, %v1652_v34  ;;  %v1669_v42 = vadd.f32 %v1663_v37, %v1654_v33 }
 0xa81   :  { %v1670_v43 = vadd.f32 %v1666_v39, %v1330_v60  ;;  %v1672_v44 = vadd.f32 %v1668_v40, %v1332_v62 }
 0xa82   :  { %v1671_v49 = vadd.f32 %v1667_v41, %v1331_v7  ;;  %v1673_v36 = vadd.f32 %v1669_v42, %v1333_v11 }
 0xa83   :  { %v1674_v38 = vmax.f32 %v1670_v43, 0.0  ;;  %v1676_v50 = vmax.f32 %v1672_v44, 0.0 }
 0xa84   :  { %v1675_v45 = vmax.f32 %v1671_v49, 0.0  ;;  %v1677_v46 = vmax.f32 %v1673_v36, 0.0 }
 0xa85   :  { %2275 = dma.done.wait [#allocation5 + $0x4], 6144 }
 0xa86   :  { %2276 = vsyncadd [#allocation5 + $0x4], 4294961152  ;;  %v1683_v48 = vpack.c.bf16 %v1677_v46, %v1675_v45  ;;  %v1692_v47 = vld [vmem:[#allocation4 + $0xc0] sm:$0xff]  ;;  %v1693_v60 = vld [vmem:[#allocation4 + $0xc8] sm:$0xff]  ;;  %v1682_v19 = vpack.c.bf16 %v1676_v50, %v1674_v38  ;;  %v2301_v15 = vmov 0.0   ;;  %vm2302_vm0 = vmmov 0  }
 0xa87   :  { %v1684_v56 = vld [vmem:[#allocation4 + $0x80] sm:$0xff]  ;;  %2030 = vmatprep.subr.bf16.mxu1 %v1692_v47  ;;  %v1685_v58 = vld [vmem:[#allocation4 + $0x88] sm:$0xff]  ;;  %v1694_v1 = vld [vmem:[#allocation4 + $0xd0] sm:$0xff]  ;;  %2092 = vmatprep.subr.bf16.mxu0 %v2301_v15  ;;  %s2303_s4 = smov [#allocation9]  }
 0xa88   :  { %1733 = vmatprep.mubr.bf16.mxu1 %v1683_v48  ;;  %2031 = vmatpush3.bf16.msra.mxu1 %v1684_v56  ;;  %v1686_v2 = vld [vmem:[#allocation4 + $0x90] sm:$0xff]  ;;  %v1695_v62 = vld [vmem:[#allocation4 + $0xd8] sm:$0xff]  ;;  %v1696_v11 = vld [vmem:[#allocation4 + $0xe0] sm:$0xff]  ;;  %s1971_s26 = sshll.u32 %s2303_s4, 4  ;;  %s1972_s26 = int_to_ptr.vmem [resolvable:$true] %s1971_s26 }
 0xa89   :  { %2032 = vmatprep.subr.bf16.mxu1 %v1693_v60  ;;  %v1687_v7 = vld [vmem:[#allocation4 + $0x98] sm:$0xff]  ;;  %v1688_v51 = vld [vmem:[#allocation4 + $0xa0] sm:$0xff]  ;;  %v1697_v52 = vld [vmem:[#allocation4 + $0xe8] sm:$0xff]  ;;  %2108 = vmatprep.mubr.msk.bf16.mxu0 %vm2302_vm0, %v2301_v15  ;;  %s2243_s27 = scalar_lea.vmem %s1972_s26, 256  ;;  %p2248_p3 = scmp.lt.s32.totalorder %s1972_s26, %s1972_s26 }
 0xa8a   :  { %v1689_v53 = vld [vmem:[#allocation4 + $0xa8] sm:$0xff]  ;;  %v1698_v54 = vld [vmem:[#allocation4 + $0xf0] sm:$0xff]  ;;  %v1699_v9 = vld [vmem:[#allocation4 + $0xf8] sm:$0xff]  ;;  %p2244_p2 = scmp.ne.s32.totalorder %s1972_s26, %s2243_s27  ;;  %p2249_p4 = scmp.lt.s32.totalorder %s2243_s27, %s2243_s27 }
 0xa8b   :  { %v1690_v8 = vld [vmem:[#allocation4 + $0xb0] sm:$0xff]  ;;  %v1691_v10 = vld [vmem:[#allocation4 + $0xb8] sm:$0xff]  ;;  %v1750_v12 = vld [vmem:[#allocation4 + $0x40] sm:$0xff] }
 0xa8c   :  { %2033 = vmatpush3.bf16.msra.mxu1 %v1685_v58  ;;  %v1742_v55 = vld [vmem:[#allocation4] sm:$0xff]  ;;  %v1751_v0 = vld [vmem:[#allocation4 + $0x48] sm:$0xff]  ;;  %v1752_v3 = vld [vmem:[#allocation4 + $0x50] sm:$0xff]  ;;  %p2250_p5 = por %p2249_p4, %p2248_p3 }
 0xa8d   :  { %2034 = vmatprep.subr.bf16.mxu1 %v1694_v1  ;;  %v1743_v63 = vld [vmem:[#allocation4 + $0x8] sm:$0xff]  ;;  %v1744_v4 = vld [vmem:[#allocation4 + $0x10] sm:$0xff]  ;;  %v1753_v5 = vld [vmem:[#allocation4 + $0x58] sm:$0xff] }
 0xa8e   :  { %v1745_v6 = vld [vmem:[#allocation4 + $0x18] sm:$0xff]  ;;  %v1754_v20 = vld [vmem:[#allocation4 + $0x60] sm:$0xff]  ;;  %v1755_v22 = vld [vmem:[#allocation4 + $0x68] sm:$0xff]  ;;  %p2251_p6 = pnand %p2250_p5, %p2244_p2 }
 0xa8f   :  { %v1746_v21 = vld [vmem:[#allocation4 + $0x20] sm:$0xff]  ;;  %v1747_v59 = vld [vmem:[#allocation4 + $0x28] sm:$0xff]  ;;  %v1756_v23 = vld [vmem:[#allocation4 + $0x70] sm:$0xff] }
 0xa90   :  { %2035 = vmatpush3.bf16.msra.mxu1 %v1686_v2  ;;  %v1748_v57 = vld [vmem:[#allocation4 + $0x30] sm:$0xff]  ;;  %v1757_v13 = vld [vmem:[#allocation4 + $0x78] sm:$0xff]  ;;  %v1831_v16 = vld [vmem:[#allocation4 + $0x100] sm:$0xff] }
 0xa91   :  { %2036 = vmatprep.subr.bf16.mxu1 %v1695_v62  ;;  %v1749_v14 = vld [vmem:[#allocation4 + $0x38] sm:$0xff]  ;;  %2093 = vmatpush3.bf16.msra.mxu0 %v1831_v16  ;;  %v1832_v17 = vld [vmem:[#allocation4 + $0x108] sm:$0xff]  ;;  %v1833_v18 = vld [vmem:[#allocation4 + $0x110] sm:$0xff] }
 0xa92   :  { %2094 = vmatprep.subr.bf16.mxu0 %v2301_v15  ;;  %v1834_v61 = vld [vmem:[#allocation4 + $0x118] sm:$0xff]  ;;  %v1835_v24 = vld [vmem:[#allocation4 + $0x120] sm:$0xff]  ;;  %v1836_v25 = vld [vmem:[#allocation4 + $0x128] sm:$0xff] }
 0xa93   :  { %v1837_v26 = vld [vmem:[#allocation4 + $0x130] sm:$0xff]  ;;  %v1838_v27 = vld [vmem:[#allocation4 + $0x138] sm:$0xff] }
 0xa94   :  { %2037 = vmatpush3.bf16.msra.mxu1 %v1687_v7 }
 0xa95   :  { %2038 = vmatprep.subr.bf16.mxu1 %v1696_v11  ;;  %2095 = vmatpush3.bf16.msra.mxu0 %v1832_v17 }
 0xa96   :  { %2096 = vmatprep.subr.bf16.mxu0 %v2301_v15 }
 0xa98   :  { %2039 = vmatpush3.bf16.msra.mxu1 %v1688_v51 }
 0xa99   :  { %2040 = vmatprep.subr.bf16.mxu1 %v1697_v52  ;;  %2097 = vmatpush3.bf16.msra.mxu0 %v1833_v18 }
 0xa9a   :  { %2098 = vmatprep.subr.bf16.mxu0 %v2301_v15 }
 0xa9c   :  { %2041 = vmatpush3.bf16.msra.mxu1 %v1689_v53  ;;  %v1799_v53 = vld [vmem:[#allocation6 + $0x25] ss:$0 sm:$0xff] }
 0xa9d   :  { %2042 = vmatprep.subr.bf16.mxu1 %v1698_v54  ;;  %2099 = vmatpush3.bf16.msra.mxu0 %v1834_v61 }
 0xa9e   :  { %2100 = vmatprep.subr.bf16.mxu0 %v2301_v15 }
 0xaa0   :  { %2043 = vmatpush3.bf16.msra.mxu1 %v1690_v8 }
 0xaa1   :  { %2044 = vmatprep.subr.bf16.mxu1 %v1699_v9  ;;  %2101 = vmatpush3.bf16.msra.mxu0 %v1835_v24  ;;  %v1800_v9 = vld [vmem:[#allocation6 + $0x26] ss:$0 sm:$0xff] }
 0xaa2   :  { %2102 = vmatprep.subr.bf16.mxu0 %v2301_v15 }
 0xaa4   :  { %2045 = vmatpush3.bf16.msra.mxu1 %v1691_v10 }
 0xaa5   :  { %2052 = vmatprep.subr.bf16.mxu1 %v1750_v12  ;;  %2103 = vmatpush3.bf16.msra.mxu0 %v1836_v25 }
 0xaa6   :  { %2104 = vmatprep.subr.bf16.mxu0 %v2301_v15 }
 0xaa7   :  { %1734 = vmatmul.mubr.bf16.vlgmr.msra.gmra.mrb[16].mxu1 %v1682_v19 }
 0xaa8   :  { %2053 = vmatpush3.bf16.msra.mxu1 %v1742_v55  ;;  %1790 = vmatprep.mubr.bf16.mxu1 %v1683_v48 }
 0xaa9   :  { %2054 = vmatprep.subr.bf16.mxu1 %v1751_v0  ;;  %2105 = vmatpush3.bf16.msra.mxu0 %v1837_v26 }
 0xaaa   :  { %2106 = vmatprep.subr.bf16.mxu0 %v2301_v15 }
 0xaac   :  { %2055 = vmatpush3.bf16.msra.mxu1 %v1743_v63 }
 0xaad   :  { %2056 = vmatprep.subr.bf16.mxu1 %v1752_v3  ;;  %2107 = vmatpush3.bf16.msra.mxu0 %v1838_v27 }
 0xab0   :  { %2057 = vmatpush3.bf16.msra.mxu1 %v1744_v4  ;;  %v1914_v4 = vld [vmem:[#allocation4 + $0x140] sm:$0xff] }
 0xab1   :  { %2058 = vmatprep.subr.bf16.mxu1 %v1753_v5  ;;  %v1915_v5 = vld [vmem:[#allocation4 + $0x148] sm:$0xff] }
 0xab4   :  { %2059 = vmatpush3.bf16.msra.mxu1 %v1745_v6  ;;  %v1916_v6 = vld [vmem:[#allocation4 + $0x150] sm:$0xff] }
 0xab5   :  { %2060 = vmatprep.subr.bf16.mxu1 %v1754_v20  ;;  %v1917_v20 = vld [vmem:[#allocation4 + $0x158] sm:$0xff] }
 0xab8   :  { %2061 = vmatpush3.bf16.msra.mxu1 %v1746_v21  ;;  %v1918_v21 = vld [vmem:[#allocation4 + $0x160] sm:$0xff] }
 0xab9   :  { %2062 = vmatprep.subr.bf16.mxu1 %v1755_v22  ;;  %v1919_v22 = vld [vmem:[#allocation4 + $0x168] sm:$0xff] }
 0xabc   :  { %2063 = vmatpush3.bf16.msra.mxu1 %v1747_v59  ;;  %v1920_v59 = vld [vmem:[#allocation4 + $0x170] sm:$0xff] }
 0xabd   :  { %2064 = vmatprep.subr.bf16.mxu1 %v1756_v23  ;;  %v1921_v23 = vld [vmem:[#allocation4 + $0x178] sm:$0xff] }
 0xac0   :  { %2065 = vmatpush3.bf16.msra.mxu1 %v1748_v57 }
 0xac1   :  { %2066 = vmatprep.subr.bf16.mxu1 %v1757_v13 }
 0xac4   :  { %2067 = vmatpush3.bf16.msra.mxu1 %v1749_v14 }
 0xac5   :  { %2112 = vmatprep.subr.bf16.mxu1 %v2301_v15 }
 0xac7   :  { %1791 = vmatmul.mubr.bf16.vlgmr.msra.gmra.mrb[20].mxu1 %v1682_v19 }
 0xac8   :  { %2128 = vmatprep.mubr.msk.bf16.mxu1 %vm2302_vm0, %v2301_v15  ;;  %2113 = vmatpush3.bf16.msra.mxu1 %v1914_v4 }
 0xac9   :  { %2114 = vmatprep.subr.bf16.mxu1 %v2301_v15 }
 0xacc   :  { %2115 = vmatpush3.bf16.msra.mxu1 %v1915_v5 }
 0xacd   :  { %2116 = vmatprep.subr.bf16.mxu1 %v2301_v15 }
 0xad0   :  { %2117 = vmatpush3.bf16.msra.mxu1 %v1916_v6 }
 0xad1   :  { %2118 = vmatprep.subr.bf16.mxu1 %v2301_v15 }
 0xad4   :  { %2119 = vmatpush3.bf16.msra.mxu1 %v1917_v20 }
 0xad5   :  { %2120 = vmatprep.subr.bf16.mxu1 %v2301_v15 }
 0xad8   :  { %2121 = vmatpush3.bf16.msra.mxu1 %v1918_v21 }
 0xad9   :  { %2122 = vmatprep.subr.bf16.mxu1 %v2301_v15 }
 0xadc   :  { %2123 = vmatpush3.bf16.msra.mxu1 %v1919_v22 }
 0xadd   :  { %2124 = vmatprep.subr.bf16.mxu1 %v2301_v15 }
 0xae0   :  { %2125 = vmatpush3.bf16.msra.mxu1 %v1920_v59 }
 0xae1   :  { %2126 = vmatprep.subr.bf16.mxu1 %v2301_v15 }
 0xae4   :  { %2127 = vmatpush3.bf16.msra.mxu1 %v1921_v23 }
 0xb7a   :  { %v2046_v28 = vpop.f32.mrb[16].mxu1 }
 0xb7b   :  { %v2047_v29 = vpop.f32.mrb[17].mxu1 }
 0xb7c   :  { %v2597_v30 = vadd.f32 %v2047_v29, %v2046_v28  ;;  %v2049_v35 = vpop.f32.mrb[18].mxu1 }
 0xb7d   :  { %v2050_v37 = vpop.f32.mrb[19].mxu1 }
 0xb7e   :  { %v2599_v31 = vadd.f32 %v2050_v37, %v2049_v35 }
 0xb9a   :  { %v2068_v32 = vpop.f32.mrb[20].mxu1 }
 0xb9b   :  { %v2069_v34 = vpop.f32.mrb[21].mxu1 }
 0xb9c   :  { %v2070_v33 = vadd.f32 %v2069_v34, %v2068_v32  ;;  %v2071_v39 = vpop.f32.mrb[22].mxu1 }
 0xb9d   :  { %v2072_v40 = vpop.f32.mrb[23].mxu1 }
 0xb9e   :  { %v2073_v41 = vadd.f32 %v2072_v40, %v2071_v39 }
 0xba0   :  { %v1801_v42 = vadd.f32 %v2073_v41, %v2070_v33 }
 0xba2   :  { %v1802_v43 = vrot.slane %v1801_v42, 4 }
 0xba4   :  { %v1803_v44 = vadd.f32 %v1802_v43, %v1801_v42 }
 0xba6   :  { %v1804_v49 = vrot.slane %v1803_v44, 2 }
 0xba8   :  { %v1805_v36 = vadd.f32 %v1804_v49, %v1803_v44  ;;  %v1880_v49 = vld [vmem:[#allocation6 + $0x27] ss:$0 sm:$0xff] }
 0xbaa   :  { %v1806_v38 = vrot.slane %v1805_v36, 1 }
 0xbac   :  { %v1807_v50 = vadd.f32 %v1806_v38, %v1805_v36 }
 0xbae   :  { %v1808_v45 = vmul.f32 0.0625, %v1807_v50  ;;  %v1700_v50 = vld [vmem:[#allocation6 + $0x31] ss:$0 sm:$0xff] }
 0xbb0   :  { %v1809_v46 = vsub.f32 %v2070_v33, %v1808_v45  ;;  %v1810_v48 = vsub.f32 %v2073_v41, %v1808_v45  ;;  %v1881_v45 = vld [vmem:[#allocation6 + $0x30] ss:$0 sm:$0xff] }
 0xbb2   :  { %v1811_v47 = vmul.f32 %v1809_v46, %v1809_v46  ;;  %v1812_v56 = vmul.f32 %v1810_v48, %v1810_v48 }
 0xbb4   :  { %v1813_v60 = vadd.f32 %v1812_v56, %v1811_v47  ;;  %v1736_v47 = vadd.f32 %v2597_v30, %v1700_v50  ;;  %v1739_v56 = vadd.f32 %v2599_v31, %v1700_v50 }
 0xbb6   :  { %v1814_v58 = vrot.slane %v1813_v60, 4 }
 0xbb8   :  { %v1815_v1 = vadd.f32 %v1814_v58, %v1813_v60 }
 0xbba   :  { %v1816_v2 = vrot.slane %v1815_v1, 2 }
 0xbbc   :  { %v1817_v62 = vadd.f32 %v1816_v2, %v1815_v1 }
 0xbbe   :  { %v1818_v7 = vrot.slane %v1817_v62, 1 }
 0xbc0   :  { %v1819_v11 = vadd.f32 %v1818_v7, %v1817_v62 }
 0xbc2   :  { %v1820_v51 = vmul.f32 0.0625, %v1819_v11 }
 0xbc4   :  { %v1821_v52 = vadd.f32 1e-05, %v1820_v51  ;;  %v1922_v51 = vld [vmem:[#allocation6 + $0x32] ss:$0 sm:$0xff] }
 0xbc6   :  { %2195 = vrsqrt.f32 %v1821_v52 }
 0xbd0   :  { %v2196_v54 = vpop.eup %2195 }
 0xbd1   :  { %v1823_v8 = vmul.f32 %v2196_v54, %v1799_v53 }
 0xbd3   :  { %v1825_v10 = vmul.f32 %v1823_v8, %v1810_v48  ;;  %v1824_v12 = vmul.f32 %v1823_v8, %v1809_v46 }
 0xbd5   :  { %v1826_v19 = vadd.f32 %v1824_v12, %v1800_v9  ;;  %v1827_v55 = vadd.f32 %v1825_v10, %v1800_v9 }
 0xbd7   :  { %v1828_v0 = vmax.f32 %v1826_v19, 0.0  ;;  %v1829_v63 = vmax.f32 %v1827_v55, 0.0 }
 0xbd9   :  { %v1830_v3 = vpack.c.bf16 %v1829_v63, %v1828_v0 }
 0xbdb   :  { %2109 = vmatmul.mubr.bf16.vlgmr.msra.gmra.mrb[20].mxu0 %v1830_v3 }
 0xcae   :  { %v1873_v57 = vpop.f32.mrb[20].mxu0 }
 0xcaf   :  { %v2110_v13 = vpop.f32.mrb[21].mxu0 }
 0xcb0   :  { %v1876_v14 = vpop.f32.mrb[22].mxu0 }
 0xcb1   :  { %v1882_v16 = vadd.f32 %v1876_v14, %v1873_v57  ;;  %v2111_v17 = vpop.f32.mrb[23].mxu0 }
 0xcb3   :  { %v1883_v18 = vrot.slane %v1882_v16, 4 }
 0xcb5   :  { %v1884_v61 = vadd.f32 %v1883_v18, %v1882_v16 }
 0xcb7   :  { %v1885_v24 = vrot.slane %v1884_v61, 2 }
 0xcb9   :  { %v1886_v25 = vadd.f32 %v1885_v24, %v1884_v61 }
 0xcbb   :  { %v1887_v26 = vrot.slane %v1886_v25, 1 }
 0xcbd   :  { %v1888_v27 = vadd.f32 %v1887_v26, %v1886_v25 }
 0xcbf   :  { %v1889_v28 = vmul.f32 0.0625, %v1888_v27 }
 0xcc1   :  { %v1890_v29 = vsub.f32 %v1873_v57, %v1889_v28  ;;  %v1891_v35 = vsub.f32 %v1876_v14, %v1889_v28 }
 0xcc3   :  { %v1892_v37 = vmul.f32 %v1890_v29, %v1890_v29  ;;  %v1893_v32 = vmul.f32 %v1891_v35, %v1891_v35 }
 0xcc5   :  { %v1894_v34 = vadd.f32 %v1893_v32, %v1892_v37 }
 0xcc7   :  { %v1895_v15 = vrot.slane %v1894_v34, 4 }
 0xcc9   :  { %v1896_v33 = vadd.f32 %v1895_v15, %v1894_v34 }
 0xccb   :  { %v1897_v39 = vrot.slane %v1896_v33, 2 }
 0xccd   :  { %v1898_v40 = vadd.f32 %v1897_v39, %v1896_v33 }
 0xccf   :  { %v1899_v41 = vrot.slane %v1898_v40, 1 }
 0xcd1   :  { %v1900_v42 = vadd.f32 %v1899_v41, %v1898_v40 }
 0xcd3   :  { %v1901_v43 = vmul.f32 0.0625, %v1900_v42 }
 0xcd5   :  { %v1902_v44 = vadd.f32 1e-05, %v1901_v43 }
 0xcd7   :  { %2197 = vrsqrt.f32 %v1902_v44 }
 0xce1   :  { %v2198_v36 = vpop.eup %2197 }
 0xce2   :  { %v1904_v38 = vmul.f32 %v2198_v36, %v1880_v49 }
 0xce4   :  { %v1905_v46 = vmul.f32 %v1904_v38, %v1890_v29  ;;  %v1906_v48 = vmul.f32 %v1904_v38, %v1891_v35 }
 0xce6   :  { %v1907_v60 = vadd.f32 %v1905_v46, %v1881_v45  ;;  %v1908_v58 = vadd.f32 %v1906_v48, %v1881_v45 }
 0xce8   :  { %v1909_v1 = vadd.f32 %v1907_v60, %v1736_v47  ;;  %v1910_v2 = vadd.f32 %v1908_v58, %v1739_v56 }
 0xcea   :  { %v1912_v62 = vmax.f32 %v1910_v2, 0.0  ;;  %v1911_v7 = vmax.f32 %v1909_v1, 0.0 }
 0xcec   :  { %v1913_v11 = vpack.c.bf16 %v1912_v62, %v1911_v7 }
 0xcee   :  { %2129 = vmatmul.mubr.bf16.vlgmr.msra.gmra.mrb[24].mxu1 %v1913_v11 }
 0xdc1   :  { %v1957_v52 = vpop.f32.mrb[24].mxu1 }
 0xdc2   :  { %v1958_v53 = vadd.f32 %v1957_v52, %v1922_v51  ;;  %v2130_v54 = vpop.f32.mrb[25].mxu1 }
 0xdc3   :  { %v1960_v8 = vpop.f32.mrb[26].mxu1 }
 0xdc4   :  { %1964 = vst [vmem:[#allocation9] sm:$0xff] %v1958_v53  ;;  %v1961_v9 = vadd.f32 %v1960_v8, %v1922_v51  ;;  %v2131_v30 = vpop.f32.mrb[27].mxu1 }
 0xdc6   :  { %1965 = vst [vmem:[#allocation9 + $0x8] sm:$0xff] %v1961_v9 }
 0xdc7   :  { %2254 = shalt.err (!%p2251_p6)
}
 0xdc8   :  { %s2255_s6 = scalar_lea.hbm %s2629_s5, 256 }
 0xdc9   :  { %p2256_p7 = scmp.ne.s32.totalorder %s2629_s5, %s2255_s6  ;;  %p2259_p8 = scmp.lt.u32.totalorder %s2255_s6, %s2629_s5 }
 0xdcb   :  { %p2261_p9 = pnand %p2259_p8, %p2256_p7 }
 0xdcd   :  { %2264 = shalt.err (!%p2261_p9)
}
 0xdce   :  { %s2304_s15 = smov 8  }
 0xdcf   :  { %1977 = dma.vmem_to_hbm [thread:$0]  %s1972_s26, 256, %s2629_s5, [#allocation8], %s2287_s11, %s2287_s11, %s2304_s15  }
 0xdd0   :  { %2277 = dma.done.wait [#allocation8], 256  }
 0xdd1   :  { %2278 = vsyncadd [#allocation8], 4294967040 }
 0xdd2   :  { %1981 = vsyncpa [#allocation7], 1 }
 0xdd3   :  { %1982 = vsyncpa [#allocation8], 1 }
 0xdd4   :  { %1983 = vsyncmov [#allocation5] }
 0xdd7   :  { %s1984_s17 = vpop.sfrf %1983 }
 0xdd8   :  { %p2025_p10 = scmp.ne.s32.totalorder %s1984_s17, 0 }
 0xdda   :  { %1988 = shalt.err (%p2025_p10)  }
 0xddb   :  { %1990 = vsyncmov [#allocation5 + $0x1] }
 0xdde   :  { %s1991_s18 = vpop.sfrf %1990 }
 0xddf   :  { %p2026_p11 = scmp.ne.s32.totalorder %s1991_s18, 0 }
 0xde1   :  { %1995 = shalt.err (%p2026_p11)  }
 0xde2   :  { %1997 = vsyncmov [#allocation5 + $0x2] }
 0xde5   :  { %s1998_s3 = vpop.sfrf %1997 }
 0xde6   :  { %p2027_p12 = scmp.ne.s32.totalorder %s1998_s3, 0 }
 0xde8   :  { %2002 = shalt.err (%p2027_p12)  }
 0xde9   :  { %2004 = vsyncmov [#allocation5 + $0x3] }
 0xdec   :  { %s2005_s19 = vpop.sfrf %2004 }
 0xded   :  { %p2028_p13 = scmp.ne.s32.totalorder %s2005_s19, 0 }
 0xdef   :  { %2009 = shalt.err (%p2028_p13)  }
 0xdf0   :  { %2011 = vsyncmov [#allocation5 + $0x4] }
 0xdf3   :  { %s2012_s5 = vpop.sfrf %2011 }
 0xdf4   :  { %p2029_p0 = scmp.ne.s32.totalorder %s2012_s5, 0 }
 0xdf6   :  { %2016 = shalt.err (%p2029_p0)  }

</bundles_post_ra>
